<compile_context>
chip_gen: v6e
topology: v6e:2x2x1
jax: 0.10.0
libtpu: 0.0.40
codegen_flags: <defaults>
</compile_context>

<pallas_src>
import jax
import jax.numpy as jnp
from jax import lax
from jax.experimental import pallas as pl
from jax.experimental.pallas import tpu as pltpu

SEQ_LEN = 30          # T, fixed by the module (reshape(-1, 30 * 16))
IN_FEAT = 68 * 2      # 136
H1 = 32               # hidden size of first biLSTM (per direction)
H2 = 8                # hidden size of second biLSTM (per direction)
FC1 = 64
FC2 = 8
BN_EPS = 1e-5         # PyTorch BatchNorm1d default


# ---------------------------------------------------------------------------
# Kernel
# ---------------------------------------------------------------------------
def _disc_kernel(
    # inputs
    x_ref,                                                # (T, B, 136)
    l1f_wih_ref, l1f_whh_ref, l1f_b_ref,                  # (4,136,32) (4,32,32) (4,1,32)
    l1b_wih_ref, l1b_whh_ref, l1b_b_ref,
    l2f_wihf_ref, l2f_wihb_ref, l2f_whh_ref, l2f_b_ref,   # (4,32,8) (4,32,8) (4,8,8) (4,1,8)
    l2b_wihf_ref, l2b_wihb_ref, l2b_whh_ref, l2b_b_ref,
    fcw1f_ref, fcw1b_ref, fcb1_ref,                       # (T,8,64) (T,8,64) (1,64)
    bn1s_ref, bn1h_ref,                                   # (1,64) (1,64)
    fcw2_ref, fcb2_ref, bn2s_ref, bn2h_ref,               # (64,8) (1,8) (1,8) (1,8)
    fcw3_ref, fcb3_ref,                                   # (1,8) (1,1)
    # output
    out_ref,                                              # (B, 1)
    # scratch
    h1f_scr, h1b_scr,                                     # (T, B, 32) VMEM
):
    f32 = jnp.float32
    T, B = x_ref.shape[0], x_ref.shape[1]

    def sigmoid(v):
        return 1.0 / (1.0 + jnp.exp(-v))

    def gate_pre(k, xw_pairs, h, whh_ref, b_ref):
        pre = jnp.dot(h, whh_ref[k], preferred_element_type=f32) + b_ref[k]
        for xv, w_ref in xw_pairs:
            pre = pre + jnp.dot(xv, w_ref[k], preferred_element_type=f32)
        return pre

    def lstm_step(xw_pairs, h, c, whh_ref, b_ref):
        # PyTorch gate ordering: i, f, g, o
        i = sigmoid(gate_pre(0, xw_pairs, h, whh_ref, b_ref))
        f = sigmoid(gate_pre(1, xw_pairs, h, whh_ref, b_ref))
        g = jnp.tanh(gate_pre(2, xw_pairs, h, whh_ref, b_ref))
        o = sigmoid(gate_pre(3, xw_pairs, h, whh_ref, b_ref))
        c_new = f * c + i * g
        h_new = o * jnp.tanh(c_new)
        return h_new, c_new

    # ---- layer 1 (bidirectional), per-timestep outputs staged in VMEM ------
    def l1_body(t, carry, wih_ref, whh_ref, b_ref, out_scr):
        h, c = carry
        x_t = x_ref[t]                                    # (B, 136)
        h, c = lstm_step([(x_t, wih_ref)], h, c, whh_ref, b_ref)
        out_scr[t, :, :] = h
        return h, c

    z1 = (jnp.zeros((B, H1), f32), jnp.zeros((B, H1), f32))
    lax.fori_loop(
        0, T,
        lambda t, carry: l1_body(t, carry, l1f_wih_ref, l1f_whh_ref, l1f_b_ref, h1f_scr),
        z1)
    lax.fori_loop(
        0, T,
        lambda k, carry: l1_body(T - 1 - k, carry, l1b_wih_ref, l1b_whh_ref, l1b_b_ref, h1b_scr),
        z1)

    # ---- layer 2 (bidirectional), fused with the first Linear(480, 64) -----
    def l2_body(t, carry, wihf_ref, wihb_ref, whh_ref, b_ref, fcw_ref):
        h, c, acc = carry
        xf = h1f_scr[t]                                   # (B, 32)
        xb = h1b_scr[t]                                   # (B, 32)
        h, c = lstm_step([(xf, wihf_ref), (xb, wihb_ref)], h, c, whh_ref, b_ref)
        acc = acc + jnp.dot(h, fcw_ref[t], preferred_element_type=f32)   # (B, 64)
        return h, c, acc

    z2 = (jnp.zeros((B, H2), f32), jnp.zeros((B, H2), f32), jnp.zeros((B, FC1), f32))
    _, _, acc_f = lax.fori_loop(
        0, T,
        lambda t, carry: l2_body(t, carry, l2f_wihf_ref, l2f_wihb_ref,
                                 l2f_whh_ref, l2f_b_ref, fcw1f_ref),
        z2)
    _, _, acc_b = lax.fori_loop(
        0, T,
        lambda k, carry: l2_body(T - 1 - k, carry, l2b_wihf_ref, l2b_wihb_ref,
                                 l2b_whh_ref, l2b_b_ref, fcw1b_ref),
        z2)

    # ---- FC head: (Linear+BN+ReLU) x2, then Linear(8,1)+Sigmoid ------------
    y = acc_f + acc_b + fcb1_ref[...]                                         # (B, 64)
    y = jnp.maximum(y * bn1s_ref[...] + bn1h_ref[...], 0.0)
    y = jnp.dot(y, fcw2_ref[...], preferred_element_type=f32) + fcb2_ref[...]  # (B, 8)
    y = jnp.maximum(y * bn2s_ref[...] + bn2h_ref[...], 0.0)
    y = jnp.sum(y * fcw3_ref[...], axis=-1, keepdims=True) + fcb3_ref[...]     # (B, 1)
    out_ref[...] = sigmoid(y)


# ---------------------------------------------------------------------------
# Weight preparation (wrapper side, plain JAX)
# ---------------------------------------------------------------------------
def _prep_lstm1(p, d):
    w_ih = p[f"l1_{d}_w_ih"]                              # (4*H1, 136)
    w_hh = p[f"l1_{d}_w_hh"]                              # (4*H1, H1)
    b = p[f"l1_{d}_b_ih"] + p[f"l1_{d}_b_hh"]             # (4*H1,)
    wih = w_ih.reshape(4, H1, IN_FEAT).transpose(0, 2, 1)  # (4, 136, 32)
    whh = w_hh.reshape(4, H1, H1).transpose(0, 2, 1)       # (4, 32, 32)
    bg = b.reshape(4, 1, H1)                               # (4, 1, 32)
    return wih, whh, bg


def _prep_lstm2(p, d):
    w_ih = p[f"l2_{d}_w_ih"]                              # (4*H2, 2*H1)
    w_hh = p[f"l2_{d}_w_hh"]                              # (4*H2, H2)
    b = p[f"l2_{d}_b_ih"] + p[f"l2_{d}_b_hh"]             # (4*H2,)
    wg = w_ih.reshape(4, H2, 2 * H1)
    wihf = wg[:, :, :H1].transpose(0, 2, 1)               # (4, 32, 8)  x fwd half
    wihb = wg[:, :, H1:].transpose(0, 2, 1)               # (4, 32, 8)  x bwd half
    whh = w_hh.reshape(4, H2, H2).transpose(0, 2, 1)      # (4, 8, 8)
    bg = b.reshape(4, 1, H2)                              # (4, 1, 8)
    return wihf, wihb, whh, bg


def _prep_fc(p):
    # Linear(30*16, 64): split the flattened (t, fwd/bwd, h2) feature axis so the
    # layer can be accumulated inside the layer-2 time loops.
    w1 = p["fc1_w"].reshape(FC1, SEQ_LEN, 2 * H2).transpose(1, 2, 0)   # (T, 16, 64)
    fcw1f = w1[:, :H2, :]                                 # (T, 8, 64)
    fcw1b = w1[:, H2:, :]                                 # (T, 8, 64)
    fcb1 = p["fc1_b"].reshape(1, FC1)
    bn1_scale = p["bn1_gamma"] / jnp.sqrt(p["bn1_var"] + BN_EPS)
    bn1_shift = p["bn1_beta"] - p["bn1_mean"] * bn1_scale
    fcw2 = p["fc2_w"].T                                   # (64, 8)
    fcb2 = p["fc2_b"].reshape(1, FC2)
    bn2_scale = p["bn2_gamma"] / jnp.sqrt(p["bn2_var"] + BN_EPS)
    bn2_shift = p["bn2_beta"] - p["bn2_mean"] * bn2_scale
    fcw3 = p["fc3_w"].reshape(1, FC2)
    fcb3 = p["fc3_b"].reshape(1, 1)
    return (fcw1f, fcw1b, fcb1,
            bn1_scale.reshape(1, FC1), bn1_shift.reshape(1, FC1),
            fcw2, fcb2, bn2_scale.reshape(1, FC2), bn2_shift.reshape(1, FC2),
            fcw3, fcb3)


@jax.jit
def discriminator_realfake_seq(kp_seq, params):
    """kp_seq: (B, 30, 136) float -> (B, 1) real/fake probability."""
    B, T, F = kp_seq.shape
    assert T == SEQ_LEN and F == IN_FEAT
    x = jnp.transpose(kp_seq, (1, 0, 2)).astype(jnp.float32)   # torch permute(1,0,2)

    inputs = (x,
              *_prep_lstm1(params, "fwd"), *_prep_lstm1(params, "bwd"),
              *_prep_lstm2(params, "fwd"), *_prep_lstm2(params, "bwd"),
              *_prep_fc(params))

    # Single-shot kernel: no grid / pipeline machinery; each operand is one
    # whole-array VMEM block (perf feedback: drop the 1-point grid).
    return pl.pallas_call(
        _disc_kernel,
        out_shape=jax.ShapeDtypeStruct((B, 1), jnp.float32),
        in_specs=[pl.BlockSpec(memory_space=pltpu.MemorySpace.VMEM)] * len(inputs),
        out_specs=pl.BlockSpec(memory_space=pltpu.MemorySpace.VMEM),
        scratch_shapes=[
            pltpu.VMEM((SEQ_LEN, B, H1), jnp.float32),   # layer-1 fwd outputs
            pltpu.VMEM((SEQ_LEN, B, H1), jnp.float32),   # layer-1 bwd outputs
        ],
    )(*inputs)


# ---------------------------------------------------------------------------
# Deterministic parameter construction + pure-JAX reference
# ---------------------------------------------------------------------------
def init_params(key):
    keys = iter(jax.random.split(key, 64))

    def nrm(shape, std=0.1):
        return std * jax.random.normal(next(keys), shape, dtype=jnp.float32)

    p = {}
    for d in ("fwd", "bwd"):
        p[f"l1_{d}_w_ih"] = nrm((4 * H1, IN_FEAT))
        p[f"l1_{d}_w_hh"] = nrm((4 * H1, H1))
        p[f"l1_{d}_b_ih"] = nrm((4 * H1,), 0.05)
        p[f"l1_{d}_b_hh"] = nrm((4 * H1,), 0.05)
    for d in ("fwd", "bwd"):
        p[f"l2_{d}_w_ih"] = nrm((4 * H2, 2 * H1))
        p[f"l2_{d}_w_hh"] = nrm((4 * H2, H2))
        p[f"l2_{d}_b_ih"] = nrm((4 * H2,), 0.05)
        p[f"l2_{d}_b_hh"] = nrm((4 * H2,), 0.05)
    p["fc1_w"] = nrm((FC1, SEQ_LEN * 2 * H2), 0.05)
    p["fc1_b"] = nrm((FC1,), 0.05)
    p["bn1_gamma"] = 1.0 + nrm((FC1,), 0.05)
    p["bn1_beta"] = nrm((FC1,), 0.05)
    p["bn1_mean"] = nrm((FC1,), 0.05)
    p["bn1_var"] = 1.0 + 0.1 * jax.random.uniform(next(keys), (FC1,), dtype=jnp.float32)
    p["fc2_w"] = nrm((FC2, FC1))
    p["fc2_b"] = nrm((FC2,), 0.05)
    p["bn2_gamma"] = 1.0 + nrm((FC2,), 0.05)
    p["bn2_beta"] = nrm((FC2,), 0.05)
    p["bn2_mean"] = nrm((FC2,), 0.05)
    p["bn2_var"] = 1.0 + 0.1 * jax.random.uniform(next(keys), (FC2,), dtype=jnp.float32)
    p["fc3_w"] = nrm((1, FC2))
    p["fc3_b"] = nrm((1,), 0.05)
    return p


def _reference(kp_seq, params):
    x = jnp.transpose(kp_seq, (1, 0, 2)).astype(jnp.float32)   # (T, B, 136)
    T, B, _ = x.shape

    def run_dir(xs, w_ih, w_hh, b_ih, b_hh, reverse):
        H = w_hh.shape[1]

        def step(carry, x_t):
            h, c = carry
            pre = x_t @ w_ih.T + h @ w_hh.T + b_ih + b_hh
            i, f, g, o = jnp.split(pre, 4, axis=-1)
            i = jax.nn.sigmoid(i)
            f = jax.nn.sigmoid(f)
            g = jnp.tanh(g)
            o = jax.nn.sigmoid(o)
            c = f * c + i * g
            h = o * jnp.tanh(c)
            return (h, c), h

        init = (jnp.zeros((B, H), jnp.float32), jnp.zeros((B, H), jnp.float32))
        seq = xs[::-1] if reverse else xs
        _, hs = lax.scan(step, init, seq)
        return hs[::-1] if reverse else hs

    def bilstm(xs, prefix):
        hf = run_dir(xs, params[f"{prefix}_fwd_w_ih"], params[f"{prefix}_fwd_w_hh"],
                     params[f"{prefix}_fwd_b_ih"], params[f"{prefix}_fwd_b_hh"], False)
        hb = run_dir(xs, params[f"{prefix}_bwd_w_ih"], params[f"{prefix}_bwd_w_hh"],
                     params[f"{prefix}_bwd_b_ih"], params[f"{prefix}_bwd_b_hh"], True)
        return jnp.concatenate([hf, hb], axis=-1)

    out1 = bilstm(x, "l1")          # (T, B, 64)
    out2 = bilstm(out1, "l2")       # (T, B, 16)
    y = jnp.transpose(out2, (1, 0, 2)).reshape(B, T * 2 * H2)

    def bn(v, g, b, m, var):
        return (v - m) / jnp.sqrt(var + BN_EPS) * g + b

    y = y @ params["fc1_w"].T + params["fc1_b"]
    y = jax.nn.relu(bn(y, params["bn1_gamma"], params["bn1_beta"],
                       params["bn1_mean"], params["bn1_var"]))
    y = y @ params["fc2_w"].T + params["fc2_b"]
    y = jax.nn.relu(bn(y, params["bn2_gamma"], params["bn2_beta"],
                       params["bn2_mean"], params["bn2_var"]))
    y = y @ params["fc3_w"].T + params["fc3_b"]
    return jax.nn.sigmoid(y)


if __name__ == "__main__":
    key = jax.random.PRNGKey(0)
    k_params, k_x = jax.random.split(key)

    B = 2
    params = init_params(k_params)
    kp_seq = jax.random.normal(k_x, (B, SEQ_LEN, IN_FEAT), dtype=jnp.float32)

    out = jax.block_until_ready(discriminator_realfake_seq(kp_seq, params))
    ref = jax.block_until_ready(_reference(kp_seq, params))

    assert out.shape == (B, 1), out.shape
    assert jnp.allclose(out, ref, atol=2e-4, rtol=2e-3), (out, ref)

    print("KERNEL_OK")
</pallas_src>

<mosaic_0001>
module attributes {stable_mosaic.version = 11 : i64} {
  func.func @_disc_kernel(%arg0: memref<30x2x136xf32, #tpu.memory_space<vmem>>, %arg1: memref<4x136x32xf32, #tpu.memory_space<vmem>>, %arg2: memref<4x32x32xf32, #tpu.memory_space<vmem>>, %arg3: memref<4x1x32xf32, #tpu.memory_space<vmem>>, %arg4: memref<4x136x32xf32, #tpu.memory_space<vmem>>, %arg5: memref<4x32x32xf32, #tpu.memory_space<vmem>>, %arg6: memref<4x1x32xf32, #tpu.memory_space<vmem>>, %arg7: memref<4x32x8xf32, #tpu.memory_space<vmem>>, %arg8: memref<4x32x8xf32, #tpu.memory_space<vmem>>, %arg9: memref<4x8x8xf32, #tpu.memory_space<vmem>>, %arg10: memref<4x1x8xf32, #tpu.memory_space<vmem>>, %arg11: memref<4x32x8xf32, #tpu.memory_space<vmem>>, %arg12: memref<4x32x8xf32, #tpu.memory_space<vmem>>, %arg13: memref<4x8x8xf32, #tpu.memory_space<vmem>>, %arg14: memref<4x1x8xf32, #tpu.memory_space<vmem>>, %arg15: memref<30x8x64xf32, #tpu.memory_space<vmem>>, %arg16: memref<30x8x64xf32, #tpu.memory_space<vmem>>, %arg17: memref<1x64xf32, #tpu.memory_space<vmem>>, %arg18: memref<1x64xf32, #tpu.memory_space<vmem>>, %arg19: memref<1x64xf32, #tpu.memory_space<vmem>>, %arg20: memref<64x8xf32, #tpu.memory_space<vmem>>, %arg21: memref<1x8xf32, #tpu.memory_space<vmem>>, %arg22: memref<1x8xf32, #tpu.memory_space<vmem>>, %arg23: memref<1x8xf32, #tpu.memory_space<vmem>>, %arg24: memref<1x8xf32, #tpu.memory_space<vmem>>, %arg25: memref<1x1xf32, #tpu.memory_space<vmem>>, %arg26: memref<2x1xf32, #tpu.memory_space<vmem>>, %arg27: memref<30x2x32xf32, #tpu.memory_space<vmem>>, %arg28: memref<30x2x32xf32, #tpu.memory_space<vmem>>) attributes {dimension_semantics = [], scalar_prefetch = 0 : i64, scratch_operands = 2 : i64, tpu.core_type = #tpu.core_type<tc>} {
    %cst = arith.constant 0.000000e+00 : f32
    %0 = vector.broadcast %cst : f32 to vector<2x32xf32>
    %cst_0 = arith.constant 0.000000e+00 : f32
    %1 = vector.broadcast %cst_0 : f32 to vector<2x32xf32>
    %c0_i32 = arith.constant 0 : i32
    %c30_i32 = arith.constant 30 : i32
    %2 = arith.addi %c0_i32, %c30_i32 : i32
    %c1_i32 = arith.constant 1 : i32
    %3:2 = scf.for %arg29 = %c0_i32 to %2 step %c1_i32 iter_args(%arg30 = %0, %arg31 = %1) -> (vector<2x32xf32>, vector<2x32xf32>)  : i32 {
      %54 = arith.index_cast %arg29 : i32 to index
      %c0_43 = arith.constant 0 : index
      %c0_44 = arith.constant 0 : index
      %55 = vector.load %arg0[%54, %c0_43, %c0_44] : memref<30x2x136xf32, #tpu.memory_space<vmem>>, vector<1x2x136xf32>
      %56 = vector.shape_cast %55 : vector<1x2x136xf32> to vector<2x136xf32>
      %c0_45 = arith.constant 0 : index
      %c0_46 = arith.constant 0 : index
      %c0_47 = arith.constant 0 : index
      %57 = vector.load %arg2[%c0_45, %c0_46, %c0_47] : memref<4x32x32xf32, #tpu.memory_space<vmem>>, vector<1x32x32xf32>
      %58 = vector.shape_cast %57 : vector<1x32x32xf32> to vector<32x32xf32>
      %cst_48 = arith.constant dense<0.000000e+00> : vector<2x32xf32>
      %59 = tpu.matmul %arg30, %58, %cst_48 {dimension_numbers = #tpu.dot_dimension_numbers<[1], [0], [0], [1], [0, 0, 1, 1], [], []>} : vector<2x32xf32>, vector<32x32xf32>, vector<2x32xf32> -> vector<2x32xf32>
      %c0_49 = arith.constant 0 : index
      %c0_50 = arith.constant 0 : index
      %c0_51 = arith.constant 0 : index
      %60 = vector.load %arg3[%c0_49, %c0_50, %c0_51] : memref<4x1x32xf32, #tpu.memory_space<vmem>>, vector<1x1x32xf32>
      %61 = vector.shape_cast %60 : vector<1x1x32xf32> to vector<1x32xf32>
      %62 = vector.broadcast %61 : vector<1x32xf32> to vector<2x32xf32>
      %63 = arith.addf %59, %62 : vector<2x32xf32>
      %c0_52 = arith.constant 0 : index
      %c0_53 = arith.constant 0 : index
      %c0_54 = arith.constant 0 : index
      %64 = vector.load %arg1[%c0_52, %c0_53, %c0_54] : memref<4x136x32xf32, #tpu.memory_space<vmem>>, vector<1x136x32xf32>
      %65 = vector.shape_cast %64 : vector<1x136x32xf32> to vector<136x32xf32>
      %cst_55 = arith.constant dense<0.000000e+00> : vector<2x32xf32>
      %66 = tpu.matmul %56, %65, %cst_55 {dimension_numbers = #tpu.dot_dimension_numbers<[1], [0], [0], [1], [0, 0, 1, 1], [], []>} : vector<2x136xf32>, vector<136x32xf32>, vector<2x32xf32> -> vector<2x32xf32>
      %67 = arith.addf %63, %66 : vector<2x32xf32>
      %cst_56 = arith.constant 0.000000e+00 : f32
      %68 = vector.broadcast %cst_56 : f32 to vector<2x32xf32>
      %69 = arith.subf %68, %67 : vector<2x32xf32>
      %70 = math.exp %69 : vector<2x32xf32>
      %cst_57 = arith.constant 1.000000e+00 : f32
      %71 = vector.broadcast %cst_57 : f32 to vector<2x32xf32>
      %72 = arith.addf %71, %70 : vector<2x32xf32>
      %cst_58 = arith.constant 1.000000e+00 : f32
      %73 = vector.broadcast %cst_58 : f32 to vector<2x32xf32>
      %74 = arith.divf %73, %72 : vector<2x32xf32>
      %c1 = arith.constant 1 : index
      %c0_59 = arith.constant 0 : index
      %c0_60 = arith.constant 0 : index
      %75 = vector.load %arg2[%c1, %c0_59, %c0_60] : memref<4x32x32xf32, #tpu.memory_space<vmem>>, vector<1x32x32xf32>
      %76 = vector.shape_cast %75 : vector<1x32x32xf32> to vector<32x32xf32>
      %cst_61 = arith.constant dense<0.000000e+00> : vector<2x32xf32>
      %77 = tpu.matmul %arg30, %76, %cst_61 {dimension_numbers = #tpu.dot_dimension_numbers<[1], [0], [0], [1], [0, 0, 1, 1], [], []>} : vector<2x32xf32>, vector<32x32xf32>, vector<2x32xf32> -> vector<2x32xf32>
      %c1_62 = arith.constant 1 : index
      %c0_63 = arith.constant 0 : index
      %c0_64 = arith.constant 0 : index
      %78 = vector.load %arg3[%c1_62, %c0_63, %c0_64] : memref<4x1x32xf32, #tpu.memory_space<vmem>>, vector<1x1x32xf32>
      %79 = vector.shape_cast %78 : vector<1x1x32xf32> to vector<1x32xf32>
      %80 = vector.broadcast %79 : vector<1x32xf32> to vector<2x32xf32>
      %81 = arith.addf %77, %80 : vector<2x32xf32>
      %c1_65 = arith.constant 1 : index
      %c0_66 = arith.constant 0 : index
      %c0_67 = arith.constant 0 : index
      %82 = vector.load %arg1[%c1_65, %c0_66, %c0_67] : memref<4x136x32xf32, #tpu.memory_space<vmem>>, vector<1x136x32xf32>
      %83 = vector.shape_cast %82 : vector<1x136x32xf32> to vector<136x32xf32>
      %cst_68 = arith.constant dense<0.000000e+00> : vector<2x32xf32>
      %84 = tpu.matmul %56, %83, %cst_68 {dimension_numbers = #tpu.dot_dimension_numbers<[1], [0], [0], [1], [0, 0, 1, 1], [], []>} : vector<2x136xf32>, vector<136x32xf32>, vector<2x32xf32> -> vector<2x32xf32>
      %85 = arith.addf %81, %84 : vector<2x32xf32>
      %cst_69 = arith.constant 0.000000e+00 : f32
      %86 = vector.broadcast %cst_69 : f32 to vector<2x32xf32>
      %87 = arith.subf %86, %85 : vector<2x32xf32>
      %88 = math.exp %87 : vector<2x32xf32>
      %cst_70 = arith.constant 1.000000e+00 : f32
      %89 = vector.broadcast %cst_70 : f32 to vector<2x32xf32>
      %90 = arith.addf %89, %88 : vector<2x32xf32>
      %cst_71 = arith.constant 1.000000e+00 : f32
      %91 = vector.broadcast %cst_71 : f32 to vector<2x32xf32>
      %92 = arith.divf %91, %90 : vector<2x32xf32>
      %c2 = arith.constant 2 : index
      %c0_72 = arith.constant 0 : index
      %c0_73 = arith.constant 0 : index
      %93 = vector.load %arg2[%c2, %c0_72, %c0_73] : memref<4x32x32xf32, #tpu.memory_space<vmem>>, vector<1x32x32xf32>
      %94 = vector.shape_cast %93 : vector<1x32x32xf32> to vector<32x32xf32>
      %cst_74 = arith.constant dense<0.000000e+00> : vector<2x32xf32>
      %95 = tpu.matmul %arg30, %94, %cst_74 {dimension_numbers = #tpu.dot_dimension_numbers<[1], [0], [0], [1], [0, 0, 1, 1], [], []>} : vector<2x32xf32>, vector<32x32xf32>, vector<2x32xf32> -> vector<2x32xf32>
      %c2_75 = arith.constant 2 : index
      %c0_76 = arith.constant 0 : index
      %c0_77 = arith.constant 0 : index
      %96 = vector.load %arg3[%c2_75, %c0_76, %c0_77] : memref<4x1x32xf32, #tpu.memory_space<vmem>>, vector<1x1x32xf32>
      %97 = vector.shape_cast %96 : vector<1x1x32xf32> to vector<1x32xf32>
      %98 = vector.broadcast %97 : vector<1x32xf32> to vector<2x32xf32>
      %99 = arith.addf %95, %98 : vector<2x32xf32>
      %c2_78 = arith.constant 2 : index
      %c0_79 = arith.constant 0 : index
      %c0_80 = arith.constant 0 : index
      %100 = vector.load %arg1[%c2_78, %c0_79, %c0_80] : memref<4x136x32xf32, #tpu.memory_space<vmem>>, vector<1x136x32xf32>
      %101 = vector.shape_cast %100 : vector<1x136x32xf32> to vector<136x32xf32>
      %cst_81 = arith.constant dense<0.000000e+00> : vector<2x32xf32>
      %102 = tpu.matmul %56, %101, %cst_81 {dimension_numbers = #tpu.dot_dimension_numbers<[1], [0], [0], [1], [0, 0, 1, 1], [], []>} : vector<2x136xf32>, vector<136x32xf32>, vector<2x32xf32> -> vector<2x32xf32>
      %103 = arith.addf %99, %102 : vector<2x32xf32>
      %104 = math.tanh %103 : vector<2x32xf32>
      %c3 = arith.constant 3 : index
      %c0_82 = arith.constant 0 : index
      %c0_83 = arith.constant 0 : index
      %105 = vector.load %arg2[%c3, %c0_82, %c0_83] : memref<4x32x32xf32, #tpu.memory_space<vmem>>, vector<1x32x32xf32>
      %106 = vector.shape_cast %105 : vector<1x32x32xf32> to vector<32x32xf32>
      %cst_84 = arith.constant dense<0.000000e+00> : vector<2x32xf32>
      %107 = tpu.matmul %arg30, %106, %cst_84 {dimension_numbers = #tpu.dot_dimension_numbers<[1], [0], [0], [1], [0, 0, 1, 1], [], []>} : vector<2x32xf32>, vector<32x32xf32>, vector<2x32xf32> -> vector<2x32xf32>
      %c3_85 = arith.constant 3 : index
      %c0_86 = arith.constant 0 : index
      %c0_87 = arith.constant 0 : index
      %108 = vector.load %arg3[%c3_85, %c0_86, %c0_87] : memref<4x1x32xf32, #tpu.memory_space<vmem>>, vector<1x1x32xf32>
      %109 = vector.shape_cast %108 : vector<1x1x32xf32> to vector<1x32xf32>
      %110 = vector.broadcast %109 : vector<1x32xf32> to vector<2x32xf32>
      %111 = arith.addf %107, %110 : vector<2x32xf32>
      %c3_88 = arith.constant 3 : index
      %c0_89 = arith.constant 0 : index
      %c0_90 = arith.constant 0 : index
      %112 = vector.load %arg1[%c3_88, %c0_89, %c0_90] : memref<4x136x32xf32, #tpu.memory_space<vmem>>, vector<1x136x32xf32>
      %113 = vector.shape_cast %112 : vector<1x136x32xf32> to vector<136x32xf32>
      %cst_91 = arith.constant dense<0.000000e+00> : vector<2x32xf32>
      %114 = tpu.matmul %56, %113, %cst_91 {dimension_numbers = #tpu.dot_dimension_numbers<[1], [0], [0], [1], [0, 0, 1, 1], [], []>} : vector<2x136xf32>, vector<136x32xf32>, vector<2x32xf32> -> vector<2x32xf32>
      %115 = arith.addf %111, %114 : vector<2x32xf32>
      %cst_92 = arith.constant 0.000000e+00 : f32
      %116 = vector.broadcast %cst_92 : f32 to vector<2x32xf32>
      %117 = arith.subf %116, %115 : vector<2x32xf32>
      %118 = math.exp %117 : vector<2x32xf32>
      %cst_93 = arith.constant 1.000000e+00 : f32
      %119 = vector.broadcast %cst_93 : f32 to vector<2x32xf32>
      %120 = arith.addf %119, %118 : vector<2x32xf32>
      %cst_94 = arith.constant 1.000000e+00 : f32
      %121 = vector.broadcast %cst_94 : f32 to vector<2x32xf32>
      %122 = arith.divf %121, %120 : vector<2x32xf32>
      %123 = arith.mulf %92, %arg31 : vector<2x32xf32>
      %124 = arith.mulf %74, %104 : vector<2x32xf32>
      %125 = arith.addf %123, %124 : vector<2x32xf32>
      %126 = math.tanh %125 : vector<2x32xf32>
      %127 = arith.mulf %122, %126 : vector<2x32xf32>
      %128 = arith.index_cast %arg29 : i32 to index
      %c0_95 = arith.constant 0 : index
      %c0_96 = arith.constant 0 : index
      %129 = vector.load %arg27[%128, %c0_95, %c0_96] : memref<30x2x32xf32, #tpu.memory_space<vmem>>, vector<1x2x32xf32>
      %130 = vector.shape_cast %129 : vector<1x2x32xf32> to vector<2x32xf32>
      %131 = vector.shape_cast %127 : vector<2x32xf32> to vector<1x2x32xf32>
      tpu.vector_store %arg27[%128, %c0_95, %c0_96], %131 {strides = array<i32>} : memref<30x2x32xf32, #tpu.memory_space<vmem>>, vector<1x2x32xf32>,
      scf.yield %127, %125 : vector<2x32xf32>, vector<2x32xf32>
    }
    %c30_i32_1 = arith.constant 30 : i32
    %c0_i32_2 = arith.constant 0 : i32
    %c30_i32_3 = arith.constant 30 : i32
    %4 = arith.addi %c0_i32_2, %c30_i32_3 : i32
    %c1_i32_4 = arith.constant 1 : i32
    %5:2 = scf.for %arg29 = %c0_i32_2 to %4 step %c1_i32_4 iter_args(%arg30 = %0, %arg31 = %1) -> (vector<2x32xf32>, vector<2x32xf32>)  : i32 {
      %c29_i32 = arith.constant 29 : i32
      %54 = arith.subi %c29_i32, %arg29 : i32
      %55 = arith.index_cast %54 : i32 to index
      %c0_43 = arith.constant 0 : index
      %c0_44 = arith.constant 0 : index
      %56 = vector.load %arg0[%55, %c0_43, %c0_44] : memref<30x2x136xf32, #tpu.memory_space<vmem>>, vector<1x2x136xf32>
      %57 = vector.shape_cast %56 : vector<1x2x136xf32> to vector<2x136xf32>
      %c0_45 = arith.constant 0 : index
      %c0_46 = arith.constant 0 : index
      %c0_47 = arith.constant 0 : index
      %58 = vector.load %arg5[%c0_45, %c0_46, %c0_47] : memref<4x32x32xf32, #tpu.memory_space<vmem>>, vector<1x32x32xf32>
      %59 = vector.shape_cast %58 : vector<1x32x32xf32> to vector<32x32xf32>
      %cst_48 = arith.constant dense<0.000000e+00> : vector<2x32xf32>
      %60 = tpu.matmul %arg30, %59, %cst_48 {dimension_numbers = #tpu.dot_dimension_numbers<[1], [0], [0], [1], [0, 0, 1, 1], [], []>} : vector<2x32xf32>, vector<32x32xf32>, vector<2x32xf32> -> vector<2x32xf32>
      %c0_49 = arith.constant 0 : index
      %c0_50 = arith.constant 0 : index
      %c0_51 = arith.constant 0 : index
      %61 = vector.load %arg6[%c0_49, %c0_50, %c0_51] : memref<4x1x32xf32, #tpu.memory_space<vmem>>, vector<1x1x32xf32>
      %62 = vector.shape_cast %61 : vector<1x1x32xf32> to vector<1x32xf32>
      %63 = vector.broadcast %62 : vector<1x32xf32> to vector<2x32xf32>
      %64 = arith.addf %60, %63 : vector<2x32xf32>
      %c0_52 = arith.constant 0 : index
      %c0_53 = arith.constant 0 : index
      %c0_54 = arith.constant 0 : index
      %65 = vector.load %arg4[%c0_52, %c0_53, %c0_54] : memref<4x136x32xf32, #tpu.memory_space<vmem>>, vector<1x136x32xf32>
      %66 = vector.shape_cast %65 : vector<1x136x32xf32> to vector<136x32xf32>
      %cst_55 = arith.constant dense<0.000000e+00> : vector<2x32xf32>
      %67 = tpu.matmul %57, %66, %cst_55 {dimension_numbers = #tpu.dot_dimension_numbers<[1], [0], [0], [1], [0, 0, 1, 1], [], []>} : vector<2x136xf32>, vector<136x32xf32>, vector<2x32xf32> -> vector<2x32xf32>
      %68 = arith.addf %64, %67 : vector<2x32xf32>
      %cst_56 = arith.constant 0.000000e+00 : f32
      %69 = vector.broadcast %cst_56 : f32 to vector<2x32xf32>
      %70 = arith.subf %69, %68 : vector<2x32xf32>
      %71 = math.exp %70 : vector<2x32xf32>
      %cst_57 = arith.constant 1.000000e+00 : f32
      %72 = vector.broadcast %cst_57 : f32 to vector<2x32xf32>
      %73 = arith.addf %72, %71 : vector<2x32xf32>
      %cst_58 = arith.constant 1.000000e+00 : f32
      %74 = vector.broadcast %cst_58 : f32 to vector<2x32xf32>
      %75 = arith.divf %74, %73 : vector<2x32xf32>
      %c1 = arith.constant 1 : index
      %c0_59 = arith.constant 0 : index
      %c0_60 = arith.constant 0 : index
      %76 = vector.load %arg5[%c1, %c0_59, %c0_60] : memref<4x32x32xf32, #tpu.memory_space<vmem>>, vector<1x32x32xf32>
      %77 = vector.shape_cast %76 : vector<1x32x32xf32> to vector<32x32xf32>
      %cst_61 = arith.constant dense<0.000000e+00> : vector<2x32xf32>
      %78 = tpu.matmul %arg30, %77, %cst_61 {dimension_numbers = #tpu.dot_dimension_numbers<[1], [0], [0], [1], [0, 0, 1, 1], [], []>} : vector<2x32xf32>, vector<32x32xf32>, vector<2x32xf32> -> vector<2x32xf32>
      %c1_62 = arith.constant 1 : index
      %c0_63 = arith.constant 0 : index
      %c0_64 = arith.constant 0 : index
      %79 = vector.load %arg6[%c1_62, %c0_63, %c0_64] : memref<4x1x32xf32, #tpu.memory_space<vmem>>, vector<1x1x32xf32>
      %80 = vector.shape_cast %79 : vector<1x1x32xf32> to vector<1x32xf32>
      %81 = vector.broadcast %80 : vector<1x32xf32> to vector<2x32xf32>
      %82 = arith.addf %78, %81 : vector<2x32xf32>
      %c1_65 = arith.constant 1 : index
      %c0_66 = arith.constant 0 : index
      %c0_67 = arith.constant 0 : index
      %83 = vector.load %arg4[%c1_65, %c0_66, %c0_67] : memref<4x136x32xf32, #tpu.memory_space<vmem>>, vector<1x136x32xf32>
      %84 = vector.shape_cast %83 : vector<1x136x32xf32> to vector<136x32xf32>
      %cst_68 = arith.constant dense<0.000000e+00> : vector<2x32xf32>
      %85 = tpu.matmul %57, %84, %cst_68 {dimension_numbers = #tpu.dot_dimension_numbers<[1], [0], [0], [1], [0, 0, 1, 1], [], []>} : vector<2x136xf32>, vector<136x32xf32>, vector<2x32xf32> -> vector<2x32xf32>
      %86 = arith.addf %82, %85 : vector<2x32xf32>
      %cst_69 = arith.constant 0.000000e+00 : f32
      %87 = vector.broadcast %cst_69 : f32 to vector<2x32xf32>
      %88 = arith.subf %87, %86 : vector<2x32xf32>
      %89 = math.exp %88 : vector<2x32xf32>
      %cst_70 = arith.constant 1.000000e+00 : f32
      %90 = vector.broadcast %cst_70 : f32 to vector<2x32xf32>
      %91 = arith.addf %90, %89 : vector<2x32xf32>
      %cst_71 = arith.constant 1.000000e+00 : f32
      %92 = vector.broadcast %cst_71 : f32 to vector<2x32xf32>
      %93 = arith.divf %92, %91 : vector<2x32xf32>
      %c2 = arith.constant 2 : index
      %c0_72 = arith.constant 0 : index
      %c0_73 = arith.constant 0 : index
      %94 = vector.load %arg5[%c2, %c0_72, %c0_73] : memref<4x32x32xf32, #tpu.memory_space<vmem>>, vector<1x32x32xf32>
      %95 = vector.shape_cast %94 : vector<1x32x32xf32> to vector<32x32xf32>
      %cst_74 = arith.constant dense<0.000000e+00> : vector<2x32xf32>
      %96 = tpu.matmul %arg30, %95, %cst_74 {dimension_numbers = #tpu.dot_dimension_numbers<[1], [0], [0], [1], [0, 0, 1, 1], [], []>} : vector<2x32xf32>, vector<32x32xf32>, vector<2x32xf32> -> vector<2x32xf32>
      %c2_75 = arith.constant 2 : index
      %c0_76 = arith.constant 0 : index
      %c0_77 = arith.constant 0 : index
      %97 = vector.load %arg6[%c2_75, %c0_76, %c0_77] : memref<4x1x32xf32, #tpu.memory_space<vmem>>, vector<1x1x32xf32>
      %98 = vector.shape_cast %97 : vector<1x1x32xf32> to vector<1x32xf32>
      %99 = vector.broadcast %98 : vector<1x32xf32> to vector<2x32xf32>
      %100 = arith.addf %96, %99 : vector<2x32xf32>
      %c2_78 = arith.constant 2 : index
      %c0_79 = arith.constant 0 : index
      %c0_80 = arith.constant 0 : index
      %101 = vector.load %arg4[%c2_78, %c0_79, %c0_80] : memref<4x136x32xf32, #tpu.memory_space<vmem>>, vector<1x136x32xf32>
      %102 = vector.shape_cast %101 : vector<1x136x32xf32> to vector<136x32xf32>
      %cst_81 = arith.constant dense<0.000000e+00> : vector<2x32xf32>
      %103 = tpu.matmul %57, %102, %cst_81 {dimension_numbers = #tpu.dot_dimension_numbers<[1], [0], [0], [1], [0, 0, 1, 1], [], []>} : vector<2x136xf32>, vector<136x32xf32>, vector<2x32xf32> -> vector<2x32xf32>
      %104 = arith.addf %100, %103 : vector<2x32xf32>
      %105 = math.tanh %104 : vector<2x32xf32>
      %c3 = arith.constant 3 : index
      %c0_82 = arith.constant 0 : index
      %c0_83 = arith.constant 0 : index
      %106 = vector.load %arg5[%c3, %c0_82, %c0_83] : memref<4x32x32xf32, #tpu.memory_space<vmem>>, vector<1x32x32xf32>
      %107 = vector.shape_cast %106 : vector<1x32x32xf32> to vector<32x32xf32>
      %cst_84 = arith.constant dense<0.000000e+00> : vector<2x32xf32>
      %108 = tpu.matmul %arg30, %107, %cst_84 {dimension_numbers = #tpu.dot_dimension_numbers<[1], [0], [0], [1], [0, 0, 1, 1], [], []>} : vector<2x32xf32>, vector<32x32xf32>, vector<2x32xf32> -> vector<2x32xf32>
      %c3_85 = arith.constant 3 : index
      %c0_86 = arith.constant 0 : index
      %c0_87 = arith.constant 0 : index
      %109 = vector.load %arg6[%c3_85, %c0_86, %c0_87] : memref<4x1x32xf32, #tpu.memory_space<vmem>>, vector<1x1x32xf32>
      %110 = vector.shape_cast %109 : vector<1x1x32xf32> to vector<1x32xf32>
      %111 = vector.broadcast %110 : vector<1x32xf32> to vector<2x32xf32>
      %112 = arith.addf %108, %111 : vector<2x32xf32>
      %c3_88 = arith.constant 3 : index
      %c0_89 = arith.constant 0 : index
      %c0_90 = arith.constant 0 : index
      %113 = vector.load %arg4[%c3_88, %c0_89, %c0_90] : memref<4x136x32xf32, #tpu.memory_space<vmem>>, vector<1x136x32xf32>
      %114 = vector.shape_cast %113 : vector<1x136x32xf32> to vector<136x32xf32>
      %cst_91 = arith.constant dense<0.000000e+00> : vector<2x32xf32>
      %115 = tpu.matmul %57, %114, %cst_91 {dimension_numbers = #tpu.dot_dimension_numbers<[1], [0], [0], [1], [0, 0, 1, 1], [], []>} : vector<2x136xf32>, vector<136x32xf32>, vector<2x32xf32> -> vector<2x32xf32>
      %116 = arith.addf %112, %115 : vector<2x32xf32>
      %cst_92 = arith.constant 0.000000e+00 : f32
      %117 = vector.broadcast %cst_92 : f32 to vector<2x32xf32>
      %118 = arith.subf %117, %116 : vector<2x32xf32>
      %119 = math.exp %118 : vector<2x32xf32>
      %cst_93 = arith.constant 1.000000e+00 : f32
      %120 = vector.broadcast %cst_93 : f32 to vector<2x32xf32>
      %121 = arith.addf %120, %119 : vector<2x32xf32>
      %cst_94 = arith.constant 1.000000e+00 : f32
      %122 = vector.broadcast %cst_94 : f32 to vector<2x32xf32>
      %123 = arith.divf %122, %121 : vector<2x32xf32>
      %124 = arith.mulf %93, %arg31 : vector<2x32xf32>
      %125 = arith.mulf %75, %105 : vector<2x32xf32>
      %126 = arith.addf %124, %125 : vector<2x32xf32>
      %127 = math.tanh %126 : vector<2x32xf32>
      %128 = arith.mulf %123, %127 : vector<2x32xf32>
      %129 = arith.index_cast %54 : i32 to index
      %c0_95 = arith.constant 0 : index
      %c0_96 = arith.constant 0 : index
      %130 = vector.load %arg28[%129, %c0_95, %c0_96] : memref<30x2x32xf32, #tpu.memory_space<vmem>>, vector<1x2x32xf32>
      %131 = vector.shape_cast %130 : vector<1x2x32xf32> to vector<2x32xf32>
      %132 = vector.shape_cast %128 : vector<2x32xf32> to vector<1x2x32xf32>
      tpu.vector_store %arg28[%129, %c0_95, %c0_96], %132 {strides = array<i32>} : memref<30x2x32xf32, #tpu.memory_space<vmem>>, vector<1x2x32xf32>,
      scf.yield %128, %126 : vector<2x32xf32>, vector<2x32xf32>
    }
    %c30_i32_5 = arith.constant 30 : i32
    %cst_6 = arith.constant 0.000000e+00 : f32
    %6 = vector.broadcast %cst_6 : f32 to vector<2x8xf32>
    %cst_7 = arith.constant 0.000000e+00 : f32
    %7 = vector.broadcast %cst_7 : f32 to vector<2x8xf32>
    %cst_8 = arith.constant 0.000000e+00 : f32
    %8 = vector.broadcast %cst_8 : f32 to vector<2x64xf32>
    %c0_i32_9 = arith.constant 0 : i32
    %c30_i32_10 = arith.constant 30 : i32
    %9 = arith.addi %c0_i32_9, %c30_i32_10 : i32
    %c1_i32_11 = arith.constant 1 : i32
    %10:3 = scf.for %arg29 = %c0_i32_9 to %9 step %c1_i32_11 iter_args(%arg30 = %6, %arg31 = %7, %arg32 = %8) -> (vector<2x8xf32>, vector<2x8xf32>, vector<2x64xf32>)  : i32 {
      %54 = arith.index_cast %arg29 : i32 to index
      %c0_43 = arith.constant 0 : index
      %c0_44 = arith.constant 0 : index
      %55 = vector.load %arg27[%54, %c0_43, %c0_44] : memref<30x2x32xf32, #tpu.memory_space<vmem>>, vector<1x2x32xf32>
      %56 = vector.shape_cast %55 : vector<1x2x32xf32> to vector<2x32xf32>
      %57 = arith.index_cast %arg29 : i32 to index
      %c0_45 = arith.constant 0 : index
      %c0_46 = arith.constant 0 : index
      %58 = vector.load %arg28[%57, %c0_45, %c0_46] : memref<30x2x32xf32, #tpu.memory_space<vmem>>, vector<1x2x32xf32>
      %59 = vector.shape_cast %58 : vector<1x2x32xf32> to vector<2x32xf32>
      %c0_47 = arith.constant 0 : index
      %c0_48 = arith.constant 0 : index
      %c0_49 = arith.constant 0 : index
      %60 = vector.load %arg9[%c0_47, %c0_48, %c0_49] : memref<4x8x8xf32, #tpu.memory_space<vmem>>, vector<1x8x8xf32>
      %61 = vector.shape_cast %60 : vector<1x8x8xf32> to vector<8x8xf32>
      %cst_50 = arith.constant dense<0.000000e+00> : vector<2x8xf32>
      %62 = tpu.matmul %arg30, %61, %cst_50 {dimension_numbers = #tpu.dot_dimension_numbers<[1], [0], [0], [1], [0, 0, 1, 1], [], []>} : vector<2x8xf32>, vector<8x8xf32>, vector<2x8xf32> -> vector<2x8xf32>
      %c0_51 = arith.constant 0 : index
      %c0_52 = arith.constant 0 : index
      %c0_53 = arith.constant 0 : index
      %63 = vector.load %arg10[%c0_51, %c0_52, %c0_53] : memref<4x1x8xf32, #tpu.memory_space<vmem>>, vector<1x1x8xf32>
      %64 = vector.shape_cast %63 : vector<1x1x8xf32> to vector<1x8xf32>
      %65 = vector.broadcast %64 : vector<1x8xf32> to vector<2x8xf32>
      %66 = arith.addf %62, %65 : vector<2x8xf32>
      %c0_54 = arith.constant 0 : index
      %c0_55 = arith.constant 0 : index
      %c0_56 = arith.constant 0 : index
      %67 = vector.load %arg7[%c0_54, %c0_55, %c0_56] : memref<4x32x8xf32, #tpu.memory_space<vmem>>, vector<1x32x8xf32>
      %68 = vector.shape_cast %67 : vector<1x32x8xf32> to vector<32x8xf32>
      %cst_57 = arith.constant dense<0.000000e+00> : vector<2x8xf32>
      %69 = tpu.matmul %56, %68, %cst_57 {dimension_numbers = #tpu.dot_dimension_numbers<[1], [0], [0], [1], [0, 0, 1, 1], [], []>} : vector<2x32xf32>, vector<32x8xf32>, vector<2x8xf32> -> vector<2x8xf32>
      %70 = arith.addf %66, %69 : vector<2x8xf32>
      %c0_58 = arith.constant 0 : index
      %c0_59 = arith.constant 0 : index
      %c0_60 = arith.constant 0 : index
      %71 = vector.load %arg8[%c0_58, %c0_59, %c0_60] : memref<4x32x8xf32, #tpu.memory_space<vmem>>, vector<1x32x8xf32>
      %72 = vector.shape_cast %71 : vector<1x32x8xf32> to vector<32x8xf32>
      %cst_61 = arith.constant dense<0.000000e+00> : vector<2x8xf32>
      %73 = tpu.matmul %59, %72, %cst_61 {dimension_numbers = #tpu.dot_dimension_numbers<[1], [0], [0], [1], [0, 0, 1, 1], [], []>} : vector<2x32xf32>, vector<32x8xf32>, vector<2x8xf32> -> vector<2x8xf32>
      %74 = arith.addf %70, %73 : vector<2x8xf32>
      %cst_62 = arith.constant 0.000000e+00 : f32
      %75 = vector.broadcast %cst_62 : f32 to vector<2x8xf32>
      %76 = arith.subf %75, %74 : vector<2x8xf32>
      %77 = math.exp %76 : vector<2x8xf32>
      %cst_63 = arith.constant 1.000000e+00 : f32
      %78 = vector.broadcast %cst_63 : f32 to vector<2x8xf32>
      %79 = arith.addf %78, %77 : vector<2x8xf32>
      %cst_64 = arith.constant 1.000000e+00 : f32
      %80 = vector.broadcast %cst_64 : f32 to vector<2x8xf32>
      %81 = arith.divf %80, %79 : vector<2x8xf32>
      %c1 = arith.constant 1 : index
      %c0_65 = arith.constant 0 : index
      %c0_66 = arith.constant 0 : index
      %82 = vector.load %arg9[%c1, %c0_65, %c0_66] : memref<4x8x8xf32, #tpu.memory_space<vmem>>, vector<1x8x8xf32>
      %83 = vector.shape_cast %82 : vector<1x8x8xf32> to vector<8x8xf32>
      %cst_67 = arith.constant dense<0.000000e+00> : vector<2x8xf32>
      %84 = tpu.matmul %arg30, %83, %cst_67 {dimension_numbers = #tpu.dot_dimension_numbers<[1], [0], [0], [1], [0, 0, 1, 1], [], []>} : vector<2x8xf32>, vector<8x8xf32>, vector<2x8xf32> -> vector<2x8xf32>
      %c1_68 = arith.constant 1 : index
      %c0_69 = arith.constant 0 : index
      %c0_70 = arith.constant 0 : index
      %85 = vector.load %arg10[%c1_68, %c0_69, %c0_70] : memref<4x1x8xf32, #tpu.memory_space<vmem>>, vector<1x1x8xf32>
      %86 = vector.shape_cast %85 : vector<1x1x8xf32> to vector<1x8xf32>
      %87 = vector.broadcast %86 : vector<1x8xf32> to vector<2x8xf32>
      %88 = arith.addf %84, %87 : vector<2x8xf32>
      %c1_71 = arith.constant 1 : index
      %c0_72 = arith.constant 0 : index
      %c0_73 = arith.constant 0 : index
      %89 = vector.load %arg7[%c1_71, %c0_72, %c0_73] : memref<4x32x8xf32, #tpu.memory_space<vmem>>, vector<1x32x8xf32>
      %90 = vector.shape_cast %89 : vector<1x32x8xf32> to vector<32x8xf32>
      %cst_74 = arith.constant dense<0.000000e+00> : vector<2x8xf32>
      %91 = tpu.matmul %56, %90, %cst_74 {dimension_numbers = #tpu.dot_dimension_numbers<[1], [0], [0], [1], [0, 0, 1, 1], [], []>} : vector<2x32xf32>, vector<32x8xf32>, vector<2x8xf32> -> vector<2x8xf32>
      %92 = arith.addf %88, %91 : vector<2x8xf32>
      %c1_75 = arith.constant 1 : index
      %c0_76 = arith.constant 0 : index
      %c0_77 = arith.constant 0 : index
      %93 = vector.load %arg8[%c1_75, %c0_76, %c0_77] : memref<4x32x8xf32, #tpu.memory_space<vmem>>, vector<1x32x8xf32>
      %94 = vector.shape_cast %93 : vector<1x32x8xf32> to vector<32x8xf32>
      %cst_78 = arith.constant dense<0.000000e+00> : vector<2x8xf32>
      %95 = tpu.matmul %59, %94, %cst_78 {dimension_numbers = #tpu.dot_dimension_numbers<[1], [0], [0], [1], [0, 0, 1, 1], [], []>} : vector<2x32xf32>, vector<32x8xf32>, vector<2x8xf32> -> vector<2x8xf32>
      %96 = arith.addf %92, %95 : vector<2x8xf32>
      %cst_79 = arith.constant 0.000000e+00 : f32
      %97 = vector.broadcast %cst_79 : f32 to vector<2x8xf32>
      %98 = arith.subf %97, %96 : vector<2x8xf32>
      %99 = math.exp %98 : vector<2x8xf32>
      %cst_80 = arith.constant 1.000000e+00 : f32
      %100 = vector.broadcast %cst_80 : f32 to vector<2x8xf32>
      %101 = arith.addf %100, %99 : vector<2x8xf32>
      %cst_81 = arith.constant 1.000000e+00 : f32
      %102 = vector.broadcast %cst_81 : f32 to vector<2x8xf32>
      %103 = arith.divf %102, %101 : vector<2x8xf32>
      %c2 = arith.constant 2 : index
      %c0_82 = arith.constant 0 : index
      %c0_83 = arith.constant 0 : index
      %104 = vector.load %arg9[%c2, %c0_82, %c0_83] : memref<4x8x8xf32, #tpu.memory_space<vmem>>, vector<1x8x8xf32>
      %105 = vector.shape_cast %104 : vector<1x8x8xf32> to vector<8x8xf32>
      %cst_84 = arith.constant dense<0.000000e+00> : vector<2x8xf32>
      %106 = tpu.matmul %arg30, %105, %cst_84 {dimension_numbers = #tpu.dot_dimension_numbers<[1], [0], [0], [1], [0, 0, 1, 1], [], []>} : vector<2x8xf32>, vector<8x8xf32>, vector<2x8xf32> -> vector<2x8xf32>
      %c2_85 = arith.constant 2 : index
      %c0_86 = arith.constant 0 : index
      %c0_87 = arith.constant 0 : index
      %107 = vector.load %arg10[%c2_85, %c0_86, %c0_87] : memref<4x1x8xf32, #tpu.memory_space<vmem>>, vector<1x1x8xf32>
      %108 = vector.shape_cast %107 : vector<1x1x8xf32> to vector<1x8xf32>
      %109 = vector.broadcast %108 : vector<1x8xf32> to vector<2x8xf32>
      %110 = arith.addf %106, %109 : vector<2x8xf32>
      %c2_88 = arith.constant 2 : index
      %c0_89 = arith.constant 0 : index
      %c0_90 = arith.constant 0 : index
      %111 = vector.load %arg7[%c2_88, %c0_89, %c0_90] : memref<4x32x8xf32, #tpu.memory_space<vmem>>, vector<1x32x8xf32>
      %112 = vector.shape_cast %111 : vector<1x32x8xf32> to vector<32x8xf32>
      %cst_91 = arith.constant dense<0.000000e+00> : vector<2x8xf32>
      %113 = tpu.matmul %56, %112, %cst_91 {dimension_numbers = #tpu.dot_dimension_numbers<[1], [0], [0], [1], [0, 0, 1, 1], [], []>} : vector<2x32xf32>, vector<32x8xf32>, vector<2x8xf32> -> vector<2x8xf32>
      %114 = arith.addf %110, %113 : vector<2x8xf32>
      %c2_92 = arith.constant 2 : index
      %c0_93 = arith.constant 0 : index
      %c0_94 = arith.constant 0 : index
      %115 = vector.load %arg8[%c2_92, %c0_93, %c0_94] : memref<4x32x8xf32, #tpu.memory_space<vmem>>, vector<1x32x8xf32>
      %116 = vector.shape_cast %115 : vector<1x32x8xf32> to vector<32x8xf32>
      %cst_95 = arith.constant dense<0.000000e+00> : vector<2x8xf32>
      %117 = tpu.matmul %59, %116, %cst_95 {dimension_numbers = #tpu.dot_dimension_numbers<[1], [0], [0], [1], [0, 0, 1, 1], [], []>} : vector<2x32xf32>, vector<32x8xf32>, vector<2x8xf32> -> vector<2x8xf32>
      %118 = arith.addf %114, %117 : vector<2x8xf32>
      %119 = math.tanh %118 : vector<2x8xf32>
      %c3 = arith.constant 3 : index
      %c0_96 = arith.constant 0 : index
      %c0_97 = arith.constant 0 : index
      %120 = vector.load %arg9[%c3, %c0_96, %c0_97] : memref<4x8x8xf32, #tpu.memory_space<vmem>>, vector<1x8x8xf32>
      %121 = vector.shape_cast %120 : vector<1x8x8xf32> to vector<8x8xf32>
      %cst_98 = arith.constant dense<0.000000e+00> : vector<2x8xf32>
      %122 = tpu.matmul %arg30, %121, %cst_98 {dimension_numbers = #tpu.dot_dimension_numbers<[1], [0], [0], [1], [0, 0, 1, 1], [], []>} : vector<2x8xf32>, vector<8x8xf32>, vector<2x8xf32> -> vector<2x8xf32>
      %c3_99 = arith.constant 3 : index
      %c0_100 = arith.constant 0 : index
      %c0_101 = arith.constant 0 : index
      %123 = vector.load %arg10[%c3_99, %c0_100, %c0_101] : memref<4x1x8xf32, #tpu.memory_space<vmem>>, vector<1x1x8xf32>
      %124 = vector.shape_cast %123 : vector<1x1x8xf32> to vector<1x8xf32>
      %125 = vector.broadcast %124 : vector<1x8xf32> to vector<2x8xf32>
      %126 = arith.addf %122, %125 : vector<2x8xf32>
      %c3_102 = arith.constant 3 : index
      %c0_103 = arith.constant 0 : index
      %c0_104 = arith.constant 0 : index
      %127 = vector.load %arg7[%c3_102, %c0_103, %c0_104] : memref<4x32x8xf32, #tpu.memory_space<vmem>>, vector<1x32x8xf32>
      %128 = vector.shape_cast %127 : vector<1x32x8xf32> to vector<32x8xf32>
      %cst_105 = arith.constant dense<0.000000e+00> : vector<2x8xf32>
      %129 = tpu.matmul %56, %128, %cst_105 {dimension_numbers = #tpu.dot_dimension_numbers<[1], [0], [0], [1], [0, 0, 1, 1], [], []>} : vector<2x32xf32>, vector<32x8xf32>, vector<2x8xf32> -> vector<2x8xf32>
      %130 = arith.addf %126, %129 : vector<2x8xf32>
      %c3_106 = arith.constant 3 : index
      %c0_107 = arith.constant 0 : index
      %c0_108 = arith.constant 0 : index
      %131 = vector.load %arg8[%c3_106, %c0_107, %c0_108] : memref<4x32x8xf32, #tpu.memory_space<vmem>>, vector<1x32x8xf32>
      %132 = vector.shape_cast %131 : vector<1x32x8xf32> to vector<32x8xf32>
      %cst_109 = arith.constant dense<0.000000e+00> : vector<2x8xf32>
      %133 = tpu.matmul %59, %132, %cst_109 {dimension_numbers = #tpu.dot_dimension_numbers<[1], [0], [0], [1], [0, 0, 1, 1], [], []>} : vector<2x32xf32>, vector<32x8xf32>, vector<2x8xf32> -> vector<2x8xf32>
      %134 = arith.addf %130, %133 : vector<2x8xf32>
      %cst_110 = arith.constant 0.000000e+00 : f32
      %135 = vector.broadcast %cst_110 : f32 to vector<2x8xf32>
      %136 = arith.subf %135, %134 : vector<2x8xf32>
      %137 = math.exp %136 : vector<2x8xf32>
      %cst_111 = arith.constant 1.000000e+00 : f32
      %138 = vector.broadcast %cst_111 : f32 to vector<2x8xf32>
      %139 = arith.addf %138, %137 : vector<2x8xf32>
      %cst_112 = arith.constant 1.000000e+00 : f32
      %140 = vector.broadcast %cst_112 : f32 to vector<2x8xf32>
      %141 = arith.divf %140, %139 : vector<2x8xf32>
      %142 = arith.mulf %103, %arg31 : vector<2x8xf32>
      %143 = arith.mulf %81, %119 : vector<2x8xf32>
      %144 = arith.addf %142, %143 : vector<2x8xf32>
      %145 = math.tanh %144 : vector<2x8xf32>
      %146 = arith.mulf %141, %145 : vector<2x8xf32>
      %147 = arith.index_cast %arg29 : i32 to index
      %c0_113 = arith.constant 0 : index
      %c0_114 = arith.constant 0 : index
      %148 = vector.load %arg15[%147, %c0_113, %c0_114] : memref<30x8x64xf32, #tpu.memory_space<vmem>>, vector<1x8x64xf32>
      %149 = vector.shape_cast %148 : vector<1x8x64xf32> to vector<8x64xf32>
      %cst_115 = arith.constant dense<0.000000e+00> : vector<2x64xf32>
      %150 = tpu.matmul %146, %149, %cst_115 {dimension_numbers = #tpu.dot_dimension_numbers<[1], [0], [0], [1], [0, 0, 1, 1], [], []>} : vector<2x8xf32>, vector<8x64xf32>, vector<2x64xf32> -> vector<2x64xf32>
      %151 = arith.addf %arg32, %150 : vector<2x64xf32>
      scf.yield %146, %144, %151 : vector<2x8xf32>, vector<2x8xf32>, vector<2x64xf32>
    }
    %c30_i32_12 = arith.constant 30 : i32
    %c0_i32_13 = arith.constant 0 : i32
    %c30_i32_14 = arith.constant 30 : i32
    %11 = arith.addi %c0_i32_13, %c30_i32_14 : i32
    %c1_i32_15 = arith.constant 1 : i32
    %12:3 = scf.for %arg29 = %c0_i32_13 to %11 step %c1_i32_15 iter_args(%arg30 = %6, %arg31 = %7, %arg32 = %8) -> (vector<2x8xf32>, vector<2x8xf32>, vector<2x64xf32>)  : i32 {
      %c29_i32 = arith.constant 29 : i32
      %54 = arith.subi %c29_i32, %arg29 : i32
      %55 = arith.index_cast %54 : i32 to index
      %c0_43 = arith.constant 0 : index
      %c0_44 = arith.constant 0 : index
      %56 = vector.load %arg27[%55, %c0_43, %c0_44] : memref<30x2x32xf32, #tpu.memory_space<vmem>>, vector<1x2x32xf32>
      %57 = vector.shape_cast %56 : vector<1x2x32xf32> to vector<2x32xf32>
      %58 = arith.index_cast %54 : i32 to index
      %c0_45 = arith.constant 0 : index
      %c0_46 = arith.constant 0 : index
      %59 = vector.load %arg28[%58, %c0_45, %c0_46] : memref<30x2x32xf32, #tpu.memory_space<vmem>>, vector<1x2x32xf32>
      %60 = vector.shape_cast %59 : vector<1x2x32xf32> to vector<2x32xf32>
      %c0_47 = arith.constant 0 : index
      %c0_48 = arith.constant 0 : index
      %c0_49 = arith.constant 0 : index
      %61 = vector.load %arg13[%c0_47, %c0_48, %c0_49] : memref<4x8x8xf32, #tpu.memory_space<vmem>>, vector<1x8x8xf32>
      %62 = vector.shape_cast %61 : vector<1x8x8xf32> to vector<8x8xf32>
      %cst_50 = arith.constant dense<0.000000e+00> : vector<2x8xf32>
      %63 = tpu.matmul %arg30, %62, %cst_50 {dimension_numbers = #tpu.dot_dimension_numbers<[1], [0], [0], [1], [0, 0, 1, 1], [], []>} : vector<2x8xf32>, vector<8x8xf32>, vector<2x8xf32> -> vector<2x8xf32>
      %c0_51 = arith.constant 0 : index
      %c0_52 = arith.constant 0 : index
      %c0_53 = arith.constant 0 : index
      %64 = vector.load %arg14[%c0_51, %c0_52, %c0_53] : memref<4x1x8xf32, #tpu.memory_space<vmem>>, vector<1x1x8xf32>
      %65 = vector.shape_cast %64 : vector<1x1x8xf32> to vector<1x8xf32>
      %66 = vector.broadcast %65 : vector<1x8xf32> to vector<2x8xf32>
      %67 = arith.addf %63, %66 : vector<2x8xf32>
      %c0_54 = arith.constant 0 : index
      %c0_55 = arith.constant 0 : index
      %c0_56 = arith.constant 0 : index
      %68 = vector.load %arg11[%c0_54, %c0_55, %c0_56] : memref<4x32x8xf32, #tpu.memory_space<vmem>>, vector<1x32x8xf32>
      %69 = vector.shape_cast %68 : vector<1x32x8xf32> to vector<32x8xf32>
      %cst_57 = arith.constant dense<0.000000e+00> : vector<2x8xf32>
      %70 = tpu.matmul %57, %69, %cst_57 {dimension_numbers = #tpu.dot_dimension_numbers<[1], [0], [0], [1], [0, 0, 1, 1], [], []>} : vector<2x32xf32>, vector<32x8xf32>, vector<2x8xf32> -> vector<2x8xf32>
      %71 = arith.addf %67, %70 : vector<2x8xf32>
      %c0_58 = arith.constant 0 : index
      %c0_59 = arith.constant 0 : index
      %c0_60 = arith.constant 0 : index
      %72 = vector.load %arg12[%c0_58, %c0_59, %c0_60] : memref<4x32x8xf32, #tpu.memory_space<vmem>>, vector<1x32x8xf32>
      %73 = vector.shape_cast %72 : vector<1x32x8xf32> to vector<32x8xf32>
      %cst_61 = arith.constant dense<0.000000e+00> : vector<2x8xf32>
      %74 = tpu.matmul %60, %73, %cst_61 {dimension_numbers = #tpu.dot_dimension_numbers<[1], [0], [0], [1], [0, 0, 1, 1], [], []>} : vector<2x32xf32>, vector<32x8xf32>, vector<2x8xf32> -> vector<2x8xf32>
      %75 = arith.addf %71, %74 : vector<2x8xf32>
      %cst_62 = arith.constant 0.000000e+00 : f32
      %76 = vector.broadcast %cst_62 : f32 to vector<2x8xf32>
      %77 = arith.subf %76, %75 : vector<2x8xf32>
      %78 = math.exp %77 : vector<2x8xf32>
      %cst_63 = arith.constant 1.000000e+00 : f32
      %79 = vector.broadcast %cst_63 : f32 to vector<2x8xf32>
      %80 = arith.addf %79, %78 : vector<2x8xf32>
      %cst_64 = arith.constant 1.000000e+00 : f32
      %81 = vector.broadcast %cst_64 : f32 to vector<2x8xf32>
      %82 = arith.divf %81, %80 : vector<2x8xf32>
      %c1 = arith.constant 1 : index
      %c0_65 = arith.constant 0 : index
      %c0_66 = arith.constant 0 : index
      %83 = vector.load %arg13[%c1, %c0_65, %c0_66] : memref<4x8x8xf32, #tpu.memory_space<vmem>>, vector<1x8x8xf32>
      %84 = vector.shape_cast %83 : vector<1x8x8xf32> to vector<8x8xf32>
      %cst_67 = arith.constant dense<0.000000e+00> : vector<2x8xf32>
      %85 = tpu.matmul %arg30, %84, %cst_67 {dimension_numbers = #tpu.dot_dimension_numbers<[1], [0], [0], [1], [0, 0, 1, 1], [], []>} : vector<2x8xf32>, vector<8x8xf32>, vector<2x8xf32> -> vector<2x8xf32>
      %c1_68 = arith.constant 1 : index
      %c0_69 = arith.constant 0 : index
      %c0_70 = arith.constant 0 : index
      %86 = vector.load %arg14[%c1_68, %c0_69, %c0_70] : memref<4x1x8xf32, #tpu.memory_space<vmem>>, vector<1x1x8xf32>
      %87 = vector.shape_cast %86 : vector<1x1x8xf32> to vector<1x8xf32>
      %88 = vector.broadcast %87 : vector<1x8xf32> to vector<2x8xf32>
      %89 = arith.addf %85, %88 : vector<2x8xf32>
      %c1_71 = arith.constant 1 : index
      %c0_72 = arith.constant 0 : index
      %c0_73 = arith.constant 0 : index
      %90 = vector.load %arg11[%c1_71, %c0_72, %c0_73] : memref<4x32x8xf32, #tpu.memory_space<vmem>>, vector<1x32x8xf32>
      %91 = vector.shape_cast %90 : vector<1x32x8xf32> to vector<32x8xf32>
      %cst_74 = arith.constant dense<0.000000e+00> : vector<2x8xf32>
      %92 = tpu.matmul %57, %91, %cst_74 {dimension_numbers = #tpu.dot_dimension_numbers<[1], [0], [0], [1], [0, 0, 1, 1], [], []>} : vector<2x32xf32>, vector<32x8xf32>, vector<2x8xf32> -> vector<2x8xf32>
      %93 = arith.addf %89, %92 : vector<2x8xf32>
      %c1_75 = arith.constant 1 : index
      %c0_76 = arith.constant 0 : index
      %c0_77 = arith.constant 0 : index
      %94 = vector.load %arg12[%c1_75, %c0_76, %c0_77] : memref<4x32x8xf32, #tpu.memory_space<vmem>>, vector<1x32x8xf32>
      %95 = vector.shape_cast %94 : vector<1x32x8xf32> to vector<32x8xf32>
      %cst_78 = arith.constant dense<0.000000e+00> : vector<2x8xf32>
      %96 = tpu.matmul %60, %95, %cst_78 {dimension_numbers = #tpu.dot_dimension_numbers<[1], [0], [0], [1], [0, 0, 1, 1], [], []>} : vector<2x32xf32>, vector<32x8xf32>, vector<2x8xf32> -> vector<2x8xf32>
      %97 = arith.addf %93, %96 : vector<2x8xf32>
      %cst_79 = arith.constant 0.000000e+00 : f32
      %98 = vector.broadcast %cst_79 : f32 to vector<2x8xf32>
      %99 = arith.subf %98, %97 : vector<2x8xf32>
      %100 = math.exp %99 : vector<2x8xf32>
      %cst_80 = arith.constant 1.000000e+00 : f32
      %101 = vector.broadcast %cst_80 : f32 to vector<2x8xf32>
      %102 = arith.addf %101, %100 : vector<2x8xf32>
      %cst_81 = arith.constant 1.000000e+00 : f32
      %103 = vector.broadcast %cst_81 : f32 to vector<2x8xf32>
      %104 = arith.divf %103, %102 : vector<2x8xf32>
      %c2 = arith.constant 2 : index
      %c0_82 = arith.constant 0 : index
      %c0_83 = arith.constant 0 : index
      %105 = vector.load %arg13[%c2, %c0_82, %c0_83] : memref<4x8x8xf32, #tpu.memory_space<vmem>>, vector<1x8x8xf32>
      %106 = vector.shape_cast %105 : vector<1x8x8xf32> to vector<8x8xf32>
      %cst_84 = arith.constant dense<0.000000e+00> : vector<2x8xf32>
      %107 = tpu.matmul %arg30, %106, %cst_84 {dimension_numbers = #tpu.dot_dimension_numbers<[1], [0], [0], [1], [0, 0, 1, 1], [], []>} : vector<2x8xf32>, vector<8x8xf32>, vector<2x8xf32> -> vector<2x8xf32>
      %c2_85 = arith.constant 2 : index
      %c0_86 = arith.constant 0 : index
      %c0_87 = arith.constant 0 : index
      %108 = vector.load %arg14[%c2_85, %c0_86, %c0_87] : memref<4x1x8xf32, #tpu.memory_space<vmem>>, vector<1x1x8xf32>
      %109 = vector.shape_cast %108 : vector<1x1x8xf32> to vector<1x8xf32>
      %110 = vector.broadcast %109 : vector<1x8xf32> to vector<2x8xf32>
      %111 = arith.addf %107, %110 : vector<2x8xf32>
      %c2_88 = arith.constant 2 : index
      %c0_89 = arith.constant 0 : index
      %c0_90 = arith.constant 0 : index
      %112 = vector.load %arg11[%c2_88, %c0_89, %c0_90] : memref<4x32x8xf32, #tpu.memory_space<vmem>>, vector<1x32x8xf32>
      %113 = vector.shape_cast %112 : vector<1x32x8xf32> to vector<32x8xf32>
      %cst_91 = arith.constant dense<0.000000e+00> : vector<2x8xf32>
      %114 = tpu.matmul %57, %113, %cst_91 {dimension_numbers = #tpu.dot_dimension_numbers<[1], [0], [0], [1], [0, 0, 1, 1], [], []>} : vector<2x32xf32>, vector<32x8xf32>, vector<2x8xf32> -> vector<2x8xf32>
      %115 = arith.addf %111, %114 : vector<2x8xf32>
      %c2_92 = arith.constant 2 : index
      %c0_93 = arith.constant 0 : index
      %c0_94 = arith.constant 0 : index
      %116 = vector.load %arg12[%c2_92, %c0_93, %c0_94] : memref<4x32x8xf32, #tpu.memory_space<vmem>>, vector<1x32x8xf32>
      %117 = vector.shape_cast %116 : vector<1x32x8xf32> to vector<32x8xf32>
      %cst_95 = arith.constant dense<0.000000e+00> : vector<2x8xf32>
      %118 = tpu.matmul %60, %117, %cst_95 {dimension_numbers = #tpu.dot_dimension_numbers<[1], [0], [0], [1], [0, 0, 1, 1], [], []>} : vector<2x32xf32>, vector<32x8xf32>, vector<2x8xf32> -> vector<2x8xf32>
      %119 = arith.addf %115, %118 : vector<2x8xf32>
      %120 = math.tanh %119 : vector<2x8xf32>
      %c3 = arith.constant 3 : index
      %c0_96 = arith.constant 0 : index
      %c0_97 = arith.constant 0 : index
      %121 = vector.load %arg13[%c3, %c0_96, %c0_97] : memref<4x8x8xf32, #tpu.memory_space<vmem>>, vector<1x8x8xf32>
      %122 = vector.shape_cast %121 : vector<1x8x8xf32> to vector<8x8xf32>
      %cst_98 = arith.constant dense<0.000000e+00> : vector<2x8xf32>
      %123 = tpu.matmul %arg30, %122, %cst_98 {dimension_numbers = #tpu.dot_dimension_numbers<[1], [0], [0], [1], [0, 0, 1, 1], [], []>} : vector<2x8xf32>, vector<8x8xf32>, vector<2x8xf32> -> vector<2x8xf32>
      %c3_99 = arith.constant 3 : index
      %c0_100 = arith.constant 0 : index
      %c0_101 = arith.constant 0 : index
      %124 = vector.load %arg14[%c3_99, %c0_100, %c0_101] : memref<4x1x8xf32, #tpu.memory_space<vmem>>, vector<1x1x8xf32>
      %125 = vector.shape_cast %124 : vector<1x1x8xf32> to vector<1x8xf32>
      %126 = vector.broadcast %125 : vector<1x8xf32> to vector<2x8xf32>
      %127 = arith.addf %123, %126 : vector<2x8xf32>
      %c3_102 = arith.constant 3 : index
      %c0_103 = arith.constant 0 : index
      %c0_104 = arith.constant 0 : index
      %128 = vector.load %arg11[%c3_102, %c0_103, %c0_104] : memref<4x32x8xf32, #tpu.memory_space<vmem>>, vector<1x32x8xf32>
      %129 = vector.shape_cast %128 : vector<1x32x8xf32> to vector<32x8xf32>
      %cst_105 = arith.constant dense<0.000000e+00> : vector<2x8xf32>
      %130 = tpu.matmul %57, %129, %cst_105 {dimension_numbers = #tpu.dot_dimension_numbers<[1], [0], [0], [1], [0, 0, 1, 1], [], []>} : vector<2x32xf32>, vector<32x8xf32>, vector<2x8xf32> -> vector<2x8xf32>
      %131 = arith.addf %127, %130 : vector<2x8xf32>
      %c3_106 = arith.constant 3 : index
      %c0_107 = arith.constant 0 : index
      %c0_108 = arith.constant 0 : index
      %132 = vector.load %arg12[%c3_106, %c0_107, %c0_108] : memref<4x32x8xf32, #tpu.memory_space<vmem>>, vector<1x32x8xf32>
      %133 = vector.shape_cast %132 : vector<1x32x8xf32> to vector<32x8xf32>
      %cst_109 = arith.constant dense<0.000000e+00> : vector<2x8xf32>
      %134 = tpu.matmul %60, %133, %cst_109 {dimension_numbers = #tpu.dot_dimension_numbers<[1], [0], [0], [1], [0, 0, 1, 1], [], []>} : vector<2x32xf32>, vector<32x8xf32>, vector<2x8xf32> -> vector<2x8xf32>
      %135 = arith.addf %131, %134 : vector<2x8xf32>
      %cst_110 = arith.constant 0.000000e+00 : f32
      %136 = vector.broadcast %cst_110 : f32 to vector<2x8xf32>
      %137 = arith.subf %136, %135 : vector<2x8xf32>
      %138 = math.exp %137 : vector<2x8xf32>
      %cst_111 = arith.constant 1.000000e+00 : f32
      %139 = vector.broadcast %cst_111 : f32 to vector<2x8xf32>
      %140 = arith.addf %139, %138 : vector<2x8xf32>
      %cst_112 = arith.constant 1.000000e+00 : f32
      %141 = vector.broadcast %cst_112 : f32 to vector<2x8xf32>
      %142 = arith.divf %141, %140 : vector<2x8xf32>
      %143 = arith.mulf %104, %arg31 : vector<2x8xf32>
      %144 = arith.mulf %82, %120 : vector<2x8xf32>
      %145 = arith.addf %143, %144 : vector<2x8xf32>
      %146 = math.tanh %145 : vector<2x8xf32>
      %147 = arith.mulf %142, %146 : vector<2x8xf32>
      %148 = arith.index_cast %54 : i32 to index
      %c0_113 = arith.constant 0 : index
      %c0_114 = arith.constant 0 : index
      %149 = vector.load %arg16[%148, %c0_113, %c0_114] : memref<30x8x64xf32, #tpu.memory_space<vmem>>, vector<1x8x64xf32>
      %150 = vector.shape_cast %149 : vector<1x8x64xf32> to vector<8x64xf32>
      %cst_115 = arith.constant dense<0.000000e+00> : vector<2x64xf32>
      %151 = tpu.matmul %147, %150, %cst_115 {dimension_numbers = #tpu.dot_dimension_numbers<[1], [0], [0], [1], [0, 0, 1, 1], [], []>} : vector<2x8xf32>, vector<8x64xf32>, vector<2x64xf32> -> vector<2x64xf32>
      %152 = arith.addf %arg32, %151 : vector<2x64xf32>
      scf.yield %147, %145, %152 : vector<2x8xf32>, vector<2x8xf32>, vector<2x64xf32>
    }
    %c30_i32_16 = arith.constant 30 : i32
    %13 = arith.addf %10#2, %12#2 : vector<2x64xf32>
    %c0 = arith.constant 0 : index
    %c0_17 = arith.constant 0 : index
    %14 = vector.load %arg17[%c0, %c0_17] : memref<1x64xf32, #tpu.memory_space<vmem>>, vector<1x64xf32>
    %15 = vector.broadcast %14 : vector<1x64xf32> to vector<2x64xf32>
    %16 = arith.addf %13, %15 : vector<2x64xf32>
    %c0_18 = arith.constant 0 : index
    %c0_19 = arith.constant 0 : index
    %17 = vector.load %arg18[%c0_18, %c0_19] : memref<1x64xf32, #tpu.memory_space<vmem>>, vector<1x64xf32>
    %18 = vector.broadcast %17 : vector<1x64xf32> to vector<2x64xf32>
    %19 = arith.mulf %16, %18 : vector<2x64xf32>
    %c0_20 = arith.constant 0 : index
    %c0_21 = arith.constant 0 : index
    %20 = vector.load %arg19[%c0_20, %c0_21] : memref<1x64xf32, #tpu.memory_space<vmem>>, vector<1x64xf32>
    %21 = vector.broadcast %20 : vector<1x64xf32> to vector<2x64xf32>
    %22 = arith.addf %19, %21 : vector<2x64xf32>
    %cst_22 = arith.constant 0.000000e+00 : f32
    %23 = vector.broadcast %cst_22 : f32 to vector<2x64xf32>
    %24 = arith.maximumf %22, %23 : vector<2x64xf32>
    %c0_23 = arith.constant 0 : index
    %c0_24 = arith.constant 0 : index
    %25 = vector.load %arg20[%c0_23, %c0_24] : memref<64x8xf32, #tpu.memory_space<vmem>>, vector<64x8xf32>
    %cst_25 = arith.constant dense<0.000000e+00> : vector<2x8xf32>
    %26 = tpu.matmul %24, %25, %cst_25 {dimension_numbers = #tpu.dot_dimension_numbers<[1], [0], [0], [1], [0, 0, 1, 1], [], []>} : vector<2x64xf32>, vector<64x8xf32>, vector<2x8xf32> -> vector<2x8xf32>
    %c0_26 = arith.constant 0 : index
    %c0_27 = arith.constant 0 : index
    %27 = vector.load %arg21[%c0_26, %c0_27] : memref<1x8xf32, #tpu.memory_space<vmem>>, vector<1x8xf32>
    %28 = vector.broadcast %27 : vector<1x8xf32> to vector<2x8xf32>
    %29 = arith.addf %26, %28 : vector<2x8xf32>
    %c0_28 = arith.constant 0 : index
    %c0_29 = arith.constant 0 : index
    %30 = vector.load %arg22[%c0_28, %c0_29] : memref<1x8xf32, #tpu.memory_space<vmem>>, vector<1x8xf32>
    %31 = vector.broadcast %30 : vector<1x8xf32> to vector<2x8xf32>
    %32 = arith.mulf %29, %31 : vector<2x8xf32>
    %c0_30 = arith.constant 0 : index
    %c0_31 = arith.constant 0 : index
    %33 = vector.load %arg23[%c0_30, %c0_31] : memref<1x8xf32, #tpu.memory_space<vmem>>, vector<1x8xf32>
    %34 = vector.broadcast %33 : vector<1x8xf32> to vector<2x8xf32>
    %35 = arith.addf %32, %34 : vector<2x8xf32>
    %cst_32 = arith.constant 0.000000e+00 : f32
    %36 = vector.broadcast %cst_32 : f32 to vector<2x8xf32>
    %37 = arith.maximumf %35, %36 : vector<2x8xf32>
    %c0_33 = arith.constant 0 : index
    %c0_34 = arith.constant 0 : index
    %38 = vector.load %arg24[%c0_33, %c0_34] : memref<1x8xf32, #tpu.memory_space<vmem>>, vector<1x8xf32>
    %39 = vector.broadcast %38 : vector<1x8xf32> to vector<2x8xf32>
    %40 = arith.mulf %37, %39 : vector<2x8xf32>
    %cst_35 = arith.constant dense<0.000000e+00> : vector<2xf32>
    %41 = vector.multi_reduction <add>, %40, %cst_35 [1] : vector<2x8xf32> to vector<2xf32>
    %42 = vector.shape_cast %41 : vector<2xf32> to vector<2x1xf32>
    %c0_36 = arith.constant 0 : index
    %c0_37 = arith.constant 0 : index
    %43 = vector.load %arg25[%c0_36, %c0_37] : memref<1x1xf32, #tpu.memory_space<vmem>>, vector<1x1xf32>
    %44 = vector.broadcast %43 : vector<1x1xf32> to vector<2x1xf32>
    %45 = arith.addf %42, %44 : vector<2x1xf32>
    %cst_38 = arith.constant 0.000000e+00 : f32
    %46 = vector.broadcast %cst_38 : f32 to vector<2x1xf32>
    %47 = arith.subf %46, %45 : vector<2x1xf32>
    %48 = math.exp %47 : vector<2x1xf32>
    %cst_39 = arith.constant 1.000000e+00 : f32
    %49 = vector.broadcast %cst_39 : f32 to vector<2x1xf32>
    %50 = arith.addf %49, %48 : vector<2x1xf32>
    %cst_40 = arith.constant 1.000000e+00 : f32
    %51 = vector.broadcast %cst_40 : f32 to vector<2x1xf32>
    %52 = arith.divf %51, %50 : vector<2x1xf32>
    %c0_41 = arith.constant 0 : index
    %c0_42 = arith.constant 0 : index
    %53 = vector.load %arg26[%c0_41, %c0_42] : memref<2x1xf32, #tpu.memory_space<vmem>>, vector<2x1xf32>
    tpu.vector_store %arg26[%c0_41, %c0_42], %52 {strides = array<i32>} : memref<2x1xf32, #tpu.memory_space<vmem>>, vector<2x1xf32>,
    return
  }
}

</mosaic_0001>

<bundles_post_ra>
// kernel: discriminator_realfake_seq.1
= control target key start
LH: loop header
LB: loop body
LE: loop exit
PB: predicated region body
PF: predicated region fallthrough
CT: control target
= control target key end

     0   :  { %v5106_v1 = vmov 0.0   ;;  %v5108_v2 = vmov 0.0   ;;  %s6482_s0 = inlined_call_operand.vmem [shape: f32[30,2,136], index: 0, kind: input, shape index: {}]   ;;  %s6483_s1 = inlined_call_operand.vmem [shape: f32[4,136,32], index: 1, kind: input, shape index: {}]   ;;  %s6484_s2 = inlined_call_operand.vmem [shape: f32[4,32,32], index: 2, kind: input, shape index: {}]   ;;  %s6485_s3 = inlined_call_operand.vmem [shape: f32[4,1,32], index: 3, kind: input, shape index: {}]   ;;  %s6486_s4 = inlined_call_operand.vmem [shape: f32[4,136,32], index: 4, kind: input, shape index: {}]   ;;  %s6487_s5 = inlined_call_operand.vmem [shape: f32[4,32,32], index: 5, kind: input, shape index: {}]   ;;  %s6488_s6 = inlined_call_operand.vmem [shape: f32[4,1,32], index: 6, kind: input, shape index: {}]   ;;  %s6489_s7 = inlined_call_operand.vmem [shape: f32[4,32,8], index: 7, kind: input, shape index: {}]   ;;  %s6490_s8 = inlined_call_operand.vmem [shape: f32[4,32,8], index: 8, kind: input, shape index: {}]   ;;  %s6491_s9 = inlined_call_operand.vmem [shape: f32[4,8,8], index: 9, kind: input, shape index: {}]   ;;  %s6492_s10 = inlined_call_operand.vmem [shape: f32[4,1,8], index: 10, kind: input, shape index: {}]   ;;  %s6493_s11 = inlined_call_operand.vmem [shape: f32[4,32,8], index: 11, kind: input, shape index: {}]   ;;  %s6494_s12 = inlined_call_operand.vmem [shape: f32[4,32,8], index: 12, kind: input, shape index: {}]   ;;  %s6495_s13 = inlined_call_operand.vmem [shape: f32[4,8,8], index: 13, kind: input, shape index: {}]   ;;  %s6496_s14 = inlined_call_operand.vmem [shape: f32[4,1,8], index: 14, kind: input, shape index: {}]   ;;  %s6497_s15 = inlined_call_operand.vmem [shape: f32[30,8,64], index: 15, kind: input, shape index: {}]   ;;  %s6498_s16 = inlined_call_operand.vmem [shape: f32[30,8,64], index: 16, kind: input, shape index: {}]   ;;  %s6499_s17 = inlined_call_operand.vmem [shape: f32[1,64], index: 17, kind: input, shape index: {}]   ;;  %s6500_s18 = inlined_call_operand.vmem [shape: f32[1,64], index: 18, kind: input, shape index: {}]   ;;  %s6501_s19 = inlined_call_operand.vmem [shape: f32[1,64], index: 19, kind: input, shape index: {}]   ;;  %s6502_s20 = inlined_call_operand.vmem [shape: f32[64,8], index: 20, kind: input, shape index: {}]   ;;  %s6503_s21 = inlined_call_operand.vmem [shape: f32[1,8], index: 21, kind: input, shape index: {}]   ;;  %s6504_s22 = inlined_call_operand.vmem [shape: f32[1,8], index: 22, kind: input, shape index: {}]   ;;  %s6505_s23 = inlined_call_operand.vmem [shape: f32[1,8], index: 23, kind: input, shape index: {}]   ;;  %s6506_s24 = inlined_call_operand.vmem [shape: f32[1,8], index: 24, kind: input, shape index: {}]   ;;  %s6507_s25 = inlined_call_operand.<no memory space> [shape: f32[1,1], index: 25, kind: input, shape index: {}]   ;;  %s6508_s26 = inlined_call_operand.vmem [shape: f32[2,1], index: 26, kind: output, shape index: {}]  }
   0x1   :  { %6519 = sst [smem:[#allocation5_spill]] %s6482_s0  ;;  %v31_v0 = vstv %s6507_s25 }
   0x2   :  { %6520 = sst [smem:[#allocation6_spill]] %s6483_s1  ;;  %32 = vst [vmem:[#allocation4] sm:$0x1] %v31_v0 }
   0x3   :  { %6521 = sst [smem:[#allocation7_spill]] %s6484_s2 }
   0x4   :  { %6522 = sst [smem:[#allocation8_spill]] %s6485_s3 }
   0x5   :  { %6523 = sst [smem:[#allocation9_spill]] %s6486_s4 }
   0x6   :  { %6524 = sst [smem:[#allocation10_spill]] %s6487_s5 }
   0x7   :  { %6525 = sst [smem:[#allocation11_spill]] %s6488_s6 }
   0x8   :  { %6526 = sst [smem:[#allocation12_spill]] %s6489_s7  ;;  %s5110_s7 = smov 0  }
   0x9   :  { %6527 = sst [smem:[#allocation13_spill]] %s6490_s8 }
   0xa   :  { %6528 = sst [smem:[#allocation14_spill]] %s6491_s9 }
   0xb   :  { %6529 = sst [smem:[#allocation15_spill]] %s6492_s10 }
   0xc LB: > { %s6530_s8 = sld [smem:[#allocation7_spill]]  ;;  %v4958_v5 = vmov 0.0   ;;  %vm108_vm0 = vcmask 261120   ;;  %vm4959_vm1 = vmmov 0   ;;  %s4172_s27 = sshll.u32 %s4912_s7, 2  ;;  %vm209_vm2 = vcmask 64512   ;;  %s4912_s7 = sphi %s5110_s7, %s90_s7   ;;  %v4908_v2 = vphi %v5108_v2, %v822_v2   ;;  %v4904_v1 = vphi %v5106_v1, %v820_v1  }
   0xd   : > { %4323 = vmatprep.subr.mxu1 %v4958_v5  ;;  %4334 = vmatprep.subr.mxu0 %v4958_v5  ;;  %s6531_s0 = sld [smem:[#allocation6_spill]]  ;;  %vm824_vm3 = vcmask 254976  }
   0xe   : > { %4342 = vmatprep.mubr.msk.f32.mxu0 %vm4959_vm1, %v4958_v5  ;;  %4331 = vmatprep.mubr.msk.f32.mxu1 %vm4959_vm1, %v4958_v5  ;;  %s6532_s30 = sld [smem:[#allocation5_spill]] }
  0x12   : > { %v100_v3 = vld [vmem:[%s6530_s8 + $0x18] sm:$0xff]  ;;  %v99_v6 = vld [vmem:[%s6530_s8 + $0x10] sm:$0xff]  ;;  %v98_v8 = vld [vmem:[%s6530_s8 + $0x8] sm:$0xff] }
  0x13   : > { %v3912_v4 = vld [vmem:[%s6530_s8 + $0x38] sm:$0xff]  ;;  %v3911_v7 = vld [vmem:[%s6530_s8 + $0x30] sm:$0xff]  ;;  %4324 = vmatpush3.msra.mxu1 %v100_v3  ;;  %v3910_v9 = vld [vmem:[%s6530_s8 + $0x28] sm:$0xff] }
  0x14   : > { %4335 = vmatpush3.msra.mxu0 %v3912_v4  ;;  %4325 = vmatprep.subr.mxu1 %v4958_v5  ;;  %v97_v10 = vld [vmem:[%s6530_s8] sm:$0xff]  ;;  %v197_v12 = vld [vmem:[%s6531_s0 + $0x78] sm:$0xff]  ;;  %v196_v14 = vld [vmem:[%s6531_s0 + $0x70] sm:$0xff]  ;;  %s95_s2 = scalar_lea.vmem %s6532_s30, %s4172_s27  ;;  %s6533_s30 = sld [smem:[#allocation8_spill]] }
  0x15   : > { %4336 = vmatprep.subr.mxu0 %v4958_v5  ;;  %4326 = vmatpush3.msra.mxu1 %v99_v6  ;;  %v3909_v11 = vld [vmem:[%s6530_s8 + $0x20] sm:$0xff]  ;;  %v3930_v15 = vld [vmem:[%s6531_s0 + $0xf8] sm:$0xff]  ;;  %v195_v16 = vld [vmem:[%s6531_s0 + $0x68] sm:$0xff]  ;;  %s3903_s27 = sshll.u32 %s4912_s7, 1  ;;  %s90_s7 = sadd.s32 1, %s4912_s7  }
  0x16   : > { %4337 = vmatpush3.msra.mxu0 %v3911_v7  ;;  %4327 = vmatprep.subr.mxu1 %v4958_v5  ;;  %v3931_v13 = vld [vmem:[%s6531_s0 + $0x100] sm:$0xff]  ;;  %v3929_v17 = vld [vmem:[%s6531_s0 + $0xf0] sm:$0xff]  ;;  %v3928_v19 = vld [vmem:[%s6531_s0 + $0xe8] sm:$0xff]  ;;  %s823_s28 = scalar_lea.vmem [#allocation2], %s3903_s27  ;;  %p87_p0 = scmp.ge.s32.totalorder %s90_s7, 30  }
  0x17   : > { %4338 = vmatprep.subr.mxu0 %v4958_v5  ;;  %4328 = vmatpush3.msra.mxu1 %v98_v8  ;;  %v194_v18 = vld [vmem:[%s6531_s0 + $0x60] sm:$0xff]  ;;  %v193_v20 = vld [vmem:[%s6531_s0 + $0x58] sm:$0xff]  ;;  %v192_v22 = vld [vmem:[%s6531_s0 + $0x50] sm:$0xff]  ;;  %s5521_s25 = smov (%p87_p0), 0  }
  0x18   : > { %4339 = vmatpush3.msra.mxu0 %v3910_v9  ;;  %4329 = vmatprep.subr.mxu1 %v4958_v5  ;;  %v3927_v21 = vld [vmem:[%s6531_s0 + $0xe0] sm:$0xff]  ;;  %v3926_v23 = vld [vmem:[%s6531_s0 + $0xd8] sm:$0xff]  ;;  %v191_v24 = vld [vmem:[%s6531_s0 + $0x48] sm:$0xff] }
  0x19   : > { %4340 = vmatprep.subr.mxu0 %v4958_v5  ;;  %4330 = vmatpush3.msra.mxu1 %v97_v10  ;;  %v3925_v25 = vld [vmem:[%s6531_s0 + $0xd0] sm:$0xff]  ;;  %v190_v26 = vld [vmem:[%s6531_s0 + $0x40] sm:$0xff]  ;;  %v3924_v27 = vld [vmem:[%s6531_s0 + $0xc8] sm:$0xff] }
  0x1a   : > { %4341 = vmatpush3.msra.mxu0 %v3909_v11  ;;  %212 = vmatprep.subr.mxu1 %v4958_v5  ;;  %v189_v28 = vld [vmem:[%s6531_s0 + $0x38] sm:$0xff]  ;;  %v3923_v29 = vld [vmem:[%s6531_s0 + $0xc0] sm:$0xff]  ;;  %v188_v30 = vld [vmem:[%s6531_s0 + $0x30] sm:$0xff] }
  0x1b   : > { %4343 = vmatmul.mubr.msk.f32.vlgmr.msra.gmra.mxu0 %vm108_vm0, %v4908_v2  ;;  %390 = vmatprep.subr.mxu0 %v4958_v5  ;;  %v3922_v31 = vld [vmem:[%s6531_s0 + $0xb8] sm:$0xff]  ;;  %v187_v32 = vld [vmem:[%s6531_s0 + $0x28] sm:$0xff]  ;;  %v3921_v33 = vld [vmem:[%s6531_s0 + $0xb0] sm:$0xff] }
  0x1c   : > { %4332 = vmatmul.mubr.msk.f32.vlgmr.msra.gmra.mxu1 %vm108_vm0, %v4908_v2  ;;  %391 = vmatpush1.msra.mxu0 %v3931_v13  ;;  %v186_v34 = vld [vmem:[%s6531_s0 + $0x20] sm:$0xff]  ;;  %v3920_v35 = vld [vmem:[%s6531_s0 + $0xa8] sm:$0xff]  ;;  %v185_v36 = vld [vmem:[%s6531_s0 + $0x18] sm:$0xff] }
  0x1d   : > { %213 = vmatpush1.msra.mxu1 %v197_v12  ;;  %392 = vmatprep.subr.mxu0 %v4958_v5  ;;  %v3919_v37 = vld [vmem:[%s6531_s0 + $0xa0] sm:$0xff]  ;;  %v184_v38 = vld [vmem:[%s6531_s0 + $0x10] sm:$0xff]  ;;  %v3918_v39 = vld [vmem:[%s6531_s0 + $0x98] sm:$0xff] }
  0x1e   : > { %214 = vmatprep.subr.mxu1 %v4958_v5  ;;  %393 = vmatpush1.msra.mxu0 %v3930_v15  ;;  %v183_v40 = vld [vmem:[%s6531_s0 + $0x8] sm:$0xff]  ;;  %v3917_v41 = vld [vmem:[%s6531_s0 + $0x90] sm:$0xff]  ;;  %v5283_v42 = vld.sshfl [vmem:[%s95_s2] sm:$0x33 pattern:$0x76325410] }
  0x1f   : > { %215 = vmatpush1.msra.mxu1 %v196_v14  ;;  %394 = vmatprep.subr.mxu0 %v4958_v5  ;;  %v182_v43 = vld [vmem:[%s6531_s0] sm:$0xff]  ;;  %v3916_v44 = vld [vmem:[%s6531_s0 + $0x88] sm:$0xff]  ;;  %v5295_v45 = vcombine.high %v5283_v42, %v5283_v42  ;;  %v3937_v48 = vld [vmem:[%s6530_s8 + $0x58] sm:$0xff] }
  0x20   : > { %216 = vmatprep.subr.mxu1 %v4958_v5  ;;  %395 = vmatpush1.msra.mxu0 %v3929_v17  ;;  %v198_v46 = vld [vmem:[%s6531_s0 + $0x80] sm:$0xff]  ;;  %v3932_v47 = vld [vmem:[%s6531_s0 + $0x108] sm:$0xff]  ;;  %v3962_v49 = vld [vmem:[%s6530_s8 + $0x78] sm:$0xff] }
  0x21   : > { %217 = vmatpush1.msra.mxu1 %v195_v16  ;;  %396 = vmatprep.subr.mxu0 %v4958_v5  ;;  %v3936_v50 = vld [vmem:[%s6530_s8 + $0x50] sm:$0xff]  ;;  %v3935_v52 = vld [vmem:[%s6530_s8 + $0x48] sm:$0xff]  ;;  %v3934_v54 = vld [vmem:[%s6530_s8 + $0x40] sm:$0xff] }
  0x22   : > { %218 = vmatprep.subr.mxu1 %v4958_v5  ;;  %397 = vmatpush1.msra.mxu0 %v3928_v19  ;;  %v3961_v51 = vld [vmem:[%s6530_s8 + $0x70] sm:$0xff]  ;;  %v3960_v53 = vld [vmem:[%s6530_s8 + $0x68] sm:$0xff]  ;;  %v3959_v55 = vld [vmem:[%s6530_s8 + $0x60] sm:$0xff] }
  0x23   : > { %219 = vmatpush1.msra.mxu1 %v194_v18  ;;  %398 = vmatprep.subr.mxu0 %v4958_v5  ;;  %v3956_v56 = vld [vmem:[%s6531_s0 + $0x188] sm:$0xff]  ;;  %v3981_v57 = vld [vmem:[%s6531_s0 + $0x210] sm:$0xff]  ;;  %v3955_v58 = vld [vmem:[%s6531_s0 + $0x180] sm:$0xff] }
  0x24   : > { %220 = vmatprep.subr.mxu1 %v4958_v5  ;;  %399 = vmatpush1.msra.mxu0 %v3927_v21  ;;  %v3980_v59 = vld [vmem:[%s6531_s0 + $0x208] sm:$0xff]  ;;  %v3954_v60 = vld [vmem:[%s6531_s0 + $0x178] sm:$0xff]  ;;  %v3979_v61 = vld [vmem:[%s6531_s0 + $0x200] sm:$0xff] }
  0x25   : > { %221 = vmatpush1.msra.mxu1 %v193_v20  ;;  %400 = vmatprep.subr.mxu0 %v4958_v5  ;;  %v3953_v62 = vld [vmem:[%s6531_s0 + $0x170] sm:$0xff]  ;;  %v3978_v63 = vld [vmem:[%s6531_s0 + $0x1f8] sm:$0xff]  ;;  %v3952_v0 = vld [vmem:[%s6531_s0 + $0x168] sm:$0xff] }
  0x26   : > { %222 = vmatprep.subr.mxu1 %v4958_v5  ;;  %401 = vmatpush1.msra.mxu0 %v3926_v23  ;;  %v3951_v3 = vld [vmem:[%s6531_s0 + $0x160] sm:$0xff]  ;;  %v3976_v4 = vld [vmem:[%s6531_s0 + $0x1e8] sm:$0xff]  ;;  %v3950_v6 = vld [vmem:[%s6531_s0 + $0x158] sm:$0xff] }
  0x27   : > { %223 = vmatpush1.msra.mxu1 %v192_v22  ;;  %402 = vmatprep.subr.mxu0 %v4958_v5  ;;  %v3975_v7 = vld [vmem:[%s6531_s0 + $0x1e0] sm:$0xff]  ;;  %v3949_v8 = vld [vmem:[%s6531_s0 + $0x150] sm:$0xff]  ;;  %v3974_v9 = vld [vmem:[%s6531_s0 + $0x1d8] sm:$0xff] }
  0x28   : > { %224 = vmatprep.subr.mxu1 %v4958_v5  ;;  %403 = vmatpush1.msra.mxu0 %v3925_v25  ;;  %v3948_v10 = vld [vmem:[%s6531_s0 + $0x148] sm:$0xff]  ;;  %v3973_v11 = vld [vmem:[%s6531_s0 + $0x1d0] sm:$0xff]  ;;  %v3947_v12 = vld [vmem:[%s6531_s0 + $0x140] sm:$0xff] }
  0x29   : > { %225 = vmatpush1.msra.mxu1 %v191_v24  ;;  %404 = vmatprep.subr.mxu0 %v4958_v5  ;;  %v3972_v13 = vld [vmem:[%s6531_s0 + $0x1c8] sm:$0xff]  ;;  %v3946_v14 = vld [vmem:[%s6531_s0 + $0x138] sm:$0xff]  ;;  %v3971_v15 = vld [vmem:[%s6531_s0 + $0x1c0] sm:$0xff] }
  0x2a   : > { %226 = vmatprep.subr.mxu1 %v4958_v5  ;;  %405 = vmatpush1.msra.mxu0 %v3924_v27  ;;  %v3945_v16 = vld [vmem:[%s6531_s0 + $0x130] sm:$0xff]  ;;  %v3970_v17 = vld [vmem:[%s6531_s0 + $0x1b8] sm:$0xff]  ;;  %v3944_v18 = vld [vmem:[%s6531_s0 + $0x128] sm:$0xff] }
  0x2b   : > { %227 = vmatpush1.msra.mxu1 %v190_v26  ;;  %406 = vmatprep.subr.mxu0 %v4958_v5  ;;  %v3969_v19 = vld [vmem:[%s6531_s0 + $0x1b0] sm:$0xff]  ;;  %v3943_v20 = vld [vmem:[%s6531_s0 + $0x120] sm:$0xff]  ;;  %v3968_v21 = vld [vmem:[%s6531_s0 + $0x1a8] sm:$0xff] }
  0x2c   : > { %228 = vmatprep.subr.mxu1 %v4958_v5  ;;  %407 = vmatpush1.msra.mxu0 %v3923_v29  ;;  %v3942_v22 = vld [vmem:[%s6531_s0 + $0x118] sm:$0xff]  ;;  %v3967_v23 = vld [vmem:[%s6531_s0 + $0x1a0] sm:$0xff]  ;;  %v3941_v24 = vld [vmem:[%s6531_s0 + $0x110] sm:$0xff] }
  0x2d   : > { %229 = vmatpush1.msra.mxu1 %v189_v28  ;;  %408 = vmatprep.subr.mxu0 %v4958_v5  ;;  %v3966_v25 = vld [vmem:[%s6531_s0 + $0x198] sm:$0xff]  ;;  %v3957_v26 = vld [vmem:[%s6531_s0 + $0x190] sm:$0xff] }
  0x2e   : > { %230 = vmatprep.subr.mxu1 %v4958_v5  ;;  %409 = vmatpush1.msra.mxu0 %v3922_v31  ;;  %v3982_v27 = vld [vmem:[%s6531_s0 + $0x218] sm:$0xff] }
  0x2f   : > { %231 = vmatpush1.msra.mxu1 %v188_v30  ;;  %410 = vmatprep.subr.mxu0 %v4958_v5 }
  0x30   : > { %232 = vmatprep.subr.mxu1 %v4958_v5  ;;  %411 = vmatpush1.msra.mxu0 %v3921_v33 }
  0x31   : > { %233 = vmatpush1.msra.mxu1 %v187_v32  ;;  %412 = vmatprep.subr.mxu0 %v4958_v5 }
  0x32   : > { %234 = vmatprep.subr.mxu1 %v4958_v5  ;;  %413 = vmatpush1.msra.mxu0 %v3920_v35  ;;  %v3914_v35 = vld [vmem:[%s6533_s30 + $0x1] ss:$0 sm:$0xff] }
  0x33   : > { %235 = vmatpush1.msra.mxu1 %v186_v34  ;;  %414 = vmatprep.subr.mxu0 %v4958_v5 }
  0x34   : > { %236 = vmatprep.subr.mxu1 %v4958_v5  ;;  %415 = vmatpush1.msra.mxu0 %v3919_v37  ;;  %v3905_v37 = vld [vmem:[%s6533_s30] ss:$0 sm:$0xff] }
  0x35   : > { %237 = vmatpush1.msra.mxu1 %v185_v36  ;;  %416 = vmatprep.subr.mxu0 %v4958_v5 }
  0x36   : > { %238 = vmatprep.subr.mxu1 %v4958_v5  ;;  %417 = vmatpush1.msra.mxu0 %v3918_v39 }
  0x37   : > { %239 = vmatpush1.msra.mxu1 %v184_v38  ;;  %418 = vmatprep.subr.mxu0 %v4958_v5 }
  0x38   : > { %240 = vmatprep.subr.mxu1 %v4958_v5  ;;  %419 = vmatpush1.msra.mxu0 %v3917_v41 }
  0x39   : > { %241 = vmatpush1.msra.mxu1 %v183_v40  ;;  %420 = vmatprep.subr.mxu0 %v4958_v5 }
  0x3a   : > { %242 = vmatprep.subr.mxu1 %v4958_v5  ;;  %421 = vmatpush1.msra.mxu0 %v3916_v44 }
  0x3b   : > { %243 = vmatpush1.msra.mxu1 %v182_v43  ;;  %452 = vmatprep.subr.mxu0 %v4958_v5 }
  0x3c   : > { %274 = vmatprep.subr.mxu1 %v4958_v5  ;;  %3908 = vmatprep.mubr.msk.f32.mxu1 %vm209_vm2, %v5295_v45 }
  0x3d   : > { %275 = vmatpush2.msra.mxu1 %v198_v46  ;;  %453 = vmatpush2.msra.mxu0 %v3932_v47 }
  0x3e   : > { %3933 = vmatprep.mubr.msk.f32.mxu0 %vm209_vm2, %v5295_v45  ;;  %277 = vmatmul.mubr.f32.vlgmr.msra.gmra.mxu1 %v5283_v42 }
  0x3f   : > { %455 = vmatmul.mubr.f32.vlgmr.msra.gmra.mxu0 %v5283_v42  ;;  %4345 = vmatprep.subr.mxu1 %v4958_v5 }
  0x40   : > { %4356 = vmatprep.subr.mxu0 %v4958_v5  ;;  %4346 = vmatpush3.msra.mxu1 %v3937_v48 }
  0x41   : > { %4357 = vmatpush3.msra.mxu0 %v3962_v49  ;;  %4347 = vmatprep.subr.mxu1 %v4958_v5 }
  0x42   : > { %4358 = vmatprep.subr.mxu0 %v4958_v5  ;;  %4348 = vmatpush3.msra.mxu1 %v3936_v50 }
  0x43   : > { %4359 = vmatpush3.msra.mxu0 %v3961_v51  ;;  %4349 = vmatprep.subr.mxu1 %v4958_v5  ;;  %v3964_v51 = vld [vmem:[%s6533_s30 + $0x3] ss:$0 sm:$0xff] }
  0x44   : > { %4360 = vmatprep.subr.mxu0 %v4958_v5  ;;  %4350 = vmatpush3.msra.mxu1 %v3935_v52  ;;  %v3939_v52 = vld [vmem:[%s6533_s30 + $0x2] ss:$0 sm:$0xff] }
  0x45   : > { %4361 = vmatpush3.msra.mxu0 %v3960_v53  ;;  %4351 = vmatprep.subr.mxu1 %v4958_v5 }
  0x46   : > { %4362 = vmatprep.subr.mxu0 %v4958_v5  ;;  %4352 = vmatpush3.msra.mxu1 %v3934_v54 }
  0x47   : > { %4363 = vmatpush3.msra.mxu0 %v3959_v55  ;;  %4364 = vmatprep.mubr.msk.f32.mxu0 %vm4959_vm1, %v4958_v5 }
  0x48   : > { %4353 = vmatprep.mubr.msk.f32.mxu1 %vm4959_vm1, %v4958_v5  ;;  %568 = vmatprep.subr.mxu1 %v4958_v5 }
  0x49   : > { %4365 = vmatmul.mubr.msk.f32.vlgmr.msra.gmra.mxu0 %vm108_vm0, %v4908_v2  ;;  %741 = vmatprep.subr.mxu0 %v4958_v5 }
  0x4a   : > { %4354 = vmatmul.mubr.msk.f32.vlgmr.msra.gmra.mxu1 %vm108_vm0, %v4908_v2  ;;  %742 = vmatpush1.msra.mxu0 %v3981_v57  ;;  %v3977_v2 = vld [vmem:[%s6531_s0 + $0x1f0] sm:$0xff] }
  0x4b   : > { %569 = vmatpush1.msra.mxu1 %v3956_v56  ;;  %743 = vmatprep.subr.mxu0 %v4958_v5 }
  0x4c   : > { %570 = vmatprep.subr.mxu1 %v4958_v5  ;;  %744 = vmatpush1.msra.mxu0 %v3980_v59 }
  0x4d   : > { %571 = vmatpush1.msra.mxu1 %v3955_v58  ;;  %745 = vmatprep.subr.mxu0 %v4958_v5 }
  0x4e   : > { %572 = vmatprep.subr.mxu1 %v4958_v5  ;;  %746 = vmatpush1.msra.mxu0 %v3979_v61 }
  0x4f   : > { %573 = vmatpush1.msra.mxu1 %v3954_v60  ;;  %747 = vmatprep.subr.mxu0 %v4958_v5 }
  0x50   : > { %574 = vmatprep.subr.mxu1 %v4958_v5  ;;  %748 = vmatpush1.msra.mxu0 %v3978_v63 }
  0x51   : > { %575 = vmatpush1.msra.mxu1 %v3953_v62  ;;  %749 = vmatprep.subr.mxu0 %v4958_v5 }
  0x52   : > { %576 = vmatprep.subr.mxu1 %v4958_v5  ;;  %750 = vmatpush1.msra.mxu0 %v3977_v2 }
  0x53   : > { %577 = vmatpush1.msra.mxu1 %v3952_v0  ;;  %751 = vmatprep.subr.mxu0 %v4958_v5 }
  0x54   : > { %578 = vmatprep.subr.mxu1 %v4958_v5  ;;  %752 = vmatpush1.msra.mxu0 %v3976_v4 }
  0x55   : > { %579 = vmatpush1.msra.mxu1 %v3951_v3  ;;  %753 = vmatprep.subr.mxu0 %v4958_v5 }
  0x56   : > { %580 = vmatprep.subr.mxu1 %v4958_v5  ;;  %754 = vmatpush1.msra.mxu0 %v3975_v7 }
  0x57   : > { %581 = vmatpush1.msra.mxu1 %v3950_v6  ;;  %755 = vmatprep.subr.mxu0 %v4958_v5 }
  0x58   : > { %582 = vmatprep.subr.mxu1 %v4958_v5  ;;  %756 = vmatpush1.msra.mxu0 %v3974_v9 }
  0x59   : > { %583 = vmatpush1.msra.mxu1 %v3949_v8  ;;  %757 = vmatprep.subr.mxu0 %v4958_v5 }
  0x5a   : > { %584 = vmatprep.subr.mxu1 %v4958_v5  ;;  %758 = vmatpush1.msra.mxu0 %v3973_v11 }
  0x5b   : > { %585 = vmatpush1.msra.mxu1 %v3948_v10  ;;  %759 = vmatprep.subr.mxu0 %v4958_v5 }
  0x5c   : > { %586 = vmatprep.subr.mxu1 %v4958_v5  ;;  %760 = vmatpush1.msra.mxu0 %v3972_v13  ;;  %v5519_v13 = vmov (%p87_p0), 0.0  }
  0x5d   : > { %587 = vmatpush1.msra.mxu1 %v3947_v12  ;;  %761 = vmatprep.subr.mxu0 %v4958_v5  ;;  %v5517_v12 = vmov (%p87_p0), 0.0  }
  0x5e   : > { %588 = vmatprep.subr.mxu1 %v4958_v5  ;;  %762 = vmatpush1.msra.mxu0 %v3971_v15 }
  0x5f   : > { %589 = vmatpush1.msra.mxu1 %v3946_v14  ;;  %763 = vmatprep.subr.mxu0 %v4958_v5 }
  0x60   : > { %590 = vmatprep.subr.mxu1 %v4958_v5  ;;  %764 = vmatpush1.msra.mxu0 %v3970_v17 }
  0x61   : > { %591 = vmatpush1.msra.mxu1 %v3945_v16  ;;  %765 = vmatprep.subr.mxu0 %v4958_v5 }
  0x62   : > { %592 = vmatprep.subr.mxu1 %v4958_v5  ;;  %766 = vmatpush1.msra.mxu0 %v3969_v19 }
  0x63   : > { %593 = vmatpush1.msra.mxu1 %v3944_v18  ;;  %767 = vmatprep.subr.mxu0 %v4958_v5 }
  0x64   : > { %594 = vmatprep.subr.mxu1 %v4958_v5  ;;  %768 = vmatpush1.msra.mxu0 %v3968_v21 }
  0x65   : > { %595 = vmatpush1.msra.mxu1 %v3943_v20  ;;  %769 = vmatprep.subr.mxu0 %v4958_v5 }
  0x66   : > { %596 = vmatprep.subr.mxu1 %v4958_v5  ;;  %770 = vmatpush1.msra.mxu0 %v3967_v23 }
  0x67   : > { %597 = vmatpush1.msra.mxu1 %v3942_v22  ;;  %771 = vmatprep.subr.mxu0 %v4958_v5 }
  0x68   : > { %598 = vmatprep.subr.mxu1 %v4958_v5  ;;  %772 = vmatpush1.msra.mxu0 %v3966_v25 }
  0x69   : > { %599 = vmatpush1.msra.mxu1 %v3941_v24  ;;  %803 = vmatprep.subr.mxu0 %v4958_v5 }
  0x6a   : > { %630 = vmatprep.subr.mxu1 %v4958_v5  ;;  %3958 = vmatprep.mubr.msk.f32.mxu1 %vm209_vm2, %v5295_v45 }
  0x6b   : > { %631 = vmatpush2.msra.mxu1 %v3957_v26  ;;  %804 = vmatpush2.msra.mxu0 %v3982_v27 }
  0x6c   : > { %3983 = vmatprep.mubr.msk.f32.mxu0 %vm209_vm2, %v5295_v45  ;;  %633 = vmatmul.mubr.f32.vlgmr.msra.gmra.mxu1 %v5283_v42 }
  0x6d   : > { %806 = vmatmul.mubr.f32.vlgmr.msra.gmra.mxu0 %v5283_v42 }
  0xdb   : > { %v368_v28 = vpop.f32.mrf.mxu0 }
  0xdc   : > { %v178_v29 = vpop.f32.mrf.mxu1  ;;  %v369_v40 = vadd.f32 %v3914_v35, %v368_v28 }
  0xdd   : > { %v4344_v30 = vpop.f32.mrf.mxu0  ;;  %v179_v42 = vadd.f32 %v3905_v37, %v178_v29 }
  0xde   : > { %v4333_v31 = vpop.f32.mrf.mxu1 }
  0xfe   : > { %v278_v32 = vpop.f32.mrf.mxu1 }
  0xff   : > { %v456_v33 = vpop.f32.mrf.mxu0  ;;  %v282_v44 = vadd.f32 %v278_v32, %v179_v42 }
 0x100   : > { %v280_v5 = vpop.f32.mrf.mxu1  ;;  %v460_v43 = vadd.f32 %v456_v33, %v369_v40 }
 0x101   : > { %v458_v34 = vpop.f32.mrf.mxu0  ;;  %v283_v46 = vsub.f32 0.0, %v282_v44 }
 0x102   : > { %v461_v45 = vsub.f32 0.0, %v460_v43 }
 0x103   : > { %v284_v48 = vmul.f32 1.442695, %v283_v46 }
 0x104   : > { %v462_v47 = vmul.f32 1.442695, %v461_v45 }
 0x106   : > { %4778 = vpow2.f32 %v462_v47 }
 0x107   : > { %4780 = vpow2.f32 %v284_v48 }
 0x109   : > { %v719_v36 = vpop.f32.mrf.mxu0 }
 0x10a   : > { %v546_v38 = vpop.f32.mrf.mxu1  ;;  %v720_v55 = vadd.f32 %v3964_v51, %v719_v36 }
 0x10b   : > { %v4366_v39 = vpop.f32.mrf.mxu0  ;;  %v547_v56 = vadd.f32 %v3939_v52, %v546_v38 }
 0x10c   : > { %v4355_v41 = vpop.f32.mrf.mxu1 }
 0x113   : > { %v4779_v49 = vpop.eup %4778 }
 0x114   : > { %v4781_v50 = vpop.eup %4780  ;;  %v464_v53 = vadd.f32 1.0, %v4779_v49 }
 0x115   : > { %v286_v54 = vadd.f32 1.0, %v4781_v50 }
 0x116   : > { %4782 = vrcp.f32 %v464_v53 }
 0x117   : > { %4784 = vrcp.f32 %v286_v54 }
 0x123   : > { %v4783_v2 = vpop.eup %4782 }
 0x124   : > { %v4785_v3 = vpop.eup %4784  ;;  %v818_v6 = vmul.f32 %v4904_v1, %v4783_v2 }
 0x12c   : > { %v634_v57 = vpop.f32.mrf.mxu1 }
 0x12d   : > { %v807_v58 = vpop.f32.mrf.mxu0  ;;  %v638_v59 = vadd.f32 %v634_v57, %v547_v56 }
 0x12e   : > { %v811_v60 = vadd.f32 %v807_v58, %v720_v55  ;;  %v636_v61 = vpop.f32.mrf.mxu1 }
 0x12f   : > { %v809_v62 = vpop.f32.mrf.mxu0  ;;  %4786 = vtanh.f32 %v638_v59 }
 0x130   : > { %v812_v63 = vsub.f32 0.0, %v811_v60 }
 0x132   : > { %v813_v0 = vmul.f32 1.442695, %v812_v63 }
 0x134   : > { %4788 = vpow2.f32 %v813_v0 }
 0x13c   : > { %v4787_v4 = vpop.eup %4786 }
 0x13d   : > { %v819_v7 = vmul.f32 %v4787_v4, %v4785_v3 }
 0x13f   : > { %v820_v1 = vadd.f32 %v819_v7, %v818_v6  }
 0x141   : > { %v4789_v8 = vpop.eup %4788  ;;  %4790 = vtanh.f32 %v820_v1 }
 0x142   : > { %v815_v9 = vadd.f32 1.0, %v4789_v8 }
 0x144   : > { %4792 = vrcp.f32 %v815_v9 }
 0x14e   : > { %v4791_v10 = vpop.eup %4790 }
 0x150   :  { %89 = sbr.rel (!%p87_p0) target bundleno = 12 (0xc), region = 204 }
 0x151   : > { %v4793_v11 = vpop.eup %4792 }
 0x152   : > { %v822_v2 = vmul.f32 %v4793_v11, %v4791_v10  }
 0x154   : > { %825 = vst.msk [vmem:[%s823_s28] sm:$0x3] %vm824_vm3, %v822_v2 }
 0x155 LB: > { %s6534_s29 = sld [smem:[#allocation10_spill]]  ;;  %v4960_v15 = vmov 0.0   ;;  %vm4961_vm4 = vmmov 0   ;;  %s834_s0 = ssub.s32 29, %s4924_s25  ;;  %s4924_s25 = sphi %s5521_s25, %s831_s25   ;;  %v4920_v13 = vphi %v5519_v13, %v1564_v13   ;;  %v4916_v12 = vphi %v5517_v12, %v1562_v12  }
 0x156   : > { %4367 = vmatprep.subr.mxu1 %v4960_v15  ;;  %4378 = vmatprep.subr.mxu0 %v4960_v15  ;;  %s6535_s9 = sld [smem:[#allocation9_spill]]  ;;  %s4173_s28 = sshll.u32 %s834_s0, 2 }
 0x157   : > { %4386 = vmatprep.mubr.msk.f32.mxu0 %vm4961_vm4, %v4960_v15  ;;  %4375 = vmatprep.mubr.msk.f32.mxu1 %vm4961_vm4, %v4960_v15  ;;  %s6536_s10 = sld [smem:[#allocation5_spill]]  ;;  %s3984_s3 = sshll.u32 %s834_s0, 1 }
 0x158   : > { %s6537_s8 = sld [smem:[#allocation11_spill]]  ;;  %s1565_s27 = scalar_lea.vmem [#allocation3], %s3984_s3 }
 0x159   : > { %s831_s25 = sadd.s32 1, %s4924_s25  }
 0x15a   : > { %p828_p1 = scmp.ge.s32.totalorder %s831_s25, 30  }
 0x15b   : > { %v842_v1 = vld [vmem:[%s6534_s29 + $0x18] sm:$0xff]  ;;  %v841_v16 = vld [vmem:[%s6534_s29 + $0x10] sm:$0xff]  ;;  %v840_v18 = vld [vmem:[%s6534_s29 + $0x8] sm:$0xff]  ;;  %s5937_s0 = smov (%p828_p1), 0  }
 0x15c   : > { %v3993_v14 = vld [vmem:[%s6534_s29 + $0x38] sm:$0xff]  ;;  %v3992_v17 = vld [vmem:[%s6534_s29 + $0x30] sm:$0xff]  ;;  %4368 = vmatpush3.msra.mxu1 %v842_v1  ;;  %v3991_v19 = vld [vmem:[%s6534_s29 + $0x28] sm:$0xff] }
 0x15d   : > { %4379 = vmatpush3.msra.mxu0 %v3993_v14  ;;  %4369 = vmatprep.subr.mxu1 %v4960_v15  ;;  %v839_v20 = vld [vmem:[%s6534_s29] sm:$0xff]  ;;  %v939_v22 = vld [vmem:[%s6535_s9 + $0x78] sm:$0xff]  ;;  %v938_v24 = vld [vmem:[%s6535_s9 + $0x70] sm:$0xff]  ;;  %s837_s6 = scalar_lea.vmem %s6536_s10, %s4173_s28 }
 0x15e   : > { %4380 = vmatprep.subr.mxu0 %v4960_v15  ;;  %4370 = vmatpush3.msra.mxu1 %v841_v16  ;;  %v3990_v21 = vld [vmem:[%s6534_s29 + $0x20] sm:$0xff]  ;;  %v4011_v25 = vld [vmem:[%s6535_s9 + $0xf8] sm:$0xff]  ;;  %v937_v26 = vld [vmem:[%s6535_s9 + $0x68] sm:$0xff] }
 0x15f   : > { %4381 = vmatpush3.msra.mxu0 %v3992_v17  ;;  %4371 = vmatprep.subr.mxu1 %v4960_v15  ;;  %v4012_v23 = vld [vmem:[%s6535_s9 + $0x100] sm:$0xff]  ;;  %v4010_v27 = vld [vmem:[%s6535_s9 + $0xf0] sm:$0xff]  ;;  %v4009_v29 = vld [vmem:[%s6535_s9 + $0xe8] sm:$0xff] }
 0x160   : > { %4382 = vmatprep.subr.mxu0 %v4960_v15  ;;  %4372 = vmatpush3.msra.mxu1 %v840_v18  ;;  %v936_v28 = vld [vmem:[%s6535_s9 + $0x60] sm:$0xff]  ;;  %v935_v30 = vld [vmem:[%s6535_s9 + $0x58] sm:$0xff]  ;;  %v934_v32 = vld [vmem:[%s6535_s9 + $0x50] sm:$0xff] }
 0x161   : > { %4383 = vmatpush3.msra.mxu0 %v3991_v19  ;;  %4373 = vmatprep.subr.mxu1 %v4960_v15  ;;  %v4008_v31 = vld [vmem:[%s6535_s9 + $0xe0] sm:$0xff]  ;;  %v4007_v33 = vld [vmem:[%s6535_s9 + $0xd8] sm:$0xff]  ;;  %v933_v34 = vld [vmem:[%s6535_s9 + $0x48] sm:$0xff] }
 0x162   : > { %4384 = vmatprep.subr.mxu0 %v4960_v15  ;;  %4374 = vmatpush3.msra.mxu1 %v839_v20  ;;  %v4006_v5 = vld [vmem:[%s6535_s9 + $0xd0] sm:$0xff]  ;;  %v932_v35 = vld [vmem:[%s6535_s9 + $0x40] sm:$0xff]  ;;  %v4005_v36 = vld [vmem:[%s6535_s9 + $0xc8] sm:$0xff] }
 0x163   : > { %4385 = vmatpush3.msra.mxu0 %v3990_v21  ;;  %954 = vmatprep.subr.mxu1 %v4960_v15  ;;  %v931_v37 = vld [vmem:[%s6535_s9 + $0x38] sm:$0xff]  ;;  %v4004_v38 = vld [vmem:[%s6535_s9 + $0xc0] sm:$0xff]  ;;  %v930_v39 = vld [vmem:[%s6535_s9 + $0x30] sm:$0xff] }
 0x164   : > { %4387 = vmatmul.mubr.msk.f32.vlgmr.msra.gmra.mxu0 %vm108_vm0, %v4920_v13  ;;  %1132 = vmatprep.subr.mxu0 %v4960_v15  ;;  %v4003_v40 = vld [vmem:[%s6535_s9 + $0xb8] sm:$0xff]  ;;  %v929_v41 = vld [vmem:[%s6535_s9 + $0x28] sm:$0xff]  ;;  %v4002_v42 = vld [vmem:[%s6535_s9 + $0xb0] sm:$0xff] }
 0x165   : > { %4376 = vmatmul.mubr.msk.f32.vlgmr.msra.gmra.mxu1 %vm108_vm0, %v4920_v13  ;;  %1133 = vmatpush1.msra.mxu0 %v4012_v23  ;;  %v928_v43 = vld [vmem:[%s6535_s9 + $0x20] sm:$0xff]  ;;  %v4001_v44 = vld [vmem:[%s6535_s9 + $0xa8] sm:$0xff]  ;;  %v927_v45 = vld [vmem:[%s6535_s9 + $0x18] sm:$0xff] }
 0x166   : > { %955 = vmatpush1.msra.mxu1 %v939_v22  ;;  %1134 = vmatprep.subr.mxu0 %v4960_v15  ;;  %v4000_v46 = vld [vmem:[%s6535_s9 + $0xa0] sm:$0xff]  ;;  %v926_v47 = vld [vmem:[%s6535_s9 + $0x10] sm:$0xff]  ;;  %v3999_v48 = vld [vmem:[%s6535_s9 + $0x98] sm:$0xff] }
 0x167   : > { %956 = vmatprep.subr.mxu1 %v4960_v15  ;;  %1135 = vmatpush1.msra.mxu0 %v4011_v25  ;;  %v925_v49 = vld [vmem:[%s6535_s9 + $0x8] sm:$0xff]  ;;  %v3998_v50 = vld [vmem:[%s6535_s9 + $0x90] sm:$0xff]  ;;  %v5696_v51 = vld.sshfl [vmem:[%s837_s6] sm:$0x33 pattern:$0x76325410] }
 0x168   : > { %957 = vmatpush1.msra.mxu1 %v938_v24  ;;  %1136 = vmatprep.subr.mxu0 %v4960_v15  ;;  %v924_v52 = vld [vmem:[%s6535_s9] sm:$0xff]  ;;  %v3997_v53 = vld [vmem:[%s6535_s9 + $0x88] sm:$0xff]  ;;  %v5708_v54 = vcombine.high %v5696_v51, %v5696_v51  ;;  %v4018_v57 = vld [vmem:[%s6534_s29 + $0x58] sm:$0xff] }
 0x169   : > { %958 = vmatprep.subr.mxu1 %v4960_v15  ;;  %1137 = vmatpush1.msra.mxu0 %v4010_v27  ;;  %v940_v55 = vld [vmem:[%s6535_s9 + $0x80] sm:$0xff]  ;;  %v4013_v56 = vld [vmem:[%s6535_s9 + $0x108] sm:$0xff]  ;;  %v4043_v58 = vld [vmem:[%s6534_s29 + $0x78] sm:$0xff] }
 0x16a   : > { %959 = vmatpush1.msra.mxu1 %v937_v26  ;;  %1138 = vmatprep.subr.mxu0 %v4960_v15  ;;  %v4017_v59 = vld [vmem:[%s6534_s29 + $0x50] sm:$0xff]  ;;  %v4016_v61 = vld [vmem:[%s6534_s29 + $0x48] sm:$0xff]  ;;  %v4015_v63 = vld [vmem:[%s6534_s29 + $0x40] sm:$0xff] }
 0x16b   : > { %960 = vmatprep.subr.mxu1 %v4960_v15  ;;  %1139 = vmatpush1.msra.mxu0 %v4009_v29  ;;  %v4042_v60 = vld [vmem:[%s6534_s29 + $0x70] sm:$0xff]  ;;  %v4041_v62 = vld [vmem:[%s6534_s29 + $0x68] sm:$0xff]  ;;  %v4040_v0 = vld [vmem:[%s6534_s29 + $0x60] sm:$0xff] }
 0x16c   : > { %961 = vmatpush1.msra.mxu1 %v936_v28  ;;  %1140 = vmatprep.subr.mxu0 %v4960_v15  ;;  %v4037_v2 = vld [vmem:[%s6535_s9 + $0x188] sm:$0xff]  ;;  %v4062_v3 = vld [vmem:[%s6535_s9 + $0x210] sm:$0xff]  ;;  %v4036_v4 = vld [vmem:[%s6535_s9 + $0x180] sm:$0xff] }
 0x16d   : > { %962 = vmatprep.subr.mxu1 %v4960_v15  ;;  %1141 = vmatpush1.msra.mxu0 %v4008_v31  ;;  %v4061_v6 = vld [vmem:[%s6535_s9 + $0x208] sm:$0xff]  ;;  %v4035_v7 = vld [vmem:[%s6535_s9 + $0x178] sm:$0xff]  ;;  %v4060_v8 = vld [vmem:[%s6535_s9 + $0x200] sm:$0xff] }
 0x16e   : > { %963 = vmatpush1.msra.mxu1 %v935_v30  ;;  %1142 = vmatprep.subr.mxu0 %v4960_v15  ;;  %v4034_v9 = vld [vmem:[%s6535_s9 + $0x170] sm:$0xff]  ;;  %v4059_v10 = vld [vmem:[%s6535_s9 + $0x1f8] sm:$0xff]  ;;  %v4033_v11 = vld [vmem:[%s6535_s9 + $0x168] sm:$0xff] }
 0x16f   : > { %964 = vmatprep.subr.mxu1 %v4960_v15  ;;  %1143 = vmatpush1.msra.mxu0 %v4007_v33  ;;  %v4032_v1 = vld [vmem:[%s6535_s9 + $0x160] sm:$0xff]  ;;  %v4057_v14 = vld [vmem:[%s6535_s9 + $0x1e8] sm:$0xff]  ;;  %v4031_v16 = vld [vmem:[%s6535_s9 + $0x158] sm:$0xff] }
 0x170   : > { %965 = vmatpush1.msra.mxu1 %v934_v32  ;;  %1144 = vmatprep.subr.mxu0 %v4960_v15  ;;  %v4056_v17 = vld [vmem:[%s6535_s9 + $0x1e0] sm:$0xff]  ;;  %v4030_v18 = vld [vmem:[%s6535_s9 + $0x150] sm:$0xff]  ;;  %v4055_v19 = vld [vmem:[%s6535_s9 + $0x1d8] sm:$0xff] }
 0x171   : > { %966 = vmatprep.subr.mxu1 %v4960_v15  ;;  %1145 = vmatpush1.msra.mxu0 %v4006_v5  ;;  %v4029_v20 = vld [vmem:[%s6535_s9 + $0x148] sm:$0xff]  ;;  %v4054_v21 = vld [vmem:[%s6535_s9 + $0x1d0] sm:$0xff]  ;;  %v4028_v22 = vld [vmem:[%s6535_s9 + $0x140] sm:$0xff] }
 0x172   : > { %967 = vmatpush1.msra.mxu1 %v933_v34  ;;  %1146 = vmatprep.subr.mxu0 %v4960_v15  ;;  %v4053_v23 = vld [vmem:[%s6535_s9 + $0x1c8] sm:$0xff]  ;;  %v4027_v24 = vld [vmem:[%s6535_s9 + $0x138] sm:$0xff]  ;;  %v4052_v25 = vld [vmem:[%s6535_s9 + $0x1c0] sm:$0xff] }
 0x173   : > { %968 = vmatprep.subr.mxu1 %v4960_v15  ;;  %1147 = vmatpush1.msra.mxu0 %v4005_v36  ;;  %v4026_v26 = vld [vmem:[%s6535_s9 + $0x130] sm:$0xff]  ;;  %v4051_v27 = vld [vmem:[%s6535_s9 + $0x1b8] sm:$0xff]  ;;  %v4025_v28 = vld [vmem:[%s6535_s9 + $0x128] sm:$0xff] }
 0x174   : > { %969 = vmatpush1.msra.mxu1 %v932_v35  ;;  %1148 = vmatprep.subr.mxu0 %v4960_v15  ;;  %v4050_v29 = vld [vmem:[%s6535_s9 + $0x1b0] sm:$0xff]  ;;  %v4024_v30 = vld [vmem:[%s6535_s9 + $0x120] sm:$0xff]  ;;  %v4049_v31 = vld [vmem:[%s6535_s9 + $0x1a8] sm:$0xff] }
 0x175   : > { %970 = vmatprep.subr.mxu1 %v4960_v15  ;;  %1149 = vmatpush1.msra.mxu0 %v4004_v38  ;;  %v4023_v32 = vld [vmem:[%s6535_s9 + $0x118] sm:$0xff]  ;;  %v4048_v33 = vld [vmem:[%s6535_s9 + $0x1a0] sm:$0xff]  ;;  %v4022_v34 = vld [vmem:[%s6535_s9 + $0x110] sm:$0xff] }
 0x176   : > { %971 = vmatpush1.msra.mxu1 %v931_v37  ;;  %1150 = vmatprep.subr.mxu0 %v4960_v15  ;;  %v4047_v5 = vld [vmem:[%s6535_s9 + $0x198] sm:$0xff]  ;;  %v4038_v35 = vld [vmem:[%s6535_s9 + $0x190] sm:$0xff] }
 0x177   : > { %972 = vmatprep.subr.mxu1 %v4960_v15  ;;  %1151 = vmatpush1.msra.mxu0 %v4003_v40  ;;  %v4063_v36 = vld [vmem:[%s6535_s9 + $0x218] sm:$0xff] }
 0x178   : > { %973 = vmatpush1.msra.mxu1 %v930_v39  ;;  %1152 = vmatprep.subr.mxu0 %v4960_v15 }
 0x179   : > { %974 = vmatprep.subr.mxu1 %v4960_v15  ;;  %1153 = vmatpush1.msra.mxu0 %v4002_v42 }
 0x17a   : > { %975 = vmatpush1.msra.mxu1 %v929_v41  ;;  %1154 = vmatprep.subr.mxu0 %v4960_v15 }
 0x17b   : > { %976 = vmatprep.subr.mxu1 %v4960_v15  ;;  %1155 = vmatpush1.msra.mxu0 %v4001_v44  ;;  %v3995_v44 = vld [vmem:[%s6537_s8 + $0x1] ss:$0 sm:$0xff] }
 0x17c   : > { %977 = vmatpush1.msra.mxu1 %v928_v43  ;;  %1156 = vmatprep.subr.mxu0 %v4960_v15 }
 0x17d   : > { %978 = vmatprep.subr.mxu1 %v4960_v15  ;;  %1157 = vmatpush1.msra.mxu0 %v4000_v46  ;;  %v3986_v46 = vld [vmem:[%s6537_s8] ss:$0 sm:$0xff] }
 0x17e   : > { %979 = vmatpush1.msra.mxu1 %v927_v45  ;;  %1158 = vmatprep.subr.mxu0 %v4960_v15 }
 0x17f   : > { %980 = vmatprep.subr.mxu1 %v4960_v15  ;;  %1159 = vmatpush1.msra.mxu0 %v3999_v48 }
 0x180   : > { %981 = vmatpush1.msra.mxu1 %v926_v47  ;;  %1160 = vmatprep.subr.mxu0 %v4960_v15 }
 0x181   : > { %982 = vmatprep.subr.mxu1 %v4960_v15  ;;  %1161 = vmatpush1.msra.mxu0 %v3998_v50 }
 0x182   : > { %983 = vmatpush1.msra.mxu1 %v925_v49  ;;  %1162 = vmatprep.subr.mxu0 %v4960_v15 }
 0x183   : > { %984 = vmatprep.subr.mxu1 %v4960_v15  ;;  %1163 = vmatpush1.msra.mxu0 %v3997_v53 }
 0x184   : > { %985 = vmatpush1.msra.mxu1 %v924_v52  ;;  %1194 = vmatprep.subr.mxu0 %v4960_v15 }
 0x185   : > { %1016 = vmatprep.subr.mxu1 %v4960_v15  ;;  %3989 = vmatprep.mubr.msk.f32.mxu1 %vm209_vm2, %v5708_v54 }
 0x186   : > { %1017 = vmatpush2.msra.mxu1 %v940_v55  ;;  %1195 = vmatpush2.msra.mxu0 %v4013_v56 }
 0x187   : > { %4014 = vmatprep.mubr.msk.f32.mxu0 %vm209_vm2, %v5708_v54  ;;  %1019 = vmatmul.mubr.f32.vlgmr.msra.gmra.mxu1 %v5696_v51 }
 0x188   : > { %1197 = vmatmul.mubr.f32.vlgmr.msra.gmra.mxu0 %v5696_v51  ;;  %4389 = vmatprep.subr.mxu1 %v4960_v15 }
 0x189   : > { %4400 = vmatprep.subr.mxu0 %v4960_v15  ;;  %4390 = vmatpush3.msra.mxu1 %v4018_v57 }
 0x18a   : > { %4401 = vmatpush3.msra.mxu0 %v4043_v58  ;;  %4391 = vmatprep.subr.mxu1 %v4960_v15 }
 0x18b   : > { %4402 = vmatprep.subr.mxu0 %v4960_v15  ;;  %4392 = vmatpush3.msra.mxu1 %v4017_v59 }
 0x18c   : > { %4403 = vmatpush3.msra.mxu0 %v4042_v60  ;;  %4393 = vmatprep.subr.mxu1 %v4960_v15  ;;  %v4045_v60 = vld [vmem:[%s6537_s8 + $0x3] ss:$0 sm:$0xff] }
 0x18d   : > { %4404 = vmatprep.subr.mxu0 %v4960_v15  ;;  %4394 = vmatpush3.msra.mxu1 %v4016_v61  ;;  %v4020_v61 = vld [vmem:[%s6537_s8 + $0x2] ss:$0 sm:$0xff] }
 0x18e   : > { %4405 = vmatpush3.msra.mxu0 %v4041_v62  ;;  %4395 = vmatprep.subr.mxu1 %v4960_v15 }
 0x18f   : > { %4406 = vmatprep.subr.mxu0 %v4960_v15  ;;  %4396 = vmatpush3.msra.mxu1 %v4015_v63 }
 0x190   : > { %4407 = vmatpush3.msra.mxu0 %v4040_v0  ;;  %4408 = vmatprep.mubr.msk.f32.mxu0 %vm4961_vm4, %v4960_v15 }
 0x191   : > { %4397 = vmatprep.mubr.msk.f32.mxu1 %vm4961_vm4, %v4960_v15  ;;  %1310 = vmatprep.subr.mxu1 %v4960_v15 }
 0x192   : > { %4409 = vmatmul.mubr.msk.f32.vlgmr.msra.gmra.mxu0 %vm108_vm0, %v4920_v13  ;;  %1483 = vmatprep.subr.mxu0 %v4960_v15 }
 0x193   : > { %4398 = vmatmul.mubr.msk.f32.vlgmr.msra.gmra.mxu1 %vm108_vm0, %v4920_v13  ;;  %1484 = vmatpush1.msra.mxu0 %v4062_v3  ;;  %v4058_v13 = vld [vmem:[%s6535_s9 + $0x1f0] sm:$0xff] }
 0x194   : > { %1311 = vmatpush1.msra.mxu1 %v4037_v2  ;;  %1485 = vmatprep.subr.mxu0 %v4960_v15 }
 0x195   : > { %1312 = vmatprep.subr.mxu1 %v4960_v15  ;;  %1486 = vmatpush1.msra.mxu0 %v4061_v6 }
 0x196   : > { %1313 = vmatpush1.msra.mxu1 %v4036_v4  ;;  %1487 = vmatprep.subr.mxu0 %v4960_v15 }
 0x197   : > { %1314 = vmatprep.subr.mxu1 %v4960_v15  ;;  %1488 = vmatpush1.msra.mxu0 %v4060_v8 }
 0x198   : > { %1315 = vmatpush1.msra.mxu1 %v4035_v7  ;;  %1489 = vmatprep.subr.mxu0 %v4960_v15 }
 0x199   : > { %1316 = vmatprep.subr.mxu1 %v4960_v15  ;;  %1490 = vmatpush1.msra.mxu0 %v4059_v10 }
 0x19a   : > { %1317 = vmatpush1.msra.mxu1 %v4034_v9  ;;  %1491 = vmatprep.subr.mxu0 %v4960_v15 }
 0x19b   : > { %1318 = vmatprep.subr.mxu1 %v4960_v15  ;;  %1492 = vmatpush1.msra.mxu0 %v4058_v13 }
 0x19c   : > { %1319 = vmatpush1.msra.mxu1 %v4033_v11  ;;  %1493 = vmatprep.subr.mxu0 %v4960_v15 }
 0x19d   : > { %1320 = vmatprep.subr.mxu1 %v4960_v15  ;;  %1494 = vmatpush1.msra.mxu0 %v4057_v14 }
 0x19e   : > { %1321 = vmatpush1.msra.mxu1 %v4032_v1  ;;  %1495 = vmatprep.subr.mxu0 %v4960_v15 }
 0x19f   : > { %1322 = vmatprep.subr.mxu1 %v4960_v15  ;;  %1496 = vmatpush1.msra.mxu0 %v4056_v17 }
 0x1a0   : > { %1323 = vmatpush1.msra.mxu1 %v4031_v16  ;;  %1497 = vmatprep.subr.mxu0 %v4960_v15 }
 0x1a1   : > { %1324 = vmatprep.subr.mxu1 %v4960_v15  ;;  %1498 = vmatpush1.msra.mxu0 %v4055_v19 }
 0x1a2   : > { %1325 = vmatpush1.msra.mxu1 %v4030_v18  ;;  %1499 = vmatprep.subr.mxu0 %v4960_v15 }
 0x1a3   : > { %1326 = vmatprep.subr.mxu1 %v4960_v15  ;;  %1500 = vmatpush1.msra.mxu0 %v4054_v21 }
 0x1a4   : > { %1327 = vmatpush1.msra.mxu1 %v4029_v20  ;;  %1501 = vmatprep.subr.mxu0 %v4960_v15 }
 0x1a5   : > { %1328 = vmatprep.subr.mxu1 %v4960_v15  ;;  %1502 = vmatpush1.msra.mxu0 %v4053_v23  ;;  %v5933_v23 = vmov (%p828_p1), 0.0  }
 0x1a6   : > { %1329 = vmatpush1.msra.mxu1 %v4028_v22  ;;  %1503 = vmatprep.subr.mxu0 %v4960_v15  ;;  %v5931_v22 = vmov (%p828_p1), 0.0  }
 0x1a7   : > { %1330 = vmatprep.subr.mxu1 %v4960_v15  ;;  %1504 = vmatpush1.msra.mxu0 %v4052_v25 }
 0x1a8   : > { %1331 = vmatpush1.msra.mxu1 %v4027_v24  ;;  %1505 = vmatprep.subr.mxu0 %v4960_v15  ;;  %v5935_v24 = vmov (%p828_p1), 0.0  }
 0x1a9   : > { %1332 = vmatprep.subr.mxu1 %v4960_v15  ;;  %1506 = vmatpush1.msra.mxu0 %v4051_v27 }
 0x1aa   : > { %1333 = vmatpush1.msra.mxu1 %v4026_v26  ;;  %1507 = vmatprep.subr.mxu0 %v4960_v15 }
 0x1ab   : > { %1334 = vmatprep.subr.mxu1 %v4960_v15  ;;  %1508 = vmatpush1.msra.mxu0 %v4050_v29 }
 0x1ac   : > { %1335 = vmatpush1.msra.mxu1 %v4025_v28  ;;  %1509 = vmatprep.subr.mxu0 %v4960_v15 }
 0x1ad   : > { %1336 = vmatprep.subr.mxu1 %v4960_v15  ;;  %1510 = vmatpush1.msra.mxu0 %v4049_v31 }
 0x1ae   : > { %1337 = vmatpush1.msra.mxu1 %v4024_v30  ;;  %1511 = vmatprep.subr.mxu0 %v4960_v15 }
 0x1af   : > { %1338 = vmatprep.subr.mxu1 %v4960_v15  ;;  %1512 = vmatpush1.msra.mxu0 %v4048_v33 }
 0x1b0   : > { %1339 = vmatpush1.msra.mxu1 %v4023_v32  ;;  %1513 = vmatprep.subr.mxu0 %v4960_v15 }
 0x1b1   : > { %1340 = vmatprep.subr.mxu1 %v4960_v15  ;;  %1514 = vmatpush1.msra.mxu0 %v4047_v5 }
 0x1b2   : > { %1341 = vmatpush1.msra.mxu1 %v4022_v34  ;;  %1545 = vmatprep.subr.mxu0 %v4960_v15 }
 0x1b3   : > { %1372 = vmatprep.subr.mxu1 %v4960_v15  ;;  %4039 = vmatprep.mubr.msk.f32.mxu1 %vm209_vm2, %v5708_v54 }
 0x1b4   : > { %1373 = vmatpush2.msra.mxu1 %v4038_v35  ;;  %1546 = vmatpush2.msra.mxu0 %v4063_v36 }
 0x1b5   : > { %4064 = vmatprep.mubr.msk.f32.mxu0 %vm209_vm2, %v5708_v54  ;;  %1375 = vmatmul.mubr.f32.vlgmr.msra.gmra.mxu1 %v5696_v51 }
 0x1b6   : > { %1548 = vmatmul.mubr.f32.vlgmr.msra.gmra.mxu0 %v5696_v51 }
 0x224   : > { %v1110_v37 = vpop.f32.mrf.mxu0 }
 0x225   : > { %v920_v38 = vpop.f32.mrf.mxu1  ;;  %v1111_v49 = vadd.f32 %v3995_v44, %v1110_v37 }
 0x226   : > { %v4388_v39 = vpop.f32.mrf.mxu0  ;;  %v921_v51 = vadd.f32 %v3986_v46, %v920_v38 }
 0x227   : > { %v4377_v40 = vpop.f32.mrf.mxu1 }
 0x247   : > { %v1020_v41 = vpop.f32.mrf.mxu1 }
 0x248   : > { %v1198_v42 = vpop.f32.mrf.mxu0  ;;  %v1024_v53 = vadd.f32 %v1020_v41, %v921_v51 }
 0x249   : > { %v1022_v15 = vpop.f32.mrf.mxu1  ;;  %v1202_v52 = vadd.f32 %v1198_v42, %v1111_v49 }
 0x24a   : > { %v1200_v43 = vpop.f32.mrf.mxu0  ;;  %v1025_v55 = vsub.f32 0.0, %v1024_v53 }
 0x24b   : > { %v1203_v54 = vsub.f32 0.0, %v1202_v52 }
 0x24c   : > { %v1026_v57 = vmul.f32 1.442695, %v1025_v55 }
 0x24d   : > { %v1204_v56 = vmul.f32 1.442695, %v1203_v54 }
 0x24f   : > { %4794 = vpow2.f32 %v1204_v56 }
 0x250   : > { %4796 = vpow2.f32 %v1026_v57 }
 0x252   : > { %v1461_v45 = vpop.f32.mrf.mxu0 }
 0x253   : > { %v1288_v47 = vpop.f32.mrf.mxu1  ;;  %v1462_v0 = vadd.f32 %v4045_v60, %v1461_v45 }
 0x254   : > { %v4410_v48 = vpop.f32.mrf.mxu0  ;;  %v1289_v2 = vadd.f32 %v4020_v61, %v1288_v47 }
 0x255   : > { %v4399_v50 = vpop.f32.mrf.mxu1 }
 0x25c   : > { %v4795_v58 = vpop.eup %4794 }
 0x25d   : > { %v4797_v59 = vpop.eup %4796  ;;  %v1206_v62 = vadd.f32 1.0, %v4795_v58 }
 0x25e   : > { %v1028_v63 = vadd.f32 1.0, %v4797_v59 }
 0x25f   : > { %4798 = vrcp.f32 %v1206_v62 }
 0x260   : > { %4800 = vrcp.f32 %v1028_v63 }
 0x26c   : > { %v4799_v13 = vpop.eup %4798 }
 0x26d   : > { %v4801_v1 = vpop.eup %4800  ;;  %v1560_v16 = vmul.f32 %v4916_v12, %v4799_v13 }
 0x275   : > { %v1376_v3 = vpop.f32.mrf.mxu1 }
 0x276   : > { %v1549_v4 = vpop.f32.mrf.mxu0  ;;  %v1380_v6 = vadd.f32 %v1376_v3, %v1289_v2 }
 0x277   : > { %v1553_v7 = vadd.f32 %v1549_v4, %v1462_v0  ;;  %v1378_v8 = vpop.f32.mrf.mxu1 }
 0x278   : > { %v1551_v9 = vpop.f32.mrf.mxu0  ;;  %4802 = vtanh.f32 %v1380_v6 }
 0x279   : > { %v1554_v10 = vsub.f32 0.0, %v1553_v7 }
 0x27b   : > { %v1555_v11 = vmul.f32 1.442695, %v1554_v10 }
 0x27d   : > { %4804 = vpow2.f32 %v1555_v11 }
 0x285   : > { %v4803_v14 = vpop.eup %4802 }
 0x286   : > { %v1561_v17 = vmul.f32 %v4803_v14, %v4801_v1 }
 0x288   : > { %v1562_v12 = vadd.f32 %v1561_v17, %v1560_v16  }
 0x28a   : > { %v4805_v18 = vpop.eup %4804  ;;  %4806 = vtanh.f32 %v1562_v12 }
 0x28b   : > { %v1557_v19 = vadd.f32 1.0, %v4805_v18 }
 0x28d   : > { %4808 = vrcp.f32 %v1557_v19 }
 0x297   : > { %v4807_v20 = vpop.eup %4806 }
 0x299   :  { %830 = sbr.rel (!%p828_p1) target bundleno = 341 (0x155), region = 215 }
 0x29a   : > { %v4809_v21 = vpop.eup %4808 }
 0x29b   : > { %v1564_v13 = vmul.f32 %v4809_v21, %v4807_v20  }
 0x29d   : > { %1567 = vst.msk [vmem:[%s1565_s27] sm:$0x3] %vm824_vm3, %v1564_v13 }
 0x29e LB: > { %s6538_s9 = sld [smem:[#allocation14_spill]]  ;;  %v4962_v26 = vmov 0.0   ;;  %vm4963_vm5 = vmmov 0   ;;  %s4065_s1 = sshll.u32 %s4940_s0, 1  ;;  %s4940_s0 = sphi %s5937_s0, %s1573_s0   ;;  %v4936_v24 = vphi %v5935_v24, %v2540_v24   ;;  %v4932_v23 = vphi %v5933_v23, %v2538_v23   ;;  %v4928_v22 = vphi %v5931_v22, %v6543_v22  }
 0x29f   : > { %s6539_s28 = sld [smem:[#allocation12_spill]]  ;;  %4411 = vmatprep.subr.mxu0 %v4962_v26  ;;  %4416 = vmatprep.subr.mxu1 %v4962_v26  ;;  %s1578_s30 = scalar_lea.vmem [#allocation2], %s4065_s1 }
 0x2a0   : > { %4413 = vmatprep.mubr.msk.f32.mxu0 %vm4963_vm5, %v4962_v26  ;;  %s6540_s10 = sld [smem:[#allocation13_spill]]  ;;  %v5986_v33 = vld [vmem:[%s1578_s30] sm:$0x3]  ;;  %4424 = vmatprep.mubr.msk.f32.mxu1 %vm4963_vm5, %v4962_v26  ;;  %s1580_s6 = scalar_lea.vmem [#allocation3], %s4065_s1 }
 0x2a1   : > { %s4112_s7 = sshll.u32 %s4940_s0, 3  ;;  %s6541_s3 = sld [smem:[#allocation15_spill]] }
 0x2a2   : > { %s2542_s2 = scalar_lea.vmem %s6497_s15, %s4112_s7  ;;  %s1573_s0 = sadd.s32 1, %s4940_s0  }
 0x2a3   : > { %v2543_v61 = vld [vmem:[%s2542_s2] sm:$0xff]  ;;  %p1570_p2 = scmp.ge.s32.totalorder %s1573_s0, 30  }
 0x2a4   : > { %v1582_v12 = vld [vmem:[%s6538_s9] sm:$0xff]  ;;  %v4070_v35 = vld [vmem:[%s6538_s9 + $0x8] sm:$0xff]  ;;  %v4084_v15 = vld [vmem:[%s6538_s9 + $0x10] sm:$0xff]  ;;  %s6188_s8 = smov (%p1570_p2), 0  }
 0x2a5   : > { %v1667_v25 = vld [vmem:[%s6539_s28 + $0x18] sm:$0xff]  ;;  %4412 = vmatpush3.msra.mxu0 %v1582_v12  ;;  %v1666_v27 = vld [vmem:[%s6539_s28 + $0x10] sm:$0xff]  ;;  %v1665_v29 = vld [vmem:[%s6539_s28 + $0x8] sm:$0xff] }
 0x2a6   : > { %v1746_v28 = vld [vmem:[%s6540_s10 + $0x18] sm:$0xff]  ;;  %4417 = vmatpush3.msra.mxu1 %v1667_v25  ;;  %4414 = vmatmul.mubr.msk.f32.vlgmr.msra.gmra.mxu0 %vm209_vm2, %v4936_v24  ;;  %v1745_v30 = vld [vmem:[%s6540_s10 + $0x10] sm:$0xff]  ;;  %v1664_v31 = vld [vmem:[%s6539_s28] sm:$0xff] }
 0x2a7   : > { %4418 = vmatprep.subr.mxu1 %v4962_v26  ;;  %4427 = vmatprep.subr.mxu0 %v4962_v26  ;;  %v1744_v32 = vld [vmem:[%s6540_s10 + $0x8] sm:$0xff]  ;;  %v1743_v34 = vld [vmem:[%s6540_s10] sm:$0xff]  ;;  %v4077_v36 = vld [vmem:[%s6539_s28 + $0x38] sm:$0xff] }
 0x2a8   : > { %4419 = vmatpush3.msra.mxu1 %v1666_v27  ;;  %4428 = vmatpush3.msra.mxu0 %v1746_v28  ;;  %v5997_v5 = vld [vmem:[%s1580_s6] sm:$0x3]  ;;  %v4082_v37 = vld [vmem:[%s6540_s10 + $0x38] sm:$0xff]  ;;  %v4076_v38 = vld [vmem:[%s6539_s28 + $0x30] sm:$0xff] }
 0x2a9   : > { %4420 = vmatprep.subr.mxu1 %v4962_v26  ;;  %4429 = vmatprep.subr.mxu0 %v4962_v26  ;;  %v4081_v39 = vld [vmem:[%s6540_s10 + $0x30] sm:$0xff]  ;;  %v4075_v40 = vld [vmem:[%s6539_s28 + $0x28] sm:$0xff]  ;;  %v4074_v42 = vld [vmem:[%s6539_s28 + $0x20] sm:$0xff] }
 0x2aa   : > { %4421 = vmatpush3.msra.mxu1 %v1665_v29  ;;  %4430 = vmatpush3.msra.mxu0 %v1745_v30  ;;  %v4080_v41 = vld [vmem:[%s6540_s10 + $0x28] sm:$0xff]  ;;  %v4079_v43 = vld [vmem:[%s6540_s10 + $0x20] sm:$0xff]  ;;  %v4091_v44 = vld [vmem:[%s6539_s28 + $0x58] sm:$0xff] }
 0x2ab   : > { %4422 = vmatprep.subr.mxu1 %v4962_v26  ;;  %4431 = vmatprep.subr.mxu0 %v4962_v26  ;;  %v4090_v45 = vld [vmem:[%s6539_s28 + $0x50] sm:$0xff]  ;;  %v4096_v46 = vld [vmem:[%s6540_s10 + $0x58] sm:$0xff]  ;;  %v4089_v47 = vld [vmem:[%s6539_s28 + $0x48] sm:$0xff] }
 0x2ac   : > { %4423 = vmatpush3.msra.mxu1 %v1664_v31  ;;  %4432 = vmatpush3.msra.mxu0 %v1744_v32  ;;  %v4095_v48 = vld [vmem:[%s6540_s10 + $0x50] sm:$0xff]  ;;  %v4088_v49 = vld [vmem:[%s6539_s28 + $0x40] sm:$0xff]  ;;  %v4094_v50 = vld [vmem:[%s6540_s10 + $0x48] sm:$0xff] }
 0x2ad   : > { %4425 = vmatmul.mubr.msk.f32.vlgmr.msra.gmra.mxu1 %vm108_vm0, %v5986_v33  ;;  %4433 = vmatprep.subr.mxu0 %v4962_v26  ;;  %v4093_v51 = vld [vmem:[%s6540_s10 + $0x40] sm:$0xff]  ;;  %v4098_v52 = vld [vmem:[%s6538_s9 + $0x18] sm:$0xff]  ;;  %v4104_v55 = vld [vmem:[%s6539_s28 + $0x70] sm:$0xff] }
 0x2ae   : > { %4435 = vmatprep.mubr.msk.f32.mxu0 %vm4963_vm5, %v4962_v26  ;;  %4434 = vmatpush3.msra.mxu0 %v1743_v34  ;;  %v4105_v53 = vld [vmem:[%s6539_s28 + $0x78] sm:$0xff]  ;;  %v4109_v56 = vld [vmem:[%s6540_s10 + $0x70] sm:$0xff]  ;;  %v4103_v57 = vld [vmem:[%s6539_s28 + $0x68] sm:$0xff] }
 0x2af   : > { %4438 = vmatprep.subr.mxu1 %v4962_v26  ;;  %4436 = vmatmul.mubr.msk.f32.vlgmr.msra.gmra.mxu0 %vm108_vm0, %v5997_v5  ;;  %v4110_v54 = vld [vmem:[%s6540_s10 + $0x78] sm:$0xff]  ;;  %v4108_v58 = vld [vmem:[%s6540_s10 + $0x68] sm:$0xff]  ;;  %v4102_v59 = vld [vmem:[%s6539_s28 + $0x60] sm:$0xff] }
 0x2b0   : > { %4439 = vmatpush3.msra.mxu1 %v4070_v35  ;;  %4443 = vmatprep.subr.mxu0 %v4962_v26  ;;  %v4107_v60 = vld [vmem:[%s6540_s10 + $0x60] sm:$0xff] }
 0x2b1   : > { %4440 = vmatprep.mubr.msk.f32.mxu1 %vm4963_vm5, %v4962_v26  ;;  %4444 = vmatpush3.msra.mxu0 %v4077_v36  ;;  %v4066_v0 = vld [vmem:[%s6541_s3] ss:$0 sm:$0xff]  ;;  %v4072_v1 = vld [vmem:[%s6541_s3 + $0x1] ss:$0 sm:$0xff]  ;;  %v4086_v28 = vld [vmem:[%s6541_s3 + $0x2] ss:$0 sm:$0xff] }
 0x2b2   : > { %4454 = vmatprep.subr.mxu1 %v4962_v26  ;;  %4441 = vmatmul.mubr.msk.f32.vlgmr.msra.gmra.mxu1 %vm209_vm2, %v4936_v24 }
 0x2b3   : > { %4445 = vmatprep.subr.mxu0 %v4962_v26  ;;  %4455 = vmatpush3.msra.mxu1 %v4082_v37 }
 0x2b4   : > { %4446 = vmatpush3.msra.mxu0 %v4076_v38  ;;  %4456 = vmatprep.subr.mxu1 %v4962_v26 }
 0x2b5   : > { %4447 = vmatprep.subr.mxu0 %v4962_v26  ;;  %4457 = vmatpush3.msra.mxu1 %v4081_v39  ;;  %v4100_v39 = vld [vmem:[%s6541_s3 + $0x3] ss:$0 sm:$0xff] }
 0x2b6   : > { %4448 = vmatpush3.msra.mxu0 %v4075_v40  ;;  %4458 = vmatprep.subr.mxu1 %v4962_v26 }
 0x2b7   : > { %4449 = vmatprep.subr.mxu0 %v4962_v26  ;;  %4459 = vmatpush3.msra.mxu1 %v4080_v41 }
 0x2b8   : > { %4450 = vmatpush3.msra.mxu0 %v4074_v42  ;;  %4451 = vmatprep.mubr.msk.f32.mxu0 %vm4963_vm5, %v4962_v26 }
 0x2b9   : > { %4460 = vmatprep.subr.mxu1 %v4962_v26  ;;  %4452 = vmatmul.mubr.msk.f32.vlgmr.msra.gmra.mxu0 %vm108_vm0, %v5986_v33 }
 0x2ba   : > { %4461 = vmatpush3.msra.mxu1 %v4079_v43  ;;  %4462 = vmatprep.mubr.msk.f32.mxu1 %vm4963_vm5, %v4962_v26 }
 0x2bb   : > { %4465 = vmatprep.subr.mxu0 %v4962_v26  ;;  %4463 = vmatmul.mubr.msk.f32.vlgmr.msra.gmra.mxu1 %vm108_vm0, %v5997_v5 }
 0x2bc   : > { %4466 = vmatpush3.msra.mxu0 %v4084_v15  ;;  %4470 = vmatprep.subr.mxu1 %v4962_v26 }
 0x2bd   : > { %4467 = vmatprep.mubr.msk.f32.mxu0 %vm4963_vm5, %v4962_v26  ;;  %4471 = vmatpush3.msra.mxu1 %v4091_v44 }
 0x2be   : > { %4481 = vmatprep.subr.mxu0 %v4962_v26  ;;  %4472 = vmatprep.subr.mxu1 %v4962_v26 }
 0x2bf   : > { %4468 = vmatmul.mubr.msk.f32.vlgmr.msra.gmra.mxu0 %vm209_vm2, %v4936_v24  ;;  %4473 = vmatpush3.msra.mxu1 %v4090_v45 }
 0x2c0   : > { %4482 = vmatpush3.msra.mxu0 %v4096_v46  ;;  %4474 = vmatprep.subr.mxu1 %v4962_v26 }
 0x2c1   : > { %4483 = vmatprep.subr.mxu0 %v4962_v26  ;;  %4475 = vmatpush3.msra.mxu1 %v4089_v47 }
 0x2c2   : > { %4484 = vmatpush3.msra.mxu0 %v4095_v48  ;;  %4476 = vmatprep.subr.mxu1 %v4962_v26 }
 0x2c3   : > { %4485 = vmatprep.subr.mxu0 %v4962_v26  ;;  %4477 = vmatpush3.msra.mxu1 %v4088_v49 }
 0x2c4   : > { %4478 = vmatprep.mubr.msk.f32.mxu1 %vm4963_vm5, %v4962_v26  ;;  %4486 = vmatpush3.msra.mxu0 %v4094_v50 }
 0x2c5   : > { %4479 = vmatmul.mubr.msk.f32.vlgmr.msra.gmra.mxu1 %vm108_vm0, %v5986_v33  ;;  %4487 = vmatprep.subr.mxu0 %v4962_v26 }
 0x2c6   : > { %4489 = vmatprep.mubr.msk.f32.mxu0 %vm4963_vm5, %v4962_v26  ;;  %4488 = vmatpush3.msra.mxu0 %v4093_v51 }
 0x2c7   : > { %4492 = vmatprep.subr.mxu1 %v4962_v26  ;;  %4490 = vmatmul.mubr.msk.f32.vlgmr.msra.gmra.mxu0 %vm108_vm0, %v5997_v5 }
 0x2c8   : > { %4493 = vmatpush3.msra.mxu1 %v4098_v52  ;;  %4497 = vmatprep.subr.mxu0 %v4962_v26 }
 0x2c9   : > { %4494 = vmatprep.mubr.msk.f32.mxu1 %vm4963_vm5, %v4962_v26  ;;  %4498 = vmatpush3.msra.mxu0 %v4105_v53 }
 0x2ca   : > { %4508 = vmatprep.subr.mxu1 %v4962_v26  ;;  %4495 = vmatmul.mubr.msk.f32.vlgmr.msra.gmra.mxu1 %vm209_vm2, %v4936_v24 }
 0x2cb   : > { %4499 = vmatprep.subr.mxu0 %v4962_v26  ;;  %4509 = vmatpush3.msra.mxu1 %v4110_v54 }
 0x2cc   : > { %4500 = vmatpush3.msra.mxu0 %v4104_v55  ;;  %4510 = vmatprep.subr.mxu1 %v4962_v26 }
 0x2cd   : > { %4501 = vmatprep.subr.mxu0 %v4962_v26  ;;  %4511 = vmatpush3.msra.mxu1 %v4109_v56 }
 0x2ce   : > { %4502 = vmatpush3.msra.mxu0 %v4103_v57  ;;  %4512 = vmatprep.subr.mxu1 %v4962_v26 }
 0x2cf   : > { %4503 = vmatprep.subr.mxu0 %v4962_v26  ;;  %4513 = vmatpush3.msra.mxu1 %v4108_v58 }
 0x2d0   : > { %4504 = vmatpush3.msra.mxu0 %v4102_v59  ;;  %4505 = vmatprep.mubr.msk.f32.mxu0 %vm4963_vm5, %v4962_v26 }
 0x2d1   : > { %4514 = vmatprep.subr.mxu1 %v4962_v26  ;;  %4506 = vmatmul.mubr.msk.f32.vlgmr.msra.gmra.mxu0 %vm108_vm0, %v5986_v33 }
 0x2d2   : > { %4515 = vmatpush3.msra.mxu1 %v4107_v60  ;;  %4516 = vmatprep.mubr.msk.f32.mxu1 %vm4963_vm5, %v4962_v26 }
 0x2d3   : > { %4519 = vmatprep.subr.mxu0 %v4962_v26  ;;  %4517 = vmatmul.mubr.msk.f32.vlgmr.msra.gmra.mxu1 %vm108_vm0, %v5997_v5 }
 0x2d4   : > { %4521 = vmatprep.mubr.msk.f32.mxu0 %vm4963_vm5, %v4962_v26  ;;  %4520 = vmatpush3.msra.mxu0 %v2543_v61 }
 0x366   : > { %v1660_v62 = vpop.f32.mrf.mxu0 }
 0x367   : > { %v1661_v2 = vadd.f32 %v4066_v0, %v1660_v62  ;;  %v6182_v62 = vmov (%p1570_p2), 0.0   ;;  %v6186_v0 = vmov (%p1570_p2), 0.0  }
 0x368   : > { %v4415_v63 = vpop.f32.mrf.mxu0 }
 0x369   :  { %v6184_v63 = vmov (%p1570_p2), 0.0  }
 0x36d   : > { %v1738_v3 = vpop.f32.mrf.mxu1 }
 0x36e   : > { %v1742_v4 = vadd.f32 %v1738_v3, %v1661_v2 }
 0x36f   : > { %v4426_v6 = vpop.f32.mrf.mxu1  ;;  %v1816_v7 = vpop.f32.mrf.mxu0 }
 0x370   : > { %v1820_v8 = vadd.f32 %v1816_v7, %v1742_v4 }
 0x371   : > { %v4437_v9 = vpop.f32.mrf.mxu0 }
 0x372   : > { %v1903_v10 = vpop.f32.mrf.mxu1  ;;  %v1821_v11 = vsub.f32 0.0, %v1820_v8 }
 0x373   : > { %v1904_v16 = vadd.f32 %v4072_v1, %v1903_v10 }
 0x374   : > { %v4442_v13 = vpop.f32.mrf.mxu1  ;;  %v1822_v14 = vmul.f32 1.442695, %v1821_v11 }
 0x376   : > { %4810 = vpow2.f32 %v1822_v14 }
 0x379   : > { %v1978_v17 = vpop.f32.mrf.mxu0 }
 0x37a   : > { %v1982_v18 = vadd.f32 %v1978_v17, %v1904_v16 }
 0x37b   : > { %v2054_v19 = vpop.f32.mrf.mxu1  ;;  %v4453_v20 = vpop.f32.mrf.mxu0 }
 0x37c   : > { %v2058_v21 = vadd.f32 %v2054_v19, %v1982_v18 }
 0x37d   : > { %v4464_v24 = vpop.f32.mrf.mxu1 }
 0x37e   : > { %v2059_v12 = vsub.f32 0.0, %v2058_v21 }
 0x37f   : > { %v2141_v25 = vpop.f32.mrf.mxu0 }
 0x380   : > { %v2060_v26 = vmul.f32 1.442695, %v2059_v12  ;;  %v2142_v31 = vadd.f32 %v4086_v28, %v2141_v25 }
 0x381   : > { %v4469_v27 = vpop.f32.mrf.mxu0 }
 0x382   : > { %4812 = vpow2.f32 %v2060_v26 }
 0x383   : > { %v4811_v33 = vpop.eup %4810 }
 0x384   : > { %v1824_v36 = vadd.f32 1.0, %v4811_v33 }
 0x385   : > { %v2216_v29 = vpop.f32.mrf.mxu1 }
 0x386   : > { %v2220_v34 = vadd.f32 %v2216_v29, %v2142_v31  ;;  %4814 = vrcp.f32 %v1824_v36 }
 0x387   : > { %v4480_v30 = vpop.f32.mrf.mxu1  ;;  %v2292_v32 = vpop.f32.mrf.mxu0 }
 0x388   : > { %v2296_v38 = vadd.f32 %v2292_v32, %v2220_v34 }
 0x389   : > { %v4491_v5 = vpop.f32.mrf.mxu0 }
 0x38a   : > { %v2374_v35 = vpop.f32.mrf.mxu1  ;;  %4816 = vtanh.f32 %v2296_v38 }
 0x38b   : > { %v2375_v42 = vadd.f32 %v4100_v39, %v2374_v35 }
 0x38c   : > { %v4496_v37 = vpop.f32.mrf.mxu1 }
 0x38f   : > { %v4813_v40 = vpop.eup %4812 }
 0x390   : > { %v2062_v41 = vadd.f32 1.0, %v4813_v40 }
 0x391   : > { %v2449_v43 = vpop.f32.mrf.mxu0 }
 0x392   : > { %4818 = vrcp.f32 %v2062_v41  ;;  %v2453_v15 = vadd.f32 %v2449_v43, %v2375_v42 }
 0x393   : > { %v2525_v44 = vpop.f32.mrf.mxu1  ;;  %v4507_v45 = vpop.f32.mrf.mxu0 }
 0x394   : > { %v2529_v46 = vadd.f32 %v2525_v44, %v2453_v15  ;;  %v4815_v50 = vpop.eup %4814 }
 0x395   : > { %v4518_v47 = vpop.f32.mrf.mxu1 }
 0x396   : > { %v2530_v48 = vsub.f32 0.0, %v2529_v46 }
 0x397   : > { %v4817_v51 = vpop.eup %4816 }
 0x398   : > { %v2531_v49 = vmul.f32 1.442695, %v2530_v48  ;;  %v2537_v54 = vmul.f32 %v4817_v51, %v4815_v50 }
 0x39a   : > { %4820 = vpow2.f32 %v2531_v49 }
 0x39f   : > { %v4819_v52 = vpop.eup %4818 }
 0x3a0   : > { %v2536_v53 = vmul.f32 %v4932_v23, %v4819_v52 }
 0x3a2   : > { %v2538_v23 = vadd.f32 %v2537_v54, %v2536_v53  }
 0x3a4   : > { %4822 = vtanh.f32 %v2538_v23 }
 0x3a7   : > { %v4821_v55 = vpop.eup %4820 }
 0x3a8   : > { %v2533_v56 = vadd.f32 1.0, %v4821_v55 }
 0x3aa   : > { %4824 = vrcp.f32 %v2533_v56 }
 0x3b1   : > { %v4823_v57 = vpop.eup %4822 }
 0x3b7   : > { %v4825_v58 = vpop.eup %4824 }
 0x3b8   : > { %v2540_v24 = vmul.f32 %v4825_v58, %v4823_v57  }
 0x3ba   : > { %4522 = vmatmul.mubr.msk.f32.vlgmr.msra.gmra.mxu0 %vm209_vm2, %v2540_v24 }
 0x47a   : > { %v2613_v59 = vpop.f32.mrf.mxu0  ;;  %1572 = sbr.rel (!%p1570_p2) target bundleno = 670 (0x29e), region = 226 }
 0x47b   : > { %v6170_v22 = vadd.f32 %v4928_v22, %v2613_v59  }
 0x47c   : > { %v4523_v61 = vpop.f32.mrf.mxu0 }
 0x47d   : > { %v6542_v60 = vmov %v6170_v22 }
 0x47e   : > { %v6543_v22 = vmov %v6542_v60 }
 0x47f LB: > { %v2633_v22 = vld [vmem:[%s6495_s13] sm:$0xff]  ;;  %v2718_v23 = vld [vmem:[%s6493_s11 + $0x18] sm:$0xff]  ;;  %v4964_v2 = vmov 0.0   ;;  %vm4965_vm6 = vmmov 0   ;;  %v2717_v3 = vld [vmem:[%s6493_s11 + $0x10] sm:$0xff]  ;;  %s2627_s6 = ssub.s32 29, %s4956_s8  ;;  %s4956_s8 = sphi %s6188_s8, %s2623_s8   ;;  %v4952_v0 = vphi %v6186_v0, %v3591_v0   ;;  %v4948_v63 = vphi %v6184_v63, %v3589_v63   ;;  %v4944_v62 = vphi %v6182_v62, %v6544_v62  }
 0x480   : > { %4524 = vmatprep.subr.mxu0 %v4964_v2  ;;  %4529 = vmatprep.subr.mxu1 %v4964_v2  ;;  %v2797_v4 = vld [vmem:[%s6494_s12 + $0x18] sm:$0xff]  ;;  %s4114_s3 = sshll.u32 %s2627_s6, 1  ;;  %v2716_v6 = vld [vmem:[%s6493_s11 + $0x8] sm:$0xff]  ;;  %v2796_v7 = vld [vmem:[%s6494_s12 + $0x10] sm:$0xff]  ;;  %s4161_s15 = sshll.u32 %s2627_s6, 3 }
 0x481   : > { %4525 = vmatpush3.msra.mxu0 %v2633_v22  ;;  %4526 = vmatprep.mubr.msk.f32.mxu0 %vm4965_vm6, %v4964_v2  ;;  %v2715_v8 = vld [vmem:[%s6493_s11] sm:$0xff]  ;;  %v2795_v9 = vld [vmem:[%s6494_s12 + $0x8] sm:$0xff]  ;;  %s2629_s9 = scalar_lea.vmem [#allocation2], %s4114_s3  ;;  %s2631_s30 = scalar_lea.vmem [#allocation3], %s4114_s3  ;;  %v4126_v14 = vld [vmem:[%s6493_s11 + $0x38] sm:$0xff] }
 0x482   : > { %4530 = vmatpush3.msra.mxu1 %v2718_v23  ;;  %4527 = vmatmul.mubr.msk.f32.vlgmr.msra.gmra.mxu0 %vm209_vm2, %v4952_v0  ;;  %v6239_v10 = vld [vmem:[%s2629_s9] sm:$0x3]  ;;  %v4119_v1 = vld [vmem:[%s6495_s13 + $0x8] sm:$0xff]  ;;  %v4131_v16 = vld [vmem:[%s6494_s12 + $0x38] sm:$0xff]  ;;  %s3593_s28 = scalar_lea.vmem %s6498_s16, %s4161_s15  ;;  %s2623_s8 = sadd.s32 1, %s4956_s8  }
 0x483   : > { %4531 = vmatprep.subr.mxu1 %v4964_v2  ;;  %4540 = vmatprep.subr.mxu0 %v4964_v2  ;;  %v2794_v11 = vld [vmem:[%s6494_s12] sm:$0xff]  ;;  %v4125_v17 = vld [vmem:[%s6493_s11 + $0x30] sm:$0xff]  ;;  %v4124_v19 = vld [vmem:[%s6493_s11 + $0x28] sm:$0xff]  ;;  %p2620_p3 = scmp.ge.s32.totalorder %s2623_s8, 30  }
 0x484   : > { %4532 = vmatpush3.msra.mxu1 %v2717_v3  ;;  %4541 = vmatpush3.msra.mxu0 %v2797_v4  ;;  %v6250_v13 = vld [vmem:[%s2631_s30] sm:$0x3]  ;;  %v4130_v18 = vld [vmem:[%s6494_s12 + $0x30] sm:$0xff]  ;;  %v4129_v20 = vld [vmem:[%s6494_s12 + $0x28] sm:$0xff]  ;;  %vm4967_vm7 = vmmov (%p2620_p3), 0   ;;  %vm3710_vm8 = vcmask (%p2620_p3), 523264  }
 0x485   : > { %4533 = vmatprep.subr.mxu1 %v4964_v2  ;;  %4542 = vmatprep.subr.mxu0 %v4964_v2  ;;  %v4123_v21 = vld [vmem:[%s6493_s11 + $0x20] sm:$0xff]  ;;  %v4133_v12 = vld [vmem:[%s6495_s13 + $0x10] sm:$0xff]  ;;  %v4140_v25 = vld [vmem:[%s6493_s11 + $0x58] sm:$0xff]  ;;  %vm3809_vm9 = vcmask (%p2620_p3), 58368   ;;  %vm3827_vm10 = vcmask (%p2620_p3), 1024  }
 0x486   : > { %4534 = vmatpush3.msra.mxu1 %v2716_v6  ;;  %4543 = vmatpush3.msra.mxu0 %v2796_v7  ;;  %v4128_v24 = vld [vmem:[%s6494_s12 + $0x20] sm:$0xff]  ;;  %v4139_v26 = vld [vmem:[%s6493_s11 + $0x50] sm:$0xff]  ;;  %v4145_v27 = vld [vmem:[%s6494_s12 + $0x58] sm:$0xff] }
 0x487   : > { %4535 = vmatprep.subr.mxu1 %v4964_v2  ;;  %4544 = vmatprep.subr.mxu0 %v4964_v2  ;;  %v4138_v28 = vld [vmem:[%s6493_s11 + $0x48] sm:$0xff]  ;;  %v4144_v29 = vld [vmem:[%s6494_s12 + $0x50] sm:$0xff]  ;;  %v4137_v30 = vld [vmem:[%s6493_s11 + $0x40] sm:$0xff] }
 0x488   : > { %4536 = vmatpush3.msra.mxu1 %v2715_v8  ;;  %4537 = vmatprep.mubr.msk.f32.mxu1 %vm4965_vm6, %v4964_v2  ;;  %v4143_v31 = vld [vmem:[%s6494_s12 + $0x48] sm:$0xff]  ;;  %v4142_v32 = vld [vmem:[%s6494_s12 + $0x40] sm:$0xff]  ;;  %v4147_v33 = vld [vmem:[%s6495_s13 + $0x18] sm:$0xff] }
 0x489   : > { %4545 = vmatpush3.msra.mxu0 %v2795_v9  ;;  %4538 = vmatmul.mubr.msk.f32.vlgmr.msra.gmra.mxu1 %vm108_vm0, %v6239_v10  ;;  %v4154_v34 = vld [vmem:[%s6493_s11 + $0x78] sm:$0xff]  ;;  %v4153_v35 = vld [vmem:[%s6493_s11 + $0x70] sm:$0xff]  ;;  %v4152_v37 = vld [vmem:[%s6493_s11 + $0x68] sm:$0xff] }
 0x48a   : > { %4546 = vmatprep.subr.mxu0 %v4964_v2  ;;  %4548 = vmatprep.mubr.msk.f32.mxu0 %vm4965_vm6, %v4964_v2  ;;  %v4159_v5 = vld [vmem:[%s6494_s12 + $0x78] sm:$0xff]  ;;  %v4158_v36 = vld [vmem:[%s6494_s12 + $0x70] sm:$0xff]  ;;  %v4157_v38 = vld [vmem:[%s6494_s12 + $0x68] sm:$0xff] }
 0x48b   : > { %4547 = vmatpush3.msra.mxu0 %v2794_v11  ;;  %4551 = vmatprep.subr.mxu1 %v4964_v2  ;;  %v4151_v39 = vld [vmem:[%s6493_s11 + $0x60] sm:$0xff] }
 0x48c   : > { %4549 = vmatmul.mubr.msk.f32.vlgmr.msra.gmra.mxu0 %vm108_vm0, %v6250_v13  ;;  %4552 = vmatpush3.msra.mxu1 %v4119_v1  ;;  %v4156_v40 = vld [vmem:[%s6494_s12 + $0x60] sm:$0xff] }
 0x48d   : > { %4556 = vmatprep.subr.mxu0 %v4964_v2  ;;  %4553 = vmatprep.mubr.msk.f32.mxu1 %vm4965_vm6, %v4964_v2  ;;  %v3594_v41 = vld [vmem:[%s3593_s28] sm:$0xff] }
 0x48e   : > { %4557 = vmatpush3.msra.mxu0 %v4126_v14  ;;  %4567 = vmatprep.subr.mxu1 %v4964_v2  ;;  %v4115_v15 = vld [vmem:[%s6496_s14] ss:$0 sm:$0xff]  ;;  %v4121_v54 = vld [vmem:[%s6496_s14 + $0x1] ss:$0 sm:$0xff]  ;;  %v4135_v6 = vld [vmem:[%s6496_s14 + $0x2] ss:$0 sm:$0xff] }
 0x48f   : > { %4554 = vmatmul.mubr.msk.f32.vlgmr.msra.gmra.mxu1 %vm209_vm2, %v4952_v0  ;;  %4558 = vmatprep.subr.mxu0 %v4964_v2 }
 0x490   : > { %4568 = vmatpush3.msra.mxu1 %v4131_v16  ;;  %4559 = vmatpush3.msra.mxu0 %v4125_v17 }
 0x491   : > { %4569 = vmatprep.subr.mxu1 %v4964_v2  ;;  %4560 = vmatprep.subr.mxu0 %v4964_v2 }
 0x492   : > { %4570 = vmatpush3.msra.mxu1 %v4130_v18  ;;  %4561 = vmatpush3.msra.mxu0 %v4124_v19  ;;  %v4149_v19 = vld [vmem:[%s6496_s14 + $0x3] ss:$0 sm:$0xff] }
 0x493   : > { %4571 = vmatprep.subr.mxu1 %v4964_v2  ;;  %4562 = vmatprep.subr.mxu0 %v4964_v2 }
 0x494   : > { %4572 = vmatpush3.msra.mxu1 %v4129_v20  ;;  %4563 = vmatpush3.msra.mxu0 %v4123_v21 }
 0x495   : > { %4564 = vmatprep.mubr.msk.f32.mxu0 %vm4965_vm6, %v4964_v2  ;;  %4573 = vmatprep.subr.mxu1 %v4964_v2 }
 0x496   : > { %4565 = vmatmul.mubr.msk.f32.vlgmr.msra.gmra.mxu0 %vm108_vm0, %v6239_v10  ;;  %4574 = vmatpush3.msra.mxu1 %v4128_v24 }
 0x497   : > { %4575 = vmatprep.mubr.msk.f32.mxu1 %vm4965_vm6, %v4964_v2  ;;  %4578 = vmatprep.subr.mxu0 %v4964_v2 }
 0x498   : > { %4576 = vmatmul.mubr.msk.f32.vlgmr.msra.gmra.mxu1 %vm108_vm0, %v6250_v13  ;;  %4579 = vmatpush3.msra.mxu0 %v4133_v12 }
 0x499   : > { %4583 = vmatprep.subr.mxu1 %v4964_v2  ;;  %4580 = vmatprep.mubr.msk.f32.mxu0 %vm4965_vm6, %v4964_v2 }
 0x49a   : > { %4584 = vmatpush3.msra.mxu1 %v4140_v25  ;;  %4594 = vmatprep.subr.mxu0 %v4964_v2 }
 0x49b   : > { %4585 = vmatprep.subr.mxu1 %v4964_v2  ;;  %4581 = vmatmul.mubr.msk.f32.vlgmr.msra.gmra.mxu0 %vm209_vm2, %v4952_v0 }
 0x49c   : > { %4586 = vmatpush3.msra.mxu1 %v4139_v26  ;;  %4595 = vmatpush3.msra.mxu0 %v4145_v27 }
 0x49d   : > { %4587 = vmatprep.subr.mxu1 %v4964_v2  ;;  %4596 = vmatprep.subr.mxu0 %v4964_v2 }
 0x49e   : > { %4588 = vmatpush3.msra.mxu1 %v4138_v28  ;;  %4597 = vmatpush3.msra.mxu0 %v4144_v29 }
 0x49f   : > { %4589 = vmatprep.subr.mxu1 %v4964_v2  ;;  %4598 = vmatprep.subr.mxu0 %v4964_v2 }
 0x4a0   : > { %4590 = vmatpush3.msra.mxu1 %v4137_v30  ;;  %4591 = vmatprep.mubr.msk.f32.mxu1 %vm4965_vm6, %v4964_v2 }
 0x4a1   : > { %4599 = vmatpush3.msra.mxu0 %v4143_v31  ;;  %4592 = vmatmul.mubr.msk.f32.vlgmr.msra.gmra.mxu1 %vm108_vm0, %v6239_v10 }
 0x4a2   : > { %4600 = vmatprep.subr.mxu0 %v4964_v2  ;;  %4602 = vmatprep.mubr.msk.f32.mxu0 %vm4965_vm6, %v4964_v2 }
 0x4a3   : > { %4601 = vmatpush3.msra.mxu0 %v4142_v32  ;;  %4605 = vmatprep.subr.mxu1 %v4964_v2 }
 0x4a4   : > { %4603 = vmatmul.mubr.msk.f32.vlgmr.msra.gmra.mxu0 %vm108_vm0, %v6250_v13  ;;  %4606 = vmatpush3.msra.mxu1 %v4147_v33 }
 0x4a5   : > { %4610 = vmatprep.subr.mxu0 %v4964_v2  ;;  %4607 = vmatprep.mubr.msk.f32.mxu1 %vm4965_vm6, %v4964_v2 }
 0x4a6   : > { %4611 = vmatpush3.msra.mxu0 %v4154_v34  ;;  %4621 = vmatprep.subr.mxu1 %v4964_v2 }
 0x4a7   : > { %4608 = vmatmul.mubr.msk.f32.vlgmr.msra.gmra.mxu1 %vm209_vm2, %v4952_v0  ;;  %4612 = vmatprep.subr.mxu0 %v4964_v2 }
 0x4a8   : > { %4622 = vmatpush3.msra.mxu1 %v4159_v5  ;;  %4613 = vmatpush3.msra.mxu0 %v4153_v35 }
 0x4a9   : > { %4623 = vmatprep.subr.mxu1 %v4964_v2  ;;  %4614 = vmatprep.subr.mxu0 %v4964_v2 }
 0x4aa   : > { %4624 = vmatpush3.msra.mxu1 %v4158_v36  ;;  %4615 = vmatpush3.msra.mxu0 %v4152_v37 }
 0x4ab   : > { %4625 = vmatprep.subr.mxu1 %v4964_v2  ;;  %4616 = vmatprep.subr.mxu0 %v4964_v2 }
 0x4ac   : > { %4626 = vmatpush3.msra.mxu1 %v4157_v38  ;;  %4617 = vmatpush3.msra.mxu0 %v4151_v39 }
 0x4ad   : > { %4618 = vmatprep.mubr.msk.f32.mxu0 %vm4965_vm6, %v4964_v2  ;;  %4627 = vmatprep.subr.mxu1 %v4964_v2 }
 0x4ae   : > { %4619 = vmatmul.mubr.msk.f32.vlgmr.msra.gmra.mxu0 %vm108_vm0, %v6239_v10  ;;  %4628 = vmatpush3.msra.mxu1 %v4156_v40 }
 0x4af   : > { %4629 = vmatprep.mubr.msk.f32.mxu1 %vm4965_vm6, %v4964_v2  ;;  %4632 = vmatprep.subr.mxu0 %v4964_v2 }
 0x4b0   : > { %4630 = vmatmul.mubr.msk.f32.vlgmr.msra.gmra.mxu1 %vm108_vm0, %v6250_v13  ;;  %4634 = vmatprep.mubr.msk.f32.mxu0 %vm4965_vm6, %v4964_v2 }
 0x4b1   : > { %4633 = vmatpush3.msra.mxu0 %v3594_v41 }
 0x542   : > { %v2711_v42 = vpop.f32.mrf.mxu0 }
 0x543   : > { %v2712_v44 = vadd.f32 %v4115_v15, %v2711_v42 }
 0x544   : > { %v4528_v43 = vpop.f32.mrf.mxu0 }
 0x545   :  { %v3702_v43 = vld [vmem:[%s6502_s20 + $0x38] sm:$0xff] (%p2620_p3) }
 0x549   : > { %v2789_v45 = vpop.f32.mrf.mxu1 }
 0x54a   : > { %v2793_v46 = vadd.f32 %v2789_v45, %v2712_v44  ;;  %v4966_v44 = vmov (%p2620_p3), 0.0   ;;  %v3701_v45 = vld [vmem:[%s6502_s20 + $0x30] sm:$0xff] (%p2620_p3) }
 0x54b   : > { %v4539_v47 = vpop.f32.mrf.mxu1  ;;  %4637 = vmatprep.subr.mxu0 (%p2620_p3), %v4966_v44 }
 0x54c   : > { %v2867_v48 = vpop.f32.mrf.mxu0  ;;  %v3699_v47 = vld [vmem:[%s6502_s20 + $0x20] sm:$0xff] (%p2620_p3) }
 0x54d   : > { %v2871_v49 = vadd.f32 %v2867_v48, %v2793_v46  ;;  %v4163_v46 = vld [vmem:[%s6499_s17] ss:$0 sm:$0xff] (%p2620_p3) }
 0x54e   : > { %v4550_v50 = vpop.f32.mrf.mxu0 }
 0x54f   : > { %v2954_v51 = vpop.f32.mrf.mxu1  ;;  %v2872_v52 = vsub.f32 0.0, %v2871_v49  ;;  %v4165_v49 = vld [vmem:[%s6501_s19] ss:$0 sm:$0xff] (%p2620_p3)  ;;  %v3698_v50 = vld [vmem:[%s6502_s20 + $0x18] sm:$0xff] (%p2620_p3) }
 0x550   : > { %v2955_v56 = vadd.f32 %v4121_v54, %v2954_v51  ;;  %v3697_v51 = vld [vmem:[%s6502_s20 + $0x10] sm:$0xff] (%p2620_p3)  ;;  %v3695_v54 = vld [vmem:[%s6502_s20] sm:$0xff] (%p2620_p3) }
 0x551   : > { %v4555_v53 = vpop.f32.mrf.mxu1  ;;  %v2873_v55 = vmul.f32 1.442695, %v2872_v52 }
 0x552   :  { %v3696_v53 = vld [vmem:[%s6502_s20 + $0x8] sm:$0xff] (%p2620_p3) }
 0x553   : > { %4826 = vpow2.f32 %v2873_v55 }
 0x556   : > { %v3029_v57 = vpop.f32.mrf.mxu0 }
 0x557   : > { %v3033_v58 = vadd.f32 %v3029_v57, %v2955_v56  ;;  %v4166_v56 = vld [vmem:[%s6503_s21] ss:$0 sm:$0xff] (%p2620_p3) }
 0x558   : > { %v3105_v59 = vpop.f32.mrf.mxu1  ;;  %v4566_v61 = vpop.f32.mrf.mxu0 }
 0x559   : > { %v3109_v0 = vadd.f32 %v3105_v59, %v3033_v58  ;;  %v4168_v58 = vld [vmem:[%s6504_s22] ss:$0 sm:$0xff] (%p2620_p3) }
 0x55a   : > { %v4577_v22 = vpop.f32.mrf.mxu1 }
 0x55b   : > { %v3110_v23 = vsub.f32 0.0, %v3109_v0  ;;  %v3192_v2 = vpop.f32.mrf.mxu0 }
 0x55c   : > { %v3193_v9 = vadd.f32 %v4135_v6, %v3192_v2  ;;  %v4170_v2 = vld [vmem:[%s6506_s24] ss:$0 sm:$0xff] (%p2620_p3) }
 0x55d   : > { %v3111_v3 = vmul.f32 1.442695, %v3110_v23  ;;  %v4582_v4 = vpop.f32.mrf.mxu0 }
 0x55f   : > { %4828 = vpow2.f32 %v3111_v3 }
 0x560   : > { %v4827_v11 = vpop.eup %4826 }
 0x561   : > { %v3267_v7 = vpop.f32.mrf.mxu1  ;;  %v2875_v16 = vadd.f32 1.0, %v4827_v11 }
 0x562   : > { %v3271_v13 = vadd.f32 %v3267_v7, %v3193_v9  ;;  %v4171_v7 = vld [vmem:[#allocation4] ss:$0 sm:$0xff] (%p2620_p3) }
 0x563   : > { %v4593_v8 = vpop.f32.mrf.mxu1  ;;  %4830 = vrcp.f32 %v2875_v16 }
 0x564   : > { %v3343_v10 = vpop.f32.mrf.mxu0 }
 0x565   : > { %v3347_v18 = vadd.f32 %v3343_v10, %v3271_v13 }
 0x566   : > { %v4604_v1 = vpop.f32.mrf.mxu0 }
 0x567   : > { %v3425_v14 = vpop.f32.mrf.mxu1  ;;  %4832 = vtanh.f32 %v3347_v18 }
 0x568   : > { %v3426_v24 = vadd.f32 %v4149_v19, %v3425_v14 }
 0x569   : > { %v4609_v17 = vpop.f32.mrf.mxu1 }
 0x56c   : > { %v4829_v20 = vpop.eup %4828 }
 0x56d   : > { %v3113_v21 = vadd.f32 1.0, %v4829_v20 }
 0x56e   : > { %v3500_v12 = vpop.f32.mrf.mxu0 }
 0x56f   : > { %4834 = vrcp.f32 %v3113_v21  ;;  %v3504_v25 = vadd.f32 %v3500_v12, %v3426_v24 }
 0x570   : > { %v3576_v26 = vpop.f32.mrf.mxu1  ;;  %v4620_v27 = vpop.f32.mrf.mxu0 }
 0x571   : > { %v3580_v28 = vadd.f32 %v3576_v26, %v3504_v25  ;;  %v4831_v32 = vpop.eup %4830 }
 0x572   : > { %v4631_v29 = vpop.f32.mrf.mxu1 }
 0x573   : > { %v3581_v30 = vsub.f32 0.0, %v3580_v28 }
 0x574   : > { %v4833_v33 = vpop.eup %4832 }
 0x575   : > { %v3582_v31 = vmul.f32 1.442695, %v3581_v30  ;;  %v3588_v35 = vmul.f32 %v4833_v33, %v4831_v32 }
 0x577   : > { %4836 = vpow2.f32 %v3582_v31 }
 0x57c   : > { %v4835_v34 = vpop.eup %4834 }
 0x57d   : > { %v3587_v5 = vmul.f32 %v4948_v63, %v4835_v34 }
 0x57f   : > { %v3589_v63 = vadd.f32 %v3588_v35, %v3587_v5  }
 0x581   : > { %4838 = vtanh.f32 %v3589_v63 }
 0x584   : > { %v4837_v36 = vpop.eup %4836 }
 0x585   : > { %v3584_v37 = vadd.f32 1.0, %v4837_v36 }
 0x587   : > { %4840 = vrcp.f32 %v3584_v37 }
 0x58e   : > { %v4839_v38 = vpop.eup %4838 }
 0x594   : > { %v4841_v39 = vpop.eup %4840 }
 0x595   : > { %v3591_v0 = vmul.f32 %v4841_v39, %v4839_v38  }
 0x597   : > { %4635 = vmatmul.mubr.msk.f32.vlgmr.msra.gmra.mxu0 %vm209_vm2, %v3591_v0  ;;  %v4169_v0 = vld [vmem:[%s6505_s23] ss:$0 sm:$0xff] (%p2620_p3) }
 0x598   :  { %4653 = vmatprep.mubr.msk.f32.mxu0 (%p2620_p3), %vm4967_vm7, %v4966_v44  ;;  %4638 = vmatpush3.msra.mxu0 (%p2620_p3), %v3702_v43 }
 0x599   :  { %4639 = vmatprep.subr.mxu0 (%p2620_p3), %v4966_v44 }
 0x59a   :  { %4640 = vmatpush3.msra.mxu0 (%p2620_p3), %v3701_v45 }
 0x59b   :  { %4641 = vmatprep.subr.mxu0 (%p2620_p3), %v4966_v44 }
 0x656   :  { %2622 = sbr.rel (!%p2620_p3) target bundleno = 1151 (0x47f), region = 237 }
 0x657   : > { %v3664_v40 = vpop.f32.mrf.mxu0 }
 0x658   : > { %v3668_v41 = vadd.f32 %v4944_v62, %v3664_v40  }
 0x659   : > { %v4636_v42 = vpop.f32.mrf.mxu0 }
 0x65a   : > { %v6544_v62 = vmov %v3668_v41  ;;  %v3669_v15 = vadd.f32 (%p2620_p3), %v3668_v41, %v6542_v60  ;;  %v4164_v60 = vld [vmem:[%s6500_s18] ss:$0 sm:$0xff] (%p2620_p3) }
 0x65b   :  { %v3700_v62 = vld [vmem:[%s6502_s20 + $0x28] sm:$0xff] }
 0x65c   :  { %v3677_v63 = vadd.f32 %v4163_v46, %v3669_v15  ;;  %4642 = vmatpush3.msra.mxu0 %v3700_v62 }
 0x65d   :  { %4643 = vmatprep.subr.mxu0 %v4966_v44 }
 0x65e   :  { %v3685_v48 = vmul.f32 %v4164_v60, %v3677_v63  ;;  %4644 = vmatpush3.msra.mxu0 %v3699_v47 }
 0x65f   :  { %4645 = vmatprep.subr.mxu0 %v4966_v44 }
 0x660   :  { %v3693_v52 = vadd.f32 %v4165_v49, %v3685_v48  ;;  %4646 = vmatpush3.msra.mxu0 %v3698_v50 }
 0x661   :  { %4647 = vmatprep.subr.mxu0 %v4966_v44 }
 0x662   :  { %4648 = vmatpush3.msra.mxu0 %v3697_v51  ;;  %v3694_v55 = vmax.f32 %v3693_v52, 0.0 }
 0x663   :  { %4649 = vmatprep.subr.mxu0 %v4966_v44 }
 0x664   :  { %4650 = vmatpush3.msra.mxu0 %v3696_v53 }
 0x665   :  { %4651 = vmatprep.subr.mxu0 %v4966_v44 }
 0x666   :  { %4652 = vmatpush3.msra.mxu0 %v3695_v54 }
 0x667   :  { %4654 = vmatmul.mubr.msk.f32.vlgmr.msra.gmra.mxu0 %vm3710_vm8, %v3694_v55 }
 0x727   :  { %v3780_v57 = vpop.f32.mrf.mxu0 }
 0x728   :  { %v3781_v59 = vadd.f32 %v4166_v56, %v3780_v57 }
 0x729   :  { %v4655_v61 = vpop.f32.mrf.mxu0 }
 0x72a   :  { %v3791_v22 = vmul.f32 %v4168_v58, %v3781_v59 }
 0x72c   :  { %v3799_v23 = vadd.f32 %v4169_v0, %v3791_v22 }
 0x72e   :  { %v3800_v3 = vmax.f32 %v3799_v23, 0.0 }
 0x730   :  { %v3808_v4 = vmul.f32 %v4170_v2, %v3800_v3 }
 0x732   :  { %v3810_v6 = vsel %vm3809_vm9, %v3808_v4, 0.0 }
 0x733   :  { %3811 = vadd.xlane.f32.xlu0 %v3810_v6 }
 0x7bc   :  { %v3812_v8 = vpop.xlane.xlu0 %3811 }
 0x7bd   :  { %v3820_v9 = vadd.f32 %v4171_v7, %v3812_v8 }
 0x7bf   :  { %v3821_v10 = vsub.f32 0.0, %v3820_v9 }
 0x7c1   :  { %v3822_v11 = vmul.f32 1.442695, %v3821_v10 }
 0x7c3   :  { %4842 = vpow2.f32 %v3822_v11 }
 0x7d0   :  { %v4843_v13 = vpop.eup %4842 }
 0x7d1   :  { %v3824_v1 = vadd.f32 1.0, %v4843_v13 }
 0x7d3   :  { %4844 = vrcp.f32 %v3824_v1 }
 0x7e0   :  { %v4845_v14 = vpop.eup %4844 }
 0x7e1   :  { %3828 = vst.msk [vmem:[%s6508_s26] sm:$0x3] %vm3827_vm10, %v4845_v14 }

</bundles_post_ra>
